<compile_context>
chip_gen: v7x
topology: tpu7x:2x2x1
jax: 0.10.0
libtpu: 0.0.40
codegen_flags: <defaults>
</compile_context>

<pallas_src>
import math

import jax
import jax.numpy as jnp
from jax.experimental import pallas as pl
from jax.experimental.pallas import tpu as pltpu

_SELU_ALPHA = 1.6732632423543772
_SELU_SCALE = 1.0507009873554805
_LANE = 128


def _round_up(v, m):
    return (v + m - 1) // m * m


def _selu(x):
    return _SELU_SCALE * jnp.where(x > 0, x, _SELU_ALPHA * (jnp.exp(x) - 1.0))


# ----------------------------- fused GRU + head kernel -----------------------------
def _gru_fused_kernel(x_ref, wih_ref, whh_ref, bih_ref, bhh_ref,
                      w1_ref, b1_ref, w2_ref, b2_ref, w3_ref, b3_ref,
                      out_ref, gx_scr, seq_scr):
    """x_ref      : (T, Bblk, Hp)   bf16, time-major, feature-padded input
       wih/whh    : (L, Hp, 3*Hp)   bf16, per-gate 128-lane blocks (order r, z, n)
       bih/bhh    : (L, 1, 3*Hp)    f32
       w1/b1..w3/b3: padded MLP head weights (bf16 / f32)
       out_ref    : (Bblk, OUTp)    f32
       gx_scr     : (T, Bblk, 3*Hp) f32 scratch (hoisted gate pre-activations)
       seq_scr    : (T, Bblk, Hp)   f32 scratch (inter-layer hidden sequence)
    """
    T, Bblk, Hp = x_ref.shape
    num_layers = wih_ref.shape[0]

    h_last = jnp.zeros((Bblk, Hp), jnp.float32)

    for layer in range(num_layers):
        # ---- hoisted input projection: ONE large MXU matmul for the whole sequence
        if layer == 0:
            seq_in = x_ref[...]                                  # (T, Bblk, Hp) bf16
        else:
            seq_in = seq_scr[...].astype(jnp.bfloat16)           # previous layer's h's
        gx = jnp.dot(seq_in.reshape(T * Bblk, Hp), wih_ref[layer],
                     preferred_element_type=jnp.float32)
        gx = gx + bih_ref[layer]                                 # (1, 3Hp) broadcast
        gx_scr[...] = gx.reshape(T, Bblk, 3 * Hp)

        whh_l = whh_ref[layer]                                   # (Hp, 3Hp) bf16
        bhh_l = bhh_ref[layer]                                   # (1, 3Hp)  f32
        keep_seq = layer < num_layers - 1                        # last layer: only h_T

        def step(t, h, whh_l=whh_l, bhh_l=bhh_l, keep_seq=keep_seq):
            gh = jnp.dot(h.astype(jnp.bfloat16), whh_l,
                         preferred_element_type=jnp.float32) + bhh_l
            gxt = gx_scr[t]                                      # (Bblk, 3Hp) f32
            r = jax.nn.sigmoid(gxt[:, 0:Hp] + gh[:, 0:Hp])
            z = jax.nn.sigmoid(gxt[:, Hp:2 * Hp] + gh[:, Hp:2 * Hp])
            n = jnp.tanh(gxt[:, 2 * Hp:3 * Hp] + r * gh[:, 2 * Hp:3 * Hp])
            h_new = (1.0 - z) * n + z * h
            if keep_seq:
                seq_scr[t] = h_new                               # stays in VMEM
            return h_new

        h = jnp.zeros((Bblk, Hp), jnp.float32)
        if T <= 32:
            # fully unrolled: lets the scheduler overlap gh matmul / EUP / stores
            for t in range(T):
                h = step(t, h)
        else:
            h = jax.lax.fori_loop(0, T, step, h)
        h_last = h

    # ---- MLP head fused on the final hidden state: fc1 -> SELU -> fc2 -> SELU -> fc3
    y = jnp.dot(h_last.astype(jnp.bfloat16), w1_ref[...],
                preferred_element_type=jnp.float32) + b1_ref[...]
    y = _selu(y)
    y = jnp.dot(y.astype(jnp.bfloat16), w2_ref[...],
                preferred_element_type=jnp.float32) + b2_ref[...]
    y = _selu(y)
    y = jnp.dot(y.astype(jnp.bfloat16), w3_ref[...],
                preferred_element_type=jnp.float32) + b3_ref[...]
    out_ref[...] = y


# ------------------------------- parameter handling -------------------------------
def init_params(key, input_size, hidden_size, num_layers, output_size=1):
    """Deterministic synthetic parameters with PyTorch shapes (gate order r, z, n)."""
    params = {"gru": []}
    k = 1.0 / math.sqrt(hidden_size)
    keys = jax.random.split(key, num_layers * 4 + 6)
    ki = 0
    for layer in range(num_layers):
        in_dim = input_size if layer == 0 else hidden_size
        wih = jax.random.uniform(keys[ki], (3 * hidden_size, in_dim), jnp.float32, -k, k); ki += 1
        whh = jax.random.uniform(keys[ki], (3 * hidden_size, hidden_size), jnp.float32, -k, k); ki += 1
        bih = jax.random.uniform(keys[ki], (3 * hidden_size,), jnp.float32, -k, k); ki += 1
        bhh = jax.random.uniform(keys[ki], (3 * hidden_size,), jnp.float32, -k, k); ki += 1
        params["gru"].append({"wih": wih, "whh": whh, "bih": bih, "bhh": bhh})

    def linear(kw, kb, fan_in, fan_out):
        bound = 1.0 / math.sqrt(fan_in)
        w = jax.random.uniform(kw, (fan_out, fan_in), jnp.float32, -bound, bound)
        b = jax.random.uniform(kb, (fan_out,), jnp.float32, -bound, bound)
        return w, b

    params["fc1"] = linear(keys[ki], keys[ki + 1], hidden_size, 256); ki += 2
    params["fc2"] = linear(keys[ki], keys[ki + 1], 256, 128); ki += 2
    params["fc3"] = linear(keys[ki], keys[ki + 1], 128, output_size); ki += 2
    return params


def pack_params(params, input_size, hidden_size, num_layers, output_size):
    """Pad / transpose / stack the PyTorch-layout params for the fused kernel.

    Gate g of layer l is placed in lanes [g*Hp, g*Hp+H) of the stacked
    (L, Hp, 3*Hp) weights so every r/z/n slice in the kernel is 128-lane aligned.
    Matmul weights are stored in bf16 (f32 MXU accumulation); biases stay f32.
    """
    H, L = hidden_size, num_layers
    Hp = _round_up(H, _LANE)
    OUTp = _round_up(output_size, _LANE)
    assert input_size <= Hp, "input_size > padded hidden not supported"
    # TODO(synk): support input_size > Hp by keeping layer-0 W_ih unstacked.

    wih = jnp.zeros((L, Hp, 3 * Hp), jnp.float32)
    whh = jnp.zeros((L, Hp, 3 * Hp), jnp.float32)
    bih = jnp.zeros((L, 1, 3 * Hp), jnp.float32)
    bhh = jnp.zeros((L, 1, 3 * Hp), jnp.float32)
    for l, lp in enumerate(params["gru"]):
        in_dim = input_size if l == 0 else H
        for g in range(3):
            wih = wih.at[l, :in_dim, g * Hp:g * Hp + H].set(lp["wih"][g * H:(g + 1) * H, :].T)
            whh = whh.at[l, :H, g * Hp:g * Hp + H].set(lp["whh"][g * H:(g + 1) * H, :].T)
            bih = bih.at[l, 0, g * Hp:g * Hp + H].set(lp["bih"][g * H:(g + 1) * H])
            bhh = bhh.at[l, 0, g * Hp:g * Hp + H].set(lp["bhh"][g * H:(g + 1) * H])

    (w1, b1), (w2, b2), (w3, b3) = params["fc1"], params["fc2"], params["fc3"]
    w1p = jnp.zeros((Hp, w1.shape[0]), jnp.float32).at[:H, :].set(w1.T)      # (Hp, 256)
    w3p = jnp.zeros((w3.shape[1], OUTp), jnp.float32).at[:, :output_size].set(w3.T)
    b3p = jnp.zeros((1, OUTp), jnp.float32).at[0, :output_size].set(b3)

    return {
        "wih": wih.astype(jnp.bfloat16), "whh": whh.astype(jnp.bfloat16),
        "bih": bih, "bhh": bhh,
        "w1": w1p.astype(jnp.bfloat16), "b1": b1.reshape(1, -1),
        "w2": jnp.asarray(w2.T, jnp.bfloat16), "b2": b2.reshape(1, -1),
        "w3": w3p.astype(jnp.bfloat16), "b3": b3p,
    }


# ---------------------------------- forward pass ----------------------------------
def gru_model_forward(x, w, output_size):
    """x: (B, T, input_size) f32  ->  (B, output_size) f32."""
    B, T, D = x.shape
    L, Hp = w["wih"].shape[0], w["wih"].shape[1]
    OUTp = w["w3"].shape[1]
    n_fc1, n_fc2 = w["w1"].shape[1], w["w2"].shape[1]

    # Batch blocking; the batch grid axis is "parallel" so >=2 blocks can be
    # sharded across v7x's two TensorCores.
    bblk = min(64, _round_up(B, 16))
    bpad = _round_up(B, bblk)
    grid = (bpad // bblk,)

    # Tiny prep (fused by XLA): time-major transpose of the raw (B,T,D) tensor,
    # zero-pad features to Hp and batch to bpad, cast matmul operand to bf16.
    xt = jnp.transpose(x, (1, 0, 2))
    xt = jnp.pad(xt, ((0, 0), (0, bpad - B), (0, Hp - D))).astype(jnp.bfloat16)

    def _full(a):  # whole-array block, identical for every grid step
        if a.ndim == 2:
            return pl.BlockSpec(a.shape, lambda b: (0, 0))
        return pl.BlockSpec(a.shape, lambda b: (0, 0, 0))

    flops = int(4 * T * bpad * Hp * 3 * Hp * L
                + 2 * bpad * (Hp * n_fc1 + n_fc1 * n_fc2 + n_fc2 * OUTp))
    transcendentals = int(3 * Hp * bpad * T * L + bpad * (n_fc1 + n_fc2))
    bytes_accessed = int(sum(a.size * a.dtype.itemsize for a in w.values())
                         + xt.size * 2 + bpad * OUTp * 4)

    out = pl.pallas_call(
        _gru_fused_kernel,
        out_shape=jax.ShapeDtypeStruct((bpad, OUTp), jnp.float32),
        grid_spec=pltpu.PrefetchScalarGridSpec(
            num_scalar_prefetch=0,
            grid=grid,
            in_specs=[
                pl.BlockSpec((T, bblk, Hp), lambda b: (0, b, 0)),   # x, blocked on batch
                _full(w["wih"]), _full(w["whh"]), _full(w["bih"]), _full(w["bhh"]),
                _full(w["w1"]), _full(w["b1"]),
                _full(w["w2"]), _full(w["b2"]),
                _full(w["w3"]), _full(w["b3"]),
            ],
            out_specs=pl.BlockSpec((bblk, OUTp), lambda b: (b, 0)),
            scratch_shapes=[
                pltpu.VMEM((T, bblk, 3 * Hp), jnp.float32),  # hoisted gate pre-acts
                pltpu.VMEM((T, bblk, Hp), jnp.float32),      # inter-layer hidden seq
            ],
        ),
        compiler_params=pltpu.CompilerParams(
            dimension_semantics=("parallel",),
            vmem_limit_bytes=48 * 1024 * 1024,
        ),
        cost_estimate=pl.CostEstimate(flops=flops,
                                      transcendentals=transcendentals,
                                      bytes_accessed=bytes_accessed),
    )(xt, w["wih"], w["whh"], w["bih"], w["bhh"],
      w["w1"], w["b1"], w["w2"], w["b2"], w["w3"], w["b3"])

    return out[:B, :output_size]


# ------------------------------- pure-JAX references -------------------------------
def reference_forward(x, params, matmul_dtype=jnp.float32):
    """PyTorch GRU semantics (eval mode, dropout off). matmul_dtype=bf16 mirrors
    the kernel's MXU operand quantization (f32 accumulation)."""
    def dot(a, b):
        return jnp.dot(a.astype(matmul_dtype), b.astype(matmul_dtype),
                       preferred_element_type=jnp.float32)

    B, T, _ = x.shape
    H = params["gru"][0]["whh"].shape[1]
    seq = jnp.transpose(x, (1, 0, 2)).astype(jnp.float32)
    for lp in params["gru"]:
        wih_t, whh_t = lp["wih"].T, lp["whh"].T
        h = jnp.zeros((B, H), jnp.float32)
        outs = []
        for t in range(T):
            gx = dot(seq[t], wih_t) + lp["bih"]
            gh = dot(h, whh_t) + lp["bhh"]
            r = jax.nn.sigmoid(gx[:, :H] + gh[:, :H])
            z = jax.nn.sigmoid(gx[:, H:2 * H] + gh[:, H:2 * H])
            n = jnp.tanh(gx[:, 2 * H:] + r * gh[:, 2 * H:])
            h = (1.0 - z) * n + z * h
            outs.append(h)
        seq = jnp.stack(outs, axis=0)
    h_last = seq[-1]
    (w1, b1), (w2, b2), (w3, b3) = params["fc1"], params["fc2"], params["fc3"]
    y = _selu(dot(h_last, w1.T) + b1)
    y = _selu(dot(y, w2.T) + b2)
    return dot(y, w3.T) + b3


if __name__ == "__main__":
    B, T, INPUT, HIDDEN, LAYERS, OUT = 2, 8, 4, 32, 2, 1

    key = jax.random.PRNGKey(0)
    k_x, k_p = jax.random.split(key)
    x = jax.random.normal(k_x, (B, T, INPUT), dtype=jnp.float32)

    params = init_params(k_p, INPUT, HIDDEN, LAYERS, OUT)
    weights = pack_params(params, INPUT, HIDDEN, LAYERS, OUT)

    fwd = jax.jit(gru_model_forward, static_argnums=2)
    out = jax.block_until_ready(fwd(x, weights, OUT))
    assert out.shape == (B, OUT), out.shape

    # Tight check vs a reference that mirrors the kernel's bf16 matmul operands,
    # loose sanity check vs the full-f32 PyTorch-equivalent math (bf16 quant gap).
    ref_bf16 = reference_forward(x, params, jnp.bfloat16)
    ref_f32 = reference_forward(x, params, jnp.float32)
    assert jnp.allclose(out, ref_bf16, atol=2e-3, rtol=2e-3), (out, ref_bf16)
    assert jnp.allclose(out, ref_f32, atol=5e-2, rtol=5e-2), (out, ref_f32)

    print("KERNEL_OK")
</pallas_src>

<mosaic_0001>
module attributes {stable_mosaic.version = 11 : i64} {
  func.func @_gru_fused_kernel(%arg0: i32, %arg1: memref<8x16x128xbf16, #tpu.memory_space<vmem>>, %arg2: memref<2x128x384xbf16, #tpu.memory_space<vmem>>, %arg3: memref<2x128x384xbf16, #tpu.memory_space<vmem>>, %arg4: memref<2x1x384xf32, #tpu.memory_space<vmem>>, %arg5: memref<2x1x384xf32, #tpu.memory_space<vmem>>, %arg6: memref<128x256xbf16, #tpu.memory_space<vmem>>, %arg7: memref<1x256xf32, #tpu.memory_space<vmem>>, %arg8: memref<256x128xbf16, #tpu.memory_space<vmem>>, %arg9: memref<1x128xf32, #tpu.memory_space<vmem>>, %arg10: memref<128x128xbf16, #tpu.memory_space<vmem>>, %arg11: memref<1x128xf32, #tpu.memory_space<vmem>>, %arg12: memref<16x128xf32, #tpu.memory_space<vmem>>, %arg13: memref<8x16x384xf32, #tpu.memory_space<vmem>>, %arg14: memref<8x16x128xf32, #tpu.memory_space<vmem>>) attributes {dimension_semantics = [#tpu.dimension_semantics<parallel>], iteration_bounds = array<i64: 1>, scalar_prefetch = 0 : i64, scratch_operands = 2 : i64, tpu.core_type = #tpu.core_type<tc>, window_params = [{transform_indices = @transform_0, window_bounds = array<i64: 8, 16, 128>}, {pipeline_mode = #tpu.pipeline_mode<synchronous>, transform_indices = @transform_1, window_bounds = array<i64: 2, 128, 384>}, {pipeline_mode = #tpu.pipeline_mode<synchronous>, transform_indices = @transform_2, window_bounds = array<i64: 2, 128, 384>}, {pipeline_mode = #tpu.pipeline_mode<synchronous>, transform_indices = @transform_3, window_bounds = array<i64: 2, 1, 384>}, {pipeline_mode = #tpu.pipeline_mode<synchronous>, transform_indices = @transform_4, window_bounds = array<i64: 2, 1, 384>}, {pipeline_mode = #tpu.pipeline_mode<synchronous>, transform_indices = @transform_5, window_bounds = array<i64: 128, 256>}, {pipeline_mode = #tpu.pipeline_mode<synchronous>, transform_indices = @transform_6, window_bounds = array<i64: 1, 256>}, {pipeline_mode = #tpu.pipeline_mode<synchronous>, transform_indices = @transform_7, window_bounds = array<i64: 256, 128>}, {pipeline_mode = #tpu.pipeline_mode<synchronous>, transform_indices = @transform_8, window_bounds = array<i64: 1, 128>}, {pipeline_mode = #tpu.pipeline_mode<synchronous>, transform_indices = @transform_9, window_bounds = array<i64: 128, 128>}, {pipeline_mode = #tpu.pipeline_mode<synchronous>, transform_indices = @transform_10, window_bounds = array<i64: 1, 128>}, {transform_indices = @transform_11, window_bounds = array<i64: 16, 128>}]} {
    %c0 = arith.constant 0 : index
    %c0_0 = arith.constant 0 : index
    %c0_1 = arith.constant 0 : index
    %0 = vector.load %arg1[%c0, %c0_0, %c0_1] : memref<8x16x128xbf16, #tpu.memory_space<vmem>>, vector<8x16x128xbf16>
    %1 = vector.shape_cast %0 : vector<8x16x128xbf16> to vector<128x128xbf16>
    %c0_2 = arith.constant 0 : index
    %c0_3 = arith.constant 0 : index
    %c0_4 = arith.constant 0 : index
    %2 = vector.load %arg2[%c0_2, %c0_3, %c0_4] : memref<2x128x384xbf16, #tpu.memory_space<vmem>>, vector<1x128x384xbf16>
    %3 = vector.shape_cast %2 : vector<1x128x384xbf16> to vector<128x384xbf16>
    %cst = arith.constant dense<0.000000e+00> : vector<128x384xf32>
    %4 = tpu.matmul %1, %3, %cst {dimension_numbers = #tpu.dot_dimension_numbers<[1], [0], [0], [1], [0, 0, 1, 1], [], []>} : vector<128x128xbf16>, vector<128x384xbf16>, vector<128x384xf32> -> vector<128x384xf32>
    %c0_5 = arith.constant 0 : index
    %c0_6 = arith.constant 0 : index
    %c0_7 = arith.constant 0 : index
    %5 = vector.load %arg4[%c0_5, %c0_6, %c0_7] : memref<2x1x384xf32, #tpu.memory_space<vmem>>, vector<1x1x384xf32>
    %6 = vector.shape_cast %5 : vector<1x1x384xf32> to vector<1x384xf32>
    %7 = vector.broadcast %6 : vector<1x384xf32> to vector<128x384xf32>
    %8 = arith.addf %4, %7 : vector<128x384xf32>
    %9 = vector.shape_cast %8 : vector<128x384xf32> to vector<8x16x384xf32>
    %c0_8 = arith.constant 0 : index
    %c0_9 = arith.constant 0 : index
    %c0_10 = arith.constant 0 : index
    %10 = vector.load %arg13[%c0_8, %c0_9, %c0_10] : memref<8x16x384xf32, #tpu.memory_space<vmem>>, vector<8x16x384xf32>
    tpu.vector_store %arg13[%c0_8, %c0_9, %c0_10], %9 {strides = array<i32>} : memref<8x16x384xf32, #tpu.memory_space<vmem>>, vector<8x16x384xf32>,
    %c0_11 = arith.constant 0 : index
    %c0_12 = arith.constant 0 : index
    %c0_13 = arith.constant 0 : index
    %11 = vector.load %arg3[%c0_11, %c0_12, %c0_13] : memref<2x128x384xbf16, #tpu.memory_space<vmem>>, vector<1x128x384xbf16>
    %12 = vector.shape_cast %11 : vector<1x128x384xbf16> to vector<128x384xbf16>
    %c0_14 = arith.constant 0 : index
    %c0_15 = arith.constant 0 : index
    %c0_16 = arith.constant 0 : index
    %13 = vector.load %arg5[%c0_14, %c0_15, %c0_16] : memref<2x1x384xf32, #tpu.memory_space<vmem>>, vector<1x1x384xf32>
    %14 = vector.shape_cast %13 : vector<1x1x384xf32> to vector<1x384xf32>
    %cst_17 = arith.constant 0.000000e+00 : f32
    %15 = vector.broadcast %cst_17 : f32 to vector<16x128xf32>
    %16 = arith.truncf %15 : vector<16x128xf32> to vector<16x128xbf16>
    %cst_18 = arith.constant dense<0.000000e+00> : vector<16x384xf32>
    %17 = tpu.matmul %16, %12, %cst_18 {dimension_numbers = #tpu.dot_dimension_numbers<[1], [0], [0], [1], [0, 0, 1, 1], [], []>} : vector<16x128xbf16>, vector<128x384xbf16>, vector<16x384xf32> -> vector<16x384xf32>
    %18 = vector.broadcast %14 : vector<1x384xf32> to vector<16x384xf32>
    %19 = arith.addf %17, %18 : vector<16x384xf32>
    %c0_19 = arith.constant 0 : index
    %c0_20 = arith.constant 0 : index
    %c0_21 = arith.constant 0 : index
    %20 = vector.load %arg13[%c0_19, %c0_20, %c0_21] : memref<8x16x384xf32, #tpu.memory_space<vmem>>, vector<1x16x384xf32>
    %21 = vector.shape_cast %20 : vector<1x16x384xf32> to vector<16x384xf32>
    %22 = vector.extract_strided_slice %21 {offsets = [0, 0], sizes = [16, 128], strides = [1, 1]} : vector<16x384xf32> to vector<16x128xf32>
    %23 = vector.extract_strided_slice %19 {offsets = [0, 0], sizes = [16, 128], strides = [1, 1]} : vector<16x384xf32> to vector<16x128xf32>
    %24 = arith.addf %22, %23 : vector<16x128xf32>
    %25 = arith.negf %24 : vector<16x128xf32>
    %26 = math.exp %25 : vector<16x128xf32>
    %cst_22 = arith.constant 1.000000e+00 : f32
    %27 = vector.broadcast %cst_22 : f32 to vector<16x128xf32>
    %28 = arith.addf %27, %26 : vector<16x128xf32>
    %29 = arith.divf %27, %28 : vector<16x128xf32>
    %30 = vector.extract_strided_slice %21 {offsets = [0, 128], sizes = [16, 128], strides = [1, 1]} : vector<16x384xf32> to vector<16x128xf32>
    %31 = vector.extract_strided_slice %19 {offsets = [0, 128], sizes = [16, 128], strides = [1, 1]} : vector<16x384xf32> to vector<16x128xf32>
    %32 = arith.addf %30, %31 : vector<16x128xf32>
    %33 = arith.negf %32 : vector<16x128xf32>
    %34 = math.exp %33 : vector<16x128xf32>
    %cst_23 = arith.constant 1.000000e+00 : f32
    %35 = vector.broadcast %cst_23 : f32 to vector<16x128xf32>
    %36 = arith.addf %35, %34 : vector<16x128xf32>
    %37 = arith.divf %35, %36 : vector<16x128xf32>
    %38 = vector.extract_strided_slice %21 {offsets = [0, 256], sizes = [16, 128], strides = [1, 1]} : vector<16x384xf32> to vector<16x128xf32>
    %39 = vector.extract_strided_slice %19 {offsets = [0, 256], sizes = [16, 128], strides = [1, 1]} : vector<16x384xf32> to vector<16x128xf32>
    %40 = arith.mulf %29, %39 : vector<16x128xf32>
    %41 = arith.addf %38, %40 : vector<16x128xf32>
    %42 = math.tanh %41 : vector<16x128xf32>
    %cst_24 = arith.constant 1.000000e+00 : f32
    %43 = vector.broadcast %cst_24 : f32 to vector<16x128xf32>
    %44 = arith.subf %43, %37 : vector<16x128xf32>
    %45 = arith.mulf %44, %42 : vector<16x128xf32>
    %46 = arith.mulf %37, %15 : vector<16x128xf32>
    %47 = arith.addf %45, %46 : vector<16x128xf32>
    %c0_25 = arith.constant 0 : index
    %c0_26 = arith.constant 0 : index
    %c0_27 = arith.constant 0 : index
    %48 = vector.load %arg14[%c0_25, %c0_26, %c0_27] : memref<8x16x128xf32, #tpu.memory_space<vmem>>, vector<1x16x128xf32>
    %49 = vector.shape_cast %48 : vector<1x16x128xf32> to vector<16x128xf32>
    %50 = vector.shape_cast %47 : vector<16x128xf32> to vector<1x16x128xf32>
    tpu.vector_store %arg14[%c0_25, %c0_26, %c0_27], %50 {strides = array<i32>} : memref<8x16x128xf32, #tpu.memory_space<vmem>>, vector<1x16x128xf32>,
    %51 = arith.truncf %47 : vector<16x128xf32> to vector<16x128xbf16>
    %cst_28 = arith.constant dense<0.000000e+00> : vector<16x384xf32>
    %52 = tpu.matmul %51, %12, %cst_28 {dimension_numbers = #tpu.dot_dimension_numbers<[1], [0], [0], [1], [0, 0, 1, 1], [], []>} : vector<16x128xbf16>, vector<128x384xbf16>, vector<16x384xf32> -> vector<16x384xf32>
    %53 = vector.broadcast %14 : vector<1x384xf32> to vector<16x384xf32>
    %54 = arith.addf %52, %53 : vector<16x384xf32>
    %c1 = arith.constant 1 : index
    %c0_29 = arith.constant 0 : index
    %c0_30 = arith.constant 0 : index
    %55 = vector.load %arg13[%c1, %c0_29, %c0_30] : memref<8x16x384xf32, #tpu.memory_space<vmem>>, vector<1x16x384xf32>
    %56 = vector.shape_cast %55 : vector<1x16x384xf32> to vector<16x384xf32>
    %57 = vector.extract_strided_slice %56 {offsets = [0, 0], sizes = [16, 128], strides = [1, 1]} : vector<16x384xf32> to vector<16x128xf32>
    %58 = vector.extract_strided_slice %54 {offsets = [0, 0], sizes = [16, 128], strides = [1, 1]} : vector<16x384xf32> to vector<16x128xf32>
    %59 = arith.addf %57, %58 : vector<16x128xf32>
    %60 = arith.negf %59 : vector<16x128xf32>
    %61 = math.exp %60 : vector<16x128xf32>
    %cst_31 = arith.constant 1.000000e+00 : f32
    %62 = vector.broadcast %cst_31 : f32 to vector<16x128xf32>
    %63 = arith.addf %62, %61 : vector<16x128xf32>
    %64 = arith.divf %62, %63 : vector<16x128xf32>
    %65 = vector.extract_strided_slice %56 {offsets = [0, 128], sizes = [16, 128], strides = [1, 1]} : vector<16x384xf32> to vector<16x128xf32>
    %66 = vector.extract_strided_slice %54 {offsets = [0, 128], sizes = [16, 128], strides = [1, 1]} : vector<16x384xf32> to vector<16x128xf32>
    %67 = arith.addf %65, %66 : vector<16x128xf32>
    %68 = arith.negf %67 : vector<16x128xf32>
    %69 = math.exp %68 : vector<16x128xf32>
    %cst_32 = arith.constant 1.000000e+00 : f32
    %70 = vector.broadcast %cst_32 : f32 to vector<16x128xf32>
    %71 = arith.addf %70, %69 : vector<16x128xf32>
    %72 = arith.divf %70, %71 : vector<16x128xf32>
    %73 = vector.extract_strided_slice %56 {offsets = [0, 256], sizes = [16, 128], strides = [1, 1]} : vector<16x384xf32> to vector<16x128xf32>
    %74 = vector.extract_strided_slice %54 {offsets = [0, 256], sizes = [16, 128], strides = [1, 1]} : vector<16x384xf32> to vector<16x128xf32>
    %75 = arith.mulf %64, %74 : vector<16x128xf32>
    %76 = arith.addf %73, %75 : vector<16x128xf32>
    %77 = math.tanh %76 : vector<16x128xf32>
    %cst_33 = arith.constant 1.000000e+00 : f32
    %78 = vector.broadcast %cst_33 : f32 to vector<16x128xf32>
    %79 = arith.subf %78, %72 : vector<16x128xf32>
    %80 = arith.mulf %79, %77 : vector<16x128xf32>
    %81 = arith.mulf %72, %47 : vector<16x128xf32>
    %82 = arith.addf %80, %81 : vector<16x128xf32>
    %c1_34 = arith.constant 1 : index
    %c0_35 = arith.constant 0 : index
    %c0_36 = arith.constant 0 : index
    %83 = vector.load %arg14[%c1_34, %c0_35, %c0_36] : memref<8x16x128xf32, #tpu.memory_space<vmem>>, vector<1x16x128xf32>
    %84 = vector.shape_cast %83 : vector<1x16x128xf32> to vector<16x128xf32>
    %85 = vector.shape_cast %82 : vector<16x128xf32> to vector<1x16x128xf32>
    tpu.vector_store %arg14[%c1_34, %c0_35, %c0_36], %85 {strides = array<i32>} : memref<8x16x128xf32, #tpu.memory_space<vmem>>, vector<1x16x128xf32>,
    %86 = arith.truncf %82 : vector<16x128xf32> to vector<16x128xbf16>
    %cst_37 = arith.constant dense<0.000000e+00> : vector<16x384xf32>
    %87 = tpu.matmul %86, %12, %cst_37 {dimension_numbers = #tpu.dot_dimension_numbers<[1], [0], [0], [1], [0, 0, 1, 1], [], []>} : vector<16x128xbf16>, vector<128x384xbf16>, vector<16x384xf32> -> vector<16x384xf32>
    %88 = vector.broadcast %14 : vector<1x384xf32> to vector<16x384xf32>
    %89 = arith.addf %87, %88 : vector<16x384xf32>
    %c2 = arith.constant 2 : index
    %c0_38 = arith.constant 0 : index
    %c0_39 = arith.constant 0 : index
    %90 = vector.load %arg13[%c2, %c0_38, %c0_39] : memref<8x16x384xf32, #tpu.memory_space<vmem>>, vector<1x16x384xf32>
    %91 = vector.shape_cast %90 : vector<1x16x384xf32> to vector<16x384xf32>
    %92 = vector.extract_strided_slice %91 {offsets = [0, 0], sizes = [16, 128], strides = [1, 1]} : vector<16x384xf32> to vector<16x128xf32>
    %93 = vector.extract_strided_slice %89 {offsets = [0, 0], sizes = [16, 128], strides = [1, 1]} : vector<16x384xf32> to vector<16x128xf32>
    %94 = arith.addf %92, %93 : vector<16x128xf32>
    %95 = arith.negf %94 : vector<16x128xf32>
    %96 = math.exp %95 : vector<16x128xf32>
    %cst_40 = arith.constant 1.000000e+00 : f32
    %97 = vector.broadcast %cst_40 : f32 to vector<16x128xf32>
    %98 = arith.addf %97, %96 : vector<16x128xf32>
    %99 = arith.divf %97, %98 : vector<16x128xf32>
    %100 = vector.extract_strided_slice %91 {offsets = [0, 128], sizes = [16, 128], strides = [1, 1]} : vector<16x384xf32> to vector<16x128xf32>
    %101 = vector.extract_strided_slice %89 {offsets = [0, 128], sizes = [16, 128], strides = [1, 1]} : vector<16x384xf32> to vector<16x128xf32>
    %102 = arith.addf %100, %101 : vector<16x128xf32>
    %103 = arith.negf %102 : vector<16x128xf32>
    %104 = math.exp %103 : vector<16x128xf32>
    %cst_41 = arith.constant 1.000000e+00 : f32
    %105 = vector.broadcast %cst_41 : f32 to vector<16x128xf32>
    %106 = arith.addf %105, %104 : vector<16x128xf32>
    %107 = arith.divf %105, %106 : vector<16x128xf32>
    %108 = vector.extract_strided_slice %91 {offsets = [0, 256], sizes = [16, 128], strides = [1, 1]} : vector<16x384xf32> to vector<16x128xf32>
    %109 = vector.extract_strided_slice %89 {offsets = [0, 256], sizes = [16, 128], strides = [1, 1]} : vector<16x384xf32> to vector<16x128xf32>
    %110 = arith.mulf %99, %109 : vector<16x128xf32>
    %111 = arith.addf %108, %110 : vector<16x128xf32>
    %112 = math.tanh %111 : vector<16x128xf32>
    %cst_42 = arith.constant 1.000000e+00 : f32
    %113 = vector.broadcast %cst_42 : f32 to vector<16x128xf32>
    %114 = arith.subf %113, %107 : vector<16x128xf32>
    %115 = arith.mulf %114, %112 : vector<16x128xf32>
    %116 = arith.mulf %107, %82 : vector<16x128xf32>
    %117 = arith.addf %115, %116 : vector<16x128xf32>
    %c2_43 = arith.constant 2 : index
    %c0_44 = arith.constant 0 : index
    %c0_45 = arith.constant 0 : index
    %118 = vector.load %arg14[%c2_43, %c0_44, %c0_45] : memref<8x16x128xf32, #tpu.memory_space<vmem>>, vector<1x16x128xf32>
    %119 = vector.shape_cast %118 : vector<1x16x128xf32> to vector<16x128xf32>
    %120 = vector.shape_cast %117 : vector<16x128xf32> to vector<1x16x128xf32>
    tpu.vector_store %arg14[%c2_43, %c0_44, %c0_45], %120 {strides = array<i32>} : memref<8x16x128xf32, #tpu.memory_space<vmem>>, vector<1x16x128xf32>,
    %121 = arith.truncf %117 : vector<16x128xf32> to vector<16x128xbf16>
    %cst_46 = arith.constant dense<0.000000e+00> : vector<16x384xf32>
    %122 = tpu.matmul %121, %12, %cst_46 {dimension_numbers = #tpu.dot_dimension_numbers<[1], [0], [0], [1], [0, 0, 1, 1], [], []>} : vector<16x128xbf16>, vector<128x384xbf16>, vector<16x384xf32> -> vector<16x384xf32>
    %123 = vector.broadcast %14 : vector<1x384xf32> to vector<16x384xf32>
    %124 = arith.addf %122, %123 : vector<16x384xf32>
    %c3 = arith.constant 3 : index
    %c0_47 = arith.constant 0 : index
    %c0_48 = arith.constant 0 : index
    %125 = vector.load %arg13[%c3, %c0_47, %c0_48] : memref<8x16x384xf32, #tpu.memory_space<vmem>>, vector<1x16x384xf32>
    %126 = vector.shape_cast %125 : vector<1x16x384xf32> to vector<16x384xf32>
    %127 = vector.extract_strided_slice %126 {offsets = [0, 0], sizes = [16, 128], strides = [1, 1]} : vector<16x384xf32> to vector<16x128xf32>
    %128 = vector.extract_strided_slice %124 {offsets = [0, 0], sizes = [16, 128], strides = [1, 1]} : vector<16x384xf32> to vector<16x128xf32>
    %129 = arith.addf %127, %128 : vector<16x128xf32>
    %130 = arith.negf %129 : vector<16x128xf32>
    %131 = math.exp %130 : vector<16x128xf32>
    %cst_49 = arith.constant 1.000000e+00 : f32
    %132 = vector.broadcast %cst_49 : f32 to vector<16x128xf32>
    %133 = arith.addf %132, %131 : vector<16x128xf32>
    %134 = arith.divf %132, %133 : vector<16x128xf32>
    %135 = vector.extract_strided_slice %126 {offsets = [0, 128], sizes = [16, 128], strides = [1, 1]} : vector<16x384xf32> to vector<16x128xf32>
    %136 = vector.extract_strided_slice %124 {offsets = [0, 128], sizes = [16, 128], strides = [1, 1]} : vector<16x384xf32> to vector<16x128xf32>
    %137 = arith.addf %135, %136 : vector<16x128xf32>
    %138 = arith.negf %137 : vector<16x128xf32>
    %139 = math.exp %138 : vector<16x128xf32>
    %cst_50 = arith.constant 1.000000e+00 : f32
    %140 = vector.broadcast %cst_50 : f32 to vector<16x128xf32>
    %141 = arith.addf %140, %139 : vector<16x128xf32>
    %142 = arith.divf %140, %141 : vector<16x128xf32>
    %143 = vector.extract_strided_slice %126 {offsets = [0, 256], sizes = [16, 128], strides = [1, 1]} : vector<16x384xf32> to vector<16x128xf32>
    %144 = vector.extract_strided_slice %124 {offsets = [0, 256], sizes = [16, 128], strides = [1, 1]} : vector<16x384xf32> to vector<16x128xf32>
    %145 = arith.mulf %134, %144 : vector<16x128xf32>
    %146 = arith.addf %143, %145 : vector<16x128xf32>
    %147 = math.tanh %146 : vector<16x128xf32>
    %cst_51 = arith.constant 1.000000e+00 : f32
    %148 = vector.broadcast %cst_51 : f32 to vector<16x128xf32>
    %149 = arith.subf %148, %142 : vector<16x128xf32>
    %150 = arith.mulf %149, %147 : vector<16x128xf32>
    %151 = arith.mulf %142, %117 : vector<16x128xf32>
    %152 = arith.addf %150, %151 : vector<16x128xf32>
    %c3_52 = arith.constant 3 : index
    %c0_53 = arith.constant 0 : index
    %c0_54 = arith.constant 0 : index
    %153 = vector.load %arg14[%c3_52, %c0_53, %c0_54] : memref<8x16x128xf32, #tpu.memory_space<vmem>>, vector<1x16x128xf32>
    %154 = vector.shape_cast %153 : vector<1x16x128xf32> to vector<16x128xf32>
    %155 = vector.shape_cast %152 : vector<16x128xf32> to vector<1x16x128xf32>
    tpu.vector_store %arg14[%c3_52, %c0_53, %c0_54], %155 {strides = array<i32>} : memref<8x16x128xf32, #tpu.memory_space<vmem>>, vector<1x16x128xf32>,
    %156 = arith.truncf %152 : vector<16x128xf32> to vector<16x128xbf16>
    %cst_55 = arith.constant dense<0.000000e+00> : vector<16x384xf32>
    %157 = tpu.matmul %156, %12, %cst_55 {dimension_numbers = #tpu.dot_dimension_numbers<[1], [0], [0], [1], [0, 0, 1, 1], [], []>} : vector<16x128xbf16>, vector<128x384xbf16>, vector<16x384xf32> -> vector<16x384xf32>
    %158 = vector.broadcast %14 : vector<1x384xf32> to vector<16x384xf32>
    %159 = arith.addf %157, %158 : vector<16x384xf32>
    %c4 = arith.constant 4 : index
    %c0_56 = arith.constant 0 : index
    %c0_57 = arith.constant 0 : index
    %160 = vector.load %arg13[%c4, %c0_56, %c0_57] : memref<8x16x384xf32, #tpu.memory_space<vmem>>, vector<1x16x384xf32>
    %161 = vector.shape_cast %160 : vector<1x16x384xf32> to vector<16x384xf32>
    %162 = vector.extract_strided_slice %161 {offsets = [0, 0], sizes = [16, 128], strides = [1, 1]} : vector<16x384xf32> to vector<16x128xf32>
    %163 = vector.extract_strided_slice %159 {offsets = [0, 0], sizes = [16, 128], strides = [1, 1]} : vector<16x384xf32> to vector<16x128xf32>
    %164 = arith.addf %162, %163 : vector<16x128xf32>
    %165 = arith.negf %164 : vector<16x128xf32>
    %166 = math.exp %165 : vector<16x128xf32>
    %cst_58 = arith.constant 1.000000e+00 : f32
    %167 = vector.broadcast %cst_58 : f32 to vector<16x128xf32>
    %168 = arith.addf %167, %166 : vector<16x128xf32>
    %169 = arith.divf %167, %168 : vector<16x128xf32>
    %170 = vector.extract_strided_slice %161 {offsets = [0, 128], sizes = [16, 128], strides = [1, 1]} : vector<16x384xf32> to vector<16x128xf32>
    %171 = vector.extract_strided_slice %159 {offsets = [0, 128], sizes = [16, 128], strides = [1, 1]} : vector<16x384xf32> to vector<16x128xf32>
    %172 = arith.addf %170, %171 : vector<16x128xf32>
    %173 = arith.negf %172 : vector<16x128xf32>
    %174 = math.exp %173 : vector<16x128xf32>
    %cst_59 = arith.constant 1.000000e+00 : f32
    %175 = vector.broadcast %cst_59 : f32 to vector<16x128xf32>
    %176 = arith.addf %175, %174 : vector<16x128xf32>
    %177 = arith.divf %175, %176 : vector<16x128xf32>
    %178 = vector.extract_strided_slice %161 {offsets = [0, 256], sizes = [16, 128], strides = [1, 1]} : vector<16x384xf32> to vector<16x128xf32>
    %179 = vector.extract_strided_slice %159 {offsets = [0, 256], sizes = [16, 128], strides = [1, 1]} : vector<16x384xf32> to vector<16x128xf32>
    %180 = arith.mulf %169, %179 : vector<16x128xf32>
    %181 = arith.addf %178, %180 : vector<16x128xf32>
    %182 = math.tanh %181 : vector<16x128xf32>
    %cst_60 = arith.constant 1.000000e+00 : f32
    %183 = vector.broadcast %cst_60 : f32 to vector<16x128xf32>
    %184 = arith.subf %183, %177 : vector<16x128xf32>
    %185 = arith.mulf %184, %182 : vector<16x128xf32>
    %186 = arith.mulf %177, %152 : vector<16x128xf32>
    %187 = arith.addf %185, %186 : vector<16x128xf32>
    %c4_61 = arith.constant 4 : index
    %c0_62 = arith.constant 0 : index
    %c0_63 = arith.constant 0 : index
    %188 = vector.load %arg14[%c4_61, %c0_62, %c0_63] : memref<8x16x128xf32, #tpu.memory_space<vmem>>, vector<1x16x128xf32>
    %189 = vector.shape_cast %188 : vector<1x16x128xf32> to vector<16x128xf32>
    %190 = vector.shape_cast %187 : vector<16x128xf32> to vector<1x16x128xf32>
    tpu.vector_store %arg14[%c4_61, %c0_62, %c0_63], %190 {strides = array<i32>} : memref<8x16x128xf32, #tpu.memory_space<vmem>>, vector<1x16x128xf32>,
    %191 = arith.truncf %187 : vector<16x128xf32> to vector<16x128xbf16>
    %cst_64 = arith.constant dense<0.000000e+00> : vector<16x384xf32>
    %192 = tpu.matmul %191, %12, %cst_64 {dimension_numbers = #tpu.dot_dimension_numbers<[1], [0], [0], [1], [0, 0, 1, 1], [], []>} : vector<16x128xbf16>, vector<128x384xbf16>, vector<16x384xf32> -> vector<16x384xf32>
    %193 = vector.broadcast %14 : vector<1x384xf32> to vector<16x384xf32>
    %194 = arith.addf %192, %193 : vector<16x384xf32>
    %c5 = arith.constant 5 : index
    %c0_65 = arith.constant 0 : index
    %c0_66 = arith.constant 0 : index
    %195 = vector.load %arg13[%c5, %c0_65, %c0_66] : memref<8x16x384xf32, #tpu.memory_space<vmem>>, vector<1x16x384xf32>
    %196 = vector.shape_cast %195 : vector<1x16x384xf32> to vector<16x384xf32>
    %197 = vector.extract_strided_slice %196 {offsets = [0, 0], sizes = [16, 128], strides = [1, 1]} : vector<16x384xf32> to vector<16x128xf32>
    %198 = vector.extract_strided_slice %194 {offsets = [0, 0], sizes = [16, 128], strides = [1, 1]} : vector<16x384xf32> to vector<16x128xf32>
    %199 = arith.addf %197, %198 : vector<16x128xf32>
    %200 = arith.negf %199 : vector<16x128xf32>
    %201 = math.exp %200 : vector<16x128xf32>
    %cst_67 = arith.constant 1.000000e+00 : f32
    %202 = vector.broadcast %cst_67 : f32 to vector<16x128xf32>
    %203 = arith.addf %202, %201 : vector<16x128xf32>
    %204 = arith.divf %202, %203 : vector<16x128xf32>
    %205 = vector.extract_strided_slice %196 {offsets = [0, 128], sizes = [16, 128], strides = [1, 1]} : vector<16x384xf32> to vector<16x128xf32>
    %206 = vector.extract_strided_slice %194 {offsets = [0, 128], sizes = [16, 128], strides = [1, 1]} : vector<16x384xf32> to vector<16x128xf32>
    %207 = arith.addf %205, %206 : vector<16x128xf32>
    %208 = arith.negf %207 : vector<16x128xf32>
    %209 = math.exp %208 : vector<16x128xf32>
    %cst_68 = arith.constant 1.000000e+00 : f32
    %210 = vector.broadcast %cst_68 : f32 to vector<16x128xf32>
    %211 = arith.addf %210, %209 : vector<16x128xf32>
    %212 = arith.divf %210, %211 : vector<16x128xf32>
    %213 = vector.extract_strided_slice %196 {offsets = [0, 256], sizes = [16, 128], strides = [1, 1]} : vector<16x384xf32> to vector<16x128xf32>
    %214 = vector.extract_strided_slice %194 {offsets = [0, 256], sizes = [16, 128], strides = [1, 1]} : vector<16x384xf32> to vector<16x128xf32>
    %215 = arith.mulf %204, %214 : vector<16x128xf32>
    %216 = arith.addf %213, %215 : vector<16x128xf32>
    %217 = math.tanh %216 : vector<16x128xf32>
    %cst_69 = arith.constant 1.000000e+00 : f32
    %218 = vector.broadcast %cst_69 : f32 to vector<16x128xf32>
    %219 = arith.subf %218, %212 : vector<16x128xf32>
    %220 = arith.mulf %219, %217 : vector<16x128xf32>
    %221 = arith.mulf %212, %187 : vector<16x128xf32>
    %222 = arith.addf %220, %221 : vector<16x128xf32>
    %c5_70 = arith.constant 5 : index
    %c0_71 = arith.constant 0 : index
    %c0_72 = arith.constant 0 : index
    %223 = vector.load %arg14[%c5_70, %c0_71, %c0_72] : memref<8x16x128xf32, #tpu.memory_space<vmem>>, vector<1x16x128xf32>
    %224 = vector.shape_cast %223 : vector<1x16x128xf32> to vector<16x128xf32>
    %225 = vector.shape_cast %222 : vector<16x128xf32> to vector<1x16x128xf32>
    tpu.vector_store %arg14[%c5_70, %c0_71, %c0_72], %225 {strides = array<i32>} : memref<8x16x128xf32, #tpu.memory_space<vmem>>, vector<1x16x128xf32>,
    %226 = arith.truncf %222 : vector<16x128xf32> to vector<16x128xbf16>
    %cst_73 = arith.constant dense<0.000000e+00> : vector<16x384xf32>
    %227 = tpu.matmul %226, %12, %cst_73 {dimension_numbers = #tpu.dot_dimension_numbers<[1], [0], [0], [1], [0, 0, 1, 1], [], []>} : vector<16x128xbf16>, vector<128x384xbf16>, vector<16x384xf32> -> vector<16x384xf32>
    %228 = vector.broadcast %14 : vector<1x384xf32> to vector<16x384xf32>
    %229 = arith.addf %227, %228 : vector<16x384xf32>
    %c6 = arith.constant 6 : index
    %c0_74 = arith.constant 0 : index
    %c0_75 = arith.constant 0 : index
    %230 = vector.load %arg13[%c6, %c0_74, %c0_75] : memref<8x16x384xf32, #tpu.memory_space<vmem>>, vector<1x16x384xf32>
    %231 = vector.shape_cast %230 : vector<1x16x384xf32> to vector<16x384xf32>
    %232 = vector.extract_strided_slice %231 {offsets = [0, 0], sizes = [16, 128], strides = [1, 1]} : vector<16x384xf32> to vector<16x128xf32>
    %233 = vector.extract_strided_slice %229 {offsets = [0, 0], sizes = [16, 128], strides = [1, 1]} : vector<16x384xf32> to vector<16x128xf32>
    %234 = arith.addf %232, %233 : vector<16x128xf32>
    %235 = arith.negf %234 : vector<16x128xf32>
    %236 = math.exp %235 : vector<16x128xf32>
    %cst_76 = arith.constant 1.000000e+00 : f32
    %237 = vector.broadcast %cst_76 : f32 to vector<16x128xf32>
    %238 = arith.addf %237, %236 : vector<16x128xf32>
    %239 = arith.divf %237, %238 : vector<16x128xf32>
    %240 = vector.extract_strided_slice %231 {offsets = [0, 128], sizes = [16, 128], strides = [1, 1]} : vector<16x384xf32> to vector<16x128xf32>
    %241 = vector.extract_strided_slice %229 {offsets = [0, 128], sizes = [16, 128], strides = [1, 1]} : vector<16x384xf32> to vector<16x128xf32>
    %242 = arith.addf %240, %241 : vector<16x128xf32>
    %243 = arith.negf %242 : vector<16x128xf32>
    %244 = math.exp %243 : vector<16x128xf32>
    %cst_77 = arith.constant 1.000000e+00 : f32
    %245 = vector.broadcast %cst_77 : f32 to vector<16x128xf32>
    %246 = arith.addf %245, %244 : vector<16x128xf32>
    %247 = arith.divf %245, %246 : vector<16x128xf32>
    %248 = vector.extract_strided_slice %231 {offsets = [0, 256], sizes = [16, 128], strides = [1, 1]} : vector<16x384xf32> to vector<16x128xf32>
    %249 = vector.extract_strided_slice %229 {offsets = [0, 256], sizes = [16, 128], strides = [1, 1]} : vector<16x384xf32> to vector<16x128xf32>
    %250 = arith.mulf %239, %249 : vector<16x128xf32>
    %251 = arith.addf %248, %250 : vector<16x128xf32>
    %252 = math.tanh %251 : vector<16x128xf32>
    %cst_78 = arith.constant 1.000000e+00 : f32
    %253 = vector.broadcast %cst_78 : f32 to vector<16x128xf32>
    %254 = arith.subf %253, %247 : vector<16x128xf32>
    %255 = arith.mulf %254, %252 : vector<16x128xf32>
    %256 = arith.mulf %247, %222 : vector<16x128xf32>
    %257 = arith.addf %255, %256 : vector<16x128xf32>
    %c6_79 = arith.constant 6 : index
    %c0_80 = arith.constant 0 : index
    %c0_81 = arith.constant 0 : index
    %258 = vector.load %arg14[%c6_79, %c0_80, %c0_81] : memref<8x16x128xf32, #tpu.memory_space<vmem>>, vector<1x16x128xf32>
    %259 = vector.shape_cast %258 : vector<1x16x128xf32> to vector<16x128xf32>
    %260 = vector.shape_cast %257 : vector<16x128xf32> to vector<1x16x128xf32>
    tpu.vector_store %arg14[%c6_79, %c0_80, %c0_81], %260 {strides = array<i32>} : memref<8x16x128xf32, #tpu.memory_space<vmem>>, vector<1x16x128xf32>,
    %261 = arith.truncf %257 : vector<16x128xf32> to vector<16x128xbf16>
    %cst_82 = arith.constant dense<0.000000e+00> : vector<16x384xf32>
    %262 = tpu.matmul %261, %12, %cst_82 {dimension_numbers = #tpu.dot_dimension_numbers<[1], [0], [0], [1], [0, 0, 1, 1], [], []>} : vector<16x128xbf16>, vector<128x384xbf16>, vector<16x384xf32> -> vector<16x384xf32>
    %263 = vector.broadcast %14 : vector<1x384xf32> to vector<16x384xf32>
    %264 = arith.addf %262, %263 : vector<16x384xf32>
    %c7 = arith.constant 7 : index
    %c0_83 = arith.constant 0 : index
    %c0_84 = arith.constant 0 : index
    %265 = vector.load %arg13[%c7, %c0_83, %c0_84] : memref<8x16x384xf32, #tpu.memory_space<vmem>>, vector<1x16x384xf32>
    %266 = vector.shape_cast %265 : vector<1x16x384xf32> to vector<16x384xf32>
    %267 = vector.extract_strided_slice %266 {offsets = [0, 0], sizes = [16, 128], strides = [1, 1]} : vector<16x384xf32> to vector<16x128xf32>
    %268 = vector.extract_strided_slice %264 {offsets = [0, 0], sizes = [16, 128], strides = [1, 1]} : vector<16x384xf32> to vector<16x128xf32>
    %269 = arith.addf %267, %268 : vector<16x128xf32>
    %270 = arith.negf %269 : vector<16x128xf32>
    %271 = math.exp %270 : vector<16x128xf32>
    %cst_85 = arith.constant 1.000000e+00 : f32
    %272 = vector.broadcast %cst_85 : f32 to vector<16x128xf32>
    %273 = arith.addf %272, %271 : vector<16x128xf32>
    %274 = arith.divf %272, %273 : vector<16x128xf32>
    %275 = vector.extract_strided_slice %266 {offsets = [0, 128], sizes = [16, 128], strides = [1, 1]} : vector<16x384xf32> to vector<16x128xf32>
    %276 = vector.extract_strided_slice %264 {offsets = [0, 128], sizes = [16, 128], strides = [1, 1]} : vector<16x384xf32> to vector<16x128xf32>
    %277 = arith.addf %275, %276 : vector<16x128xf32>
    %278 = arith.negf %277 : vector<16x128xf32>
    %279 = math.exp %278 : vector<16x128xf32>
    %cst_86 = arith.constant 1.000000e+00 : f32
    %280 = vector.broadcast %cst_86 : f32 to vector<16x128xf32>
    %281 = arith.addf %280, %279 : vector<16x128xf32>
    %282 = arith.divf %280, %281 : vector<16x128xf32>
    %283 = vector.extract_strided_slice %266 {offsets = [0, 256], sizes = [16, 128], strides = [1, 1]} : vector<16x384xf32> to vector<16x128xf32>
    %284 = vector.extract_strided_slice %264 {offsets = [0, 256], sizes = [16, 128], strides = [1, 1]} : vector<16x384xf32> to vector<16x128xf32>
    %285 = arith.mulf %274, %284 : vector<16x128xf32>
    %286 = arith.addf %283, %285 : vector<16x128xf32>
    %287 = math.tanh %286 : vector<16x128xf32>
    %cst_87 = arith.constant 1.000000e+00 : f32
    %288 = vector.broadcast %cst_87 : f32 to vector<16x128xf32>
    %289 = arith.subf %288, %282 : vector<16x128xf32>
    %290 = arith.mulf %289, %287 : vector<16x128xf32>
    %291 = arith.mulf %282, %257 : vector<16x128xf32>
    %292 = arith.addf %290, %291 : vector<16x128xf32>
    %c7_88 = arith.constant 7 : index
    %c0_89 = arith.constant 0 : index
    %c0_90 = arith.constant 0 : index
    %293 = vector.load %arg14[%c7_88, %c0_89, %c0_90] : memref<8x16x128xf32, #tpu.memory_space<vmem>>, vector<1x16x128xf32>
    %294 = vector.shape_cast %293 : vector<1x16x128xf32> to vector<16x128xf32>
    %295 = vector.shape_cast %292 : vector<16x128xf32> to vector<1x16x128xf32>
    tpu.vector_store %arg14[%c7_88, %c0_89, %c0_90], %295 {strides = array<i32>} : memref<8x16x128xf32, #tpu.memory_space<vmem>>, vector<1x16x128xf32>,
    %c0_91 = arith.constant 0 : index
    %c0_92 = arith.constant 0 : index
    %c0_93 = arith.constant 0 : index
    %296 = vector.load %arg14[%c0_91, %c0_92, %c0_93] : memref<8x16x128xf32, #tpu.memory_space<vmem>>, vector<8x16x128xf32>
    %297 = arith.truncf %296 : vector<8x16x128xf32> to vector<8x16x128xbf16>
    %298 = vector.shape_cast %297 : vector<8x16x128xbf16> to vector<128x128xbf16>
    %c1_94 = arith.constant 1 : index
    %c0_95 = arith.constant 0 : index
    %c0_96 = arith.constant 0 : index
    %299 = vector.load %arg2[%c1_94, %c0_95, %c0_96] : memref<2x128x384xbf16, #tpu.memory_space<vmem>>, vector<1x128x384xbf16>
    %300 = vector.shape_cast %299 : vector<1x128x384xbf16> to vector<128x384xbf16>
    %cst_97 = arith.constant dense<0.000000e+00> : vector<128x384xf32>
    %301 = tpu.matmul %298, %300, %cst_97 {dimension_numbers = #tpu.dot_dimension_numbers<[1], [0], [0], [1], [0, 0, 1, 1], [], []>} : vector<128x128xbf16>, vector<128x384xbf16>, vector<128x384xf32> -> vector<128x384xf32>
    %c1_98 = arith.constant 1 : index
    %c0_99 = arith.constant 0 : index
    %c0_100 = arith.constant 0 : index
    %302 = vector.load %arg4[%c1_98, %c0_99, %c0_100] : memref<2x1x384xf32, #tpu.memory_space<vmem>>, vector<1x1x384xf32>
    %303 = vector.shape_cast %302 : vector<1x1x384xf32> to vector<1x384xf32>
    %304 = vector.broadcast %303 : vector<1x384xf32> to vector<128x384xf32>
    %305 = arith.addf %301, %304 : vector<128x384xf32>
    %306 = vector.shape_cast %305 : vector<128x384xf32> to vector<8x16x384xf32>
    %c0_101 = arith.constant 0 : index
    %c0_102 = arith.constant 0 : index
    %c0_103 = arith.constant 0 : index
    %307 = vector.load %arg13[%c0_101, %c0_102, %c0_103] : memref<8x16x384xf32, #tpu.memory_space<vmem>>, vector<8x16x384xf32>
    tpu.vector_store %arg13[%c0_101, %c0_102, %c0_103], %306 {strides = array<i32>} : memref<8x16x384xf32, #tpu.memory_space<vmem>>, vector<8x16x384xf32>,
    %c1_104 = arith.constant 1 : index
    %c0_105 = arith.constant 0 : index
    %c0_106 = arith.constant 0 : index
    %308 = vector.load %arg3[%c1_104, %c0_105, %c0_106] : memref<2x128x384xbf16, #tpu.memory_space<vmem>>, vector<1x128x384xbf16>
    %309 = vector.shape_cast %308 : vector<1x128x384xbf16> to vector<128x384xbf16>
    %c1_107 = arith.constant 1 : index
    %c0_108 = arith.constant 0 : index
    %c0_109 = arith.constant 0 : index
    %310 = vector.load %arg5[%c1_107, %c0_108, %c0_109] : memref<2x1x384xf32, #tpu.memory_space<vmem>>, vector<1x1x384xf32>
    %311 = vector.shape_cast %310 : vector<1x1x384xf32> to vector<1x384xf32>
    %cst_110 = arith.constant 0.000000e+00 : f32
    %312 = vector.broadcast %cst_110 : f32 to vector<16x128xf32>
    %313 = arith.truncf %312 : vector<16x128xf32> to vector<16x128xbf16>
    %cst_111 = arith.constant dense<0.000000e+00> : vector<16x384xf32>
    %314 = tpu.matmul %313, %309, %cst_111 {dimension_numbers = #tpu.dot_dimension_numbers<[1], [0], [0], [1], [0, 0, 1, 1], [], []>} : vector<16x128xbf16>, vector<128x384xbf16>, vector<16x384xf32> -> vector<16x384xf32>
    %315 = vector.broadcast %311 : vector<1x384xf32> to vector<16x384xf32>
    %316 = arith.addf %314, %315 : vector<16x384xf32>
    %c0_112 = arith.constant 0 : index
    %c0_113 = arith.constant 0 : index
    %c0_114 = arith.constant 0 : index
    %317 = vector.load %arg13[%c0_112, %c0_113, %c0_114] : memref<8x16x384xf32, #tpu.memory_space<vmem>>, vector<1x16x384xf32>
    %318 = vector.shape_cast %317 : vector<1x16x384xf32> to vector<16x384xf32>
    %319 = vector.extract_strided_slice %318 {offsets = [0, 0], sizes = [16, 128], strides = [1, 1]} : vector<16x384xf32> to vector<16x128xf32>
    %320 = vector.extract_strided_slice %316 {offsets = [0, 0], sizes = [16, 128], strides = [1, 1]} : vector<16x384xf32> to vector<16x128xf32>
    %321 = arith.addf %319, %320 : vector<16x128xf32>
    %322 = arith.negf %321 : vector<16x128xf32>
    %323 = math.exp %322 : vector<16x128xf32>
    %cst_115 = arith.constant 1.000000e+00 : f32
    %324 = vector.broadcast %cst_115 : f32 to vector<16x128xf32>
    %325 = arith.addf %324, %323 : vector<16x128xf32>
    %326 = arith.divf %324, %325 : vector<16x128xf32>
    %327 = vector.extract_strided_slice %318 {offsets = [0, 128], sizes = [16, 128], strides = [1, 1]} : vector<16x384xf32> to vector<16x128xf32>
    %328 = vector.extract_strided_slice %316 {offsets = [0, 128], sizes = [16, 128], strides = [1, 1]} : vector<16x384xf32> to vector<16x128xf32>
    %329 = arith.addf %327, %328 : vector<16x128xf32>
    %330 = arith.negf %329 : vector<16x128xf32>
    %331 = math.exp %330 : vector<16x128xf32>
    %cst_116 = arith.constant 1.000000e+00 : f32
    %332 = vector.broadcast %cst_116 : f32 to vector<16x128xf32>
    %333 = arith.addf %332, %331 : vector<16x128xf32>
    %334 = arith.divf %332, %333 : vector<16x128xf32>
    %335 = vector.extract_strided_slice %318 {offsets = [0, 256], sizes = [16, 128], strides = [1, 1]} : vector<16x384xf32> to vector<16x128xf32>
    %336 = vector.extract_strided_slice %316 {offsets = [0, 256], sizes = [16, 128], strides = [1, 1]} : vector<16x384xf32> to vector<16x128xf32>
    %337 = arith.mulf %326, %336 : vector<16x128xf32>
    %338 = arith.addf %335, %337 : vector<16x128xf32>
    %339 = math.tanh %338 : vector<16x128xf32>
    %cst_117 = arith.constant 1.000000e+00 : f32
    %340 = vector.broadcast %cst_117 : f32 to vector<16x128xf32>
    %341 = arith.subf %340, %334 : vector<16x128xf32>
    %342 = arith.mulf %341, %339 : vector<16x128xf32>
    %343 = arith.mulf %334, %312 : vector<16x128xf32>
    %344 = arith.addf %342, %343 : vector<16x128xf32>
    %345 = arith.truncf %344 : vector<16x128xf32> to vector<16x128xbf16>
    %cst_118 = arith.constant dense<0.000000e+00> : vector<16x384xf32>
    %346 = tpu.matmul %345, %309, %cst_118 {dimension_numbers = #tpu.dot_dimension_numbers<[1], [0], [0], [1], [0, 0, 1, 1], [], []>} : vector<16x128xbf16>, vector<128x384xbf16>, vector<16x384xf32> -> vector<16x384xf32>
    %347 = vector.broadcast %311 : vector<1x384xf32> to vector<16x384xf32>
    %348 = arith.addf %346, %347 : vector<16x384xf32>
    %c1_119 = arith.constant 1 : index
    %c0_120 = arith.constant 0 : index
    %c0_121 = arith.constant 0 : index
    %349 = vector.load %arg13[%c1_119, %c0_120, %c0_121] : memref<8x16x384xf32, #tpu.memory_space<vmem>>, vector<1x16x384xf32>
    %350 = vector.shape_cast %349 : vector<1x16x384xf32> to vector<16x384xf32>
    %351 = vector.extract_strided_slice %350 {offsets = [0, 0], sizes = [16, 128], strides = [1, 1]} : vector<16x384xf32> to vector<16x128xf32>
    %352 = vector.extract_strided_slice %348 {offsets = [0, 0], sizes = [16, 128], strides = [1, 1]} : vector<16x384xf32> to vector<16x128xf32>
    %353 = arith.addf %351, %352 : vector<16x128xf32>
    %354 = arith.negf %353 : vector<16x128xf32>
    %355 = math.exp %354 : vector<16x128xf32>
    %cst_122 = arith.constant 1.000000e+00 : f32
    %356 = vector.broadcast %cst_122 : f32 to vector<16x128xf32>
    %357 = arith.addf %356, %355 : vector<16x128xf32>
    %358 = arith.divf %356, %357 : vector<16x128xf32>
    %359 = vector.extract_strided_slice %350 {offsets = [0, 128], sizes = [16, 128], strides = [1, 1]} : vector<16x384xf32> to vector<16x128xf32>
    %360 = vector.extract_strided_slice %348 {offsets = [0, 128], sizes = [16, 128], strides = [1, 1]} : vector<16x384xf32> to vector<16x128xf32>
    %361 = arith.addf %359, %360 : vector<16x128xf32>
    %362 = arith.negf %361 : vector<16x128xf32>
    %363 = math.exp %362 : vector<16x128xf32>
    %cst_123 = arith.constant 1.000000e+00 : f32
    %364 = vector.broadcast %cst_123 : f32 to vector<16x128xf32>
    %365 = arith.addf %364, %363 : vector<16x128xf32>
    %366 = arith.divf %364, %365 : vector<16x128xf32>
    %367 = vector.extract_strided_slice %350 {offsets = [0, 256], sizes = [16, 128], strides = [1, 1]} : vector<16x384xf32> to vector<16x128xf32>
    %368 = vector.extract_strided_slice %348 {offsets = [0, 256], sizes = [16, 128], strides = [1, 1]} : vector<16x384xf32> to vector<16x128xf32>
    %369 = arith.mulf %358, %368 : vector<16x128xf32>
    %370 = arith.addf %367, %369 : vector<16x128xf32>
    %371 = math.tanh %370 : vector<16x128xf32>
    %cst_124 = arith.constant 1.000000e+00 : f32
    %372 = vector.broadcast %cst_124 : f32 to vector<16x128xf32>
    %373 = arith.subf %372, %366 : vector<16x128xf32>
    %374 = arith.mulf %373, %371 : vector<16x128xf32>
    %375 = arith.mulf %366, %344 : vector<16x128xf32>
    %376 = arith.addf %374, %375 : vector<16x128xf32>
    %377 = arith.truncf %376 : vector<16x128xf32> to vector<16x128xbf16>
    %cst_125 = arith.constant dense<0.000000e+00> : vector<16x384xf32>
    %378 = tpu.matmul %377, %309, %cst_125 {dimension_numbers = #tpu.dot_dimension_numbers<[1], [0], [0], [1], [0, 0, 1, 1], [], []>} : vector<16x128xbf16>, vector<128x384xbf16>, vector<16x384xf32> -> vector<16x384xf32>
    %379 = vector.broadcast %311 : vector<1x384xf32> to vector<16x384xf32>
    %380 = arith.addf %378, %379 : vector<16x384xf32>
    %c2_126 = arith.constant 2 : index
    %c0_127 = arith.constant 0 : index
    %c0_128 = arith.constant 0 : index
    %381 = vector.load %arg13[%c2_126, %c0_127, %c0_128] : memref<8x16x384xf32, #tpu.memory_space<vmem>>, vector<1x16x384xf32>
    %382 = vector.shape_cast %381 : vector<1x16x384xf32> to vector<16x384xf32>
    %383 = vector.extract_strided_slice %382 {offsets = [0, 0], sizes = [16, 128], strides = [1, 1]} : vector<16x384xf32> to vector<16x128xf32>
    %384 = vector.extract_strided_slice %380 {offsets = [0, 0], sizes = [16, 128], strides = [1, 1]} : vector<16x384xf32> to vector<16x128xf32>
    %385 = arith.addf %383, %384 : vector<16x128xf32>
    %386 = arith.negf %385 : vector<16x128xf32>
    %387 = math.exp %386 : vector<16x128xf32>
    %cst_129 = arith.constant 1.000000e+00 : f32
    %388 = vector.broadcast %cst_129 : f32 to vector<16x128xf32>
    %389 = arith.addf %388, %387 : vector<16x128xf32>
    %390 = arith.divf %388, %389 : vector<16x128xf32>
    %391 = vector.extract_strided_slice %382 {offsets = [0, 128], sizes = [16, 128], strides = [1, 1]} : vector<16x384xf32> to vector<16x128xf32>
    %392 = vector.extract_strided_slice %380 {offsets = [0, 128], sizes = [16, 128], strides = [1, 1]} : vector<16x384xf32> to vector<16x128xf32>
    %393 = arith.addf %391, %392 : vector<16x128xf32>
    %394 = arith.negf %393 : vector<16x128xf32>
    %395 = math.exp %394 : vector<16x128xf32>
    %cst_130 = arith.constant 1.000000e+00 : f32
    %396 = vector.broadcast %cst_130 : f32 to vector<16x128xf32>
    %397 = arith.addf %396, %395 : vector<16x128xf32>
    %398 = arith.divf %396, %397 : vector<16x128xf32>
    %399 = vector.extract_strided_slice %382 {offsets = [0, 256], sizes = [16, 128], strides = [1, 1]} : vector<16x384xf32> to vector<16x128xf32>
    %400 = vector.extract_strided_slice %380 {offsets = [0, 256], sizes = [16, 128], strides = [1, 1]} : vector<16x384xf32> to vector<16x128xf32>
    %401 = arith.mulf %390, %400 : vector<16x128xf32>
    %402 = arith.addf %399, %401 : vector<16x128xf32>
    %403 = math.tanh %402 : vector<16x128xf32>
    %cst_131 = arith.constant 1.000000e+00 : f32
    %404 = vector.broadcast %cst_131 : f32 to vector<16x128xf32>
    %405 = arith.subf %404, %398 : vector<16x128xf32>
    %406 = arith.mulf %405, %403 : vector<16x128xf32>
    %407 = arith.mulf %398, %376 : vector<16x128xf32>
    %408 = arith.addf %406, %407 : vector<16x128xf32>
    %409 = arith.truncf %408 : vector<16x128xf32> to vector<16x128xbf16>
    %cst_132 = arith.constant dense<0.000000e+00> : vector<16x384xf32>
    %410 = tpu.matmul %409, %309, %cst_132 {dimension_numbers = #tpu.dot_dimension_numbers<[1], [0], [0], [1], [0, 0, 1, 1], [], []>} : vector<16x128xbf16>, vector<128x384xbf16>, vector<16x384xf32> -> vector<16x384xf32>
    %411 = vector.broadcast %311 : vector<1x384xf32> to vector<16x384xf32>
    %412 = arith.addf %410, %411 : vector<16x384xf32>
    %c3_133 = arith.constant 3 : index
    %c0_134 = arith.constant 0 : index
    %c0_135 = arith.constant 0 : index
    %413 = vector.load %arg13[%c3_133, %c0_134, %c0_135] : memref<8x16x384xf32, #tpu.memory_space<vmem>>, vector<1x16x384xf32>
    %414 = vector.shape_cast %413 : vector<1x16x384xf32> to vector<16x384xf32>
    %415 = vector.extract_strided_slice %414 {offsets = [0, 0], sizes = [16, 128], strides = [1, 1]} : vector<16x384xf32> to vector<16x128xf32>
    %416 = vector.extract_strided_slice %412 {offsets = [0, 0], sizes = [16, 128], strides = [1, 1]} : vector<16x384xf32> to vector<16x128xf32>
    %417 = arith.addf %415, %416 : vector<16x128xf32>
    %418 = arith.negf %417 : vector<16x128xf32>
    %419 = math.exp %418 : vector<16x128xf32>
    %cst_136 = arith.constant 1.000000e+00 : f32
    %420 = vector.broadcast %cst_136 : f32 to vector<16x128xf32>
    %421 = arith.addf %420, %419 : vector<16x128xf32>
    %422 = arith.divf %420, %421 : vector<16x128xf32>
    %423 = vector.extract_strided_slice %414 {offsets = [0, 128], sizes = [16, 128], strides = [1, 1]} : vector<16x384xf32> to vector<16x128xf32>
    %424 = vector.extract_strided_slice %412 {offsets = [0, 128], sizes = [16, 128], strides = [1, 1]} : vector<16x384xf32> to vector<16x128xf32>
    %425 = arith.addf %423, %424 : vector<16x128xf32>
    %426 = arith.negf %425 : vector<16x128xf32>
    %427 = math.exp %426 : vector<16x128xf32>
    %cst_137 = arith.constant 1.000000e+00 : f32
    %428 = vector.broadcast %cst_137 : f32 to vector<16x128xf32>
    %429 = arith.addf %428, %427 : vector<16x128xf32>
    %430 = arith.divf %428, %429 : vector<16x128xf32>
    %431 = vector.extract_strided_slice %414 {offsets = [0, 256], sizes = [16, 128], strides = [1, 1]} : vector<16x384xf32> to vector<16x128xf32>
    %432 = vector.extract_strided_slice %412 {offsets = [0, 256], sizes = [16, 128], strides = [1, 1]} : vector<16x384xf32> to vector<16x128xf32>
    %433 = arith.mulf %422, %432 : vector<16x128xf32>
    %434 = arith.addf %431, %433 : vector<16x128xf32>
    %435 = math.tanh %434 : vector<16x128xf32>
    %cst_138 = arith.constant 1.000000e+00 : f32
    %436 = vector.broadcast %cst_138 : f32 to vector<16x128xf32>
    %437 = arith.subf %436, %430 : vector<16x128xf32>
    %438 = arith.mulf %437, %435 : vector<16x128xf32>
    %439 = arith.mulf %430, %408 : vector<16x128xf32>
    %440 = arith.addf %438, %439 : vector<16x128xf32>
    %441 = arith.truncf %440 : vector<16x128xf32> to vector<16x128xbf16>
    %cst_139 = arith.constant dense<0.000000e+00> : vector<16x384xf32>
    %442 = tpu.matmul %441, %309, %cst_139 {dimension_numbers = #tpu.dot_dimension_numbers<[1], [0], [0], [1], [0, 0, 1, 1], [], []>} : vector<16x128xbf16>, vector<128x384xbf16>, vector<16x384xf32> -> vector<16x384xf32>
    %443 = vector.broadcast %311 : vector<1x384xf32> to vector<16x384xf32>
    %444 = arith.addf %442, %443 : vector<16x384xf32>
    %c4_140 = arith.constant 4 : index
    %c0_141 = arith.constant 0 : index
    %c0_142 = arith.constant 0 : index
    %445 = vector.load %arg13[%c4_140, %c0_141, %c0_142] : memref<8x16x384xf32, #tpu.memory_space<vmem>>, vector<1x16x384xf32>
    %446 = vector.shape_cast %445 : vector<1x16x384xf32> to vector<16x384xf32>
    %447 = vector.extract_strided_slice %446 {offsets = [0, 0], sizes = [16, 128], strides = [1, 1]} : vector<16x384xf32> to vector<16x128xf32>
    %448 = vector.extract_strided_slice %444 {offsets = [0, 0], sizes = [16, 128], strides = [1, 1]} : vector<16x384xf32> to vector<16x128xf32>
    %449 = arith.addf %447, %448 : vector<16x128xf32>
    %450 = arith.negf %449 : vector<16x128xf32>
    %451 = math.exp %450 : vector<16x128xf32>
    %cst_143 = arith.constant 1.000000e+00 : f32
    %452 = vector.broadcast %cst_143 : f32 to vector<16x128xf32>
    %453 = arith.addf %452, %451 : vector<16x128xf32>
    %454 = arith.divf %452, %453 : vector<16x128xf32>
    %455 = vector.extract_strided_slice %446 {offsets = [0, 128], sizes = [16, 128], strides = [1, 1]} : vector<16x384xf32> to vector<16x128xf32>
    %456 = vector.extract_strided_slice %444 {offsets = [0, 128], sizes = [16, 128], strides = [1, 1]} : vector<16x384xf32> to vector<16x128xf32>
    %457 = arith.addf %455, %456 : vector<16x128xf32>
    %458 = arith.negf %457 : vector<16x128xf32>
    %459 = math.exp %458 : vector<16x128xf32>
    %cst_144 = arith.constant 1.000000e+00 : f32
    %460 = vector.broadcast %cst_144 : f32 to vector<16x128xf32>
    %461 = arith.addf %460, %459 : vector<16x128xf32>
    %462 = arith.divf %460, %461 : vector<16x128xf32>
    %463 = vector.extract_strided_slice %446 {offsets = [0, 256], sizes = [16, 128], strides = [1, 1]} : vector<16x384xf32> to vector<16x128xf32>
    %464 = vector.extract_strided_slice %444 {offsets = [0, 256], sizes = [16, 128], strides = [1, 1]} : vector<16x384xf32> to vector<16x128xf32>
    %465 = arith.mulf %454, %464 : vector<16x128xf32>
    %466 = arith.addf %463, %465 : vector<16x128xf32>
    %467 = math.tanh %466 : vector<16x128xf32>
    %cst_145 = arith.constant 1.000000e+00 : f32
    %468 = vector.broadcast %cst_145 : f32 to vector<16x128xf32>
    %469 = arith.subf %468, %462 : vector<16x128xf32>
    %470 = arith.mulf %469, %467 : vector<16x128xf32>
    %471 = arith.mulf %462, %440 : vector<16x128xf32>
    %472 = arith.addf %470, %471 : vector<16x128xf32>
    %473 = arith.truncf %472 : vector<16x128xf32> to vector<16x128xbf16>
    %cst_146 = arith.constant dense<0.000000e+00> : vector<16x384xf32>
    %474 = tpu.matmul %473, %309, %cst_146 {dimension_numbers = #tpu.dot_dimension_numbers<[1], [0], [0], [1], [0, 0, 1, 1], [], []>} : vector<16x128xbf16>, vector<128x384xbf16>, vector<16x384xf32> -> vector<16x384xf32>
    %475 = vector.broadcast %311 : vector<1x384xf32> to vector<16x384xf32>
    %476 = arith.addf %474, %475 : vector<16x384xf32>
    %c5_147 = arith.constant 5 : index
    %c0_148 = arith.constant 0 : index
    %c0_149 = arith.constant 0 : index
    %477 = vector.load %arg13[%c5_147, %c0_148, %c0_149] : memref<8x16x384xf32, #tpu.memory_space<vmem>>, vector<1x16x384xf32>
    %478 = vector.shape_cast %477 : vector<1x16x384xf32> to vector<16x384xf32>
    %479 = vector.extract_strided_slice %478 {offsets = [0, 0], sizes = [16, 128], strides = [1, 1]} : vector<16x384xf32> to vector<16x128xf32>
    %480 = vector.extract_strided_slice %476 {offsets = [0, 0], sizes = [16, 128], strides = [1, 1]} : vector<16x384xf32> to vector<16x128xf32>
    %481 = arith.addf %479, %480 : vector<16x128xf32>
    %482 = arith.negf %481 : vector<16x128xf32>
    %483 = math.exp %482 : vector<16x128xf32>
    %cst_150 = arith.constant 1.000000e+00 : f32
    %484 = vector.broadcast %cst_150 : f32 to vector<16x128xf32>
    %485 = arith.addf %484, %483 : vector<16x128xf32>
    %486 = arith.divf %484, %485 : vector<16x128xf32>
    %487 = vector.extract_strided_slice %478 {offsets = [0, 128], sizes = [16, 128], strides = [1, 1]} : vector<16x384xf32> to vector<16x128xf32>
    %488 = vector.extract_strided_slice %476 {offsets = [0, 128], sizes = [16, 128], strides = [1, 1]} : vector<16x384xf32> to vector<16x128xf32>
    %489 = arith.addf %487, %488 : vector<16x128xf32>
    %490 = arith.negf %489 : vector<16x128xf32>
    %491 = math.exp %490 : vector<16x128xf32>
    %cst_151 = arith.constant 1.000000e+00 : f32
    %492 = vector.broadcast %cst_151 : f32 to vector<16x128xf32>
    %493 = arith.addf %492, %491 : vector<16x128xf32>
    %494 = arith.divf %492, %493 : vector<16x128xf32>
    %495 = vector.extract_strided_slice %478 {offsets = [0, 256], sizes = [16, 128], strides = [1, 1]} : vector<16x384xf32> to vector<16x128xf32>
    %496 = vector.extract_strided_slice %476 {offsets = [0, 256], sizes = [16, 128], strides = [1, 1]} : vector<16x384xf32> to vector<16x128xf32>
    %497 = arith.mulf %486, %496 : vector<16x128xf32>
    %498 = arith.addf %495, %497 : vector<16x128xf32>
    %499 = math.tanh %498 : vector<16x128xf32>
    %cst_152 = arith.constant 1.000000e+00 : f32
    %500 = vector.broadcast %cst_152 : f32 to vector<16x128xf32>
    %501 = arith.subf %500, %494 : vector<16x128xf32>
    %502 = arith.mulf %501, %499 : vector<16x128xf32>
    %503 = arith.mulf %494, %472 : vector<16x128xf32>
    %504 = arith.addf %502, %503 : vector<16x128xf32>
    %505 = arith.truncf %504 : vector<16x128xf32> to vector<16x128xbf16>
    %cst_153 = arith.constant dense<0.000000e+00> : vector<16x384xf32>
    %506 = tpu.matmul %505, %309, %cst_153 {dimension_numbers = #tpu.dot_dimension_numbers<[1], [0], [0], [1], [0, 0, 1, 1], [], []>} : vector<16x128xbf16>, vector<128x384xbf16>, vector<16x384xf32> -> vector<16x384xf32>
    %507 = vector.broadcast %311 : vector<1x384xf32> to vector<16x384xf32>
    %508 = arith.addf %506, %507 : vector<16x384xf32>
    %c6_154 = arith.constant 6 : index
    %c0_155 = arith.constant 0 : index
    %c0_156 = arith.constant 0 : index
    %509 = vector.load %arg13[%c6_154, %c0_155, %c0_156] : memref<8x16x384xf32, #tpu.memory_space<vmem>>, vector<1x16x384xf32>
    %510 = vector.shape_cast %509 : vector<1x16x384xf32> to vector<16x384xf32>
    %511 = vector.extract_strided_slice %510 {offsets = [0, 0], sizes = [16, 128], strides = [1, 1]} : vector<16x384xf32> to vector<16x128xf32>
    %512 = vector.extract_strided_slice %508 {offsets = [0, 0], sizes = [16, 128], strides = [1, 1]} : vector<16x384xf32> to vector<16x128xf32>
    %513 = arith.addf %511, %512 : vector<16x128xf32>
    %514 = arith.negf %513 : vector<16x128xf32>
    %515 = math.exp %514 : vector<16x128xf32>
    %cst_157 = arith.constant 1.000000e+00 : f32
    %516 = vector.broadcast %cst_157 : f32 to vector<16x128xf32>
    %517 = arith.addf %516, %515 : vector<16x128xf32>
    %518 = arith.divf %516, %517 : vector<16x128xf32>
    %519 = vector.extract_strided_slice %510 {offsets = [0, 128], sizes = [16, 128], strides = [1, 1]} : vector<16x384xf32> to vector<16x128xf32>
    %520 = vector.extract_strided_slice %508 {offsets = [0, 128], sizes = [16, 128], strides = [1, 1]} : vector<16x384xf32> to vector<16x128xf32>
    %521 = arith.addf %519, %520 : vector<16x128xf32>
    %522 = arith.negf %521 : vector<16x128xf32>
    %523 = math.exp %522 : vector<16x128xf32>
    %cst_158 = arith.constant 1.000000e+00 : f32
    %524 = vector.broadcast %cst_158 : f32 to vector<16x128xf32>
    %525 = arith.addf %524, %523 : vector<16x128xf32>
    %526 = arith.divf %524, %525 : vector<16x128xf32>
    %527 = vector.extract_strided_slice %510 {offsets = [0, 256], sizes = [16, 128], strides = [1, 1]} : vector<16x384xf32> to vector<16x128xf32>
    %528 = vector.extract_strided_slice %508 {offsets = [0, 256], sizes = [16, 128], strides = [1, 1]} : vector<16x384xf32> to vector<16x128xf32>
    %529 = arith.mulf %518, %528 : vector<16x128xf32>
    %530 = arith.addf %527, %529 : vector<16x128xf32>
    %531 = math.tanh %530 : vector<16x128xf32>
    %cst_159 = arith.constant 1.000000e+00 : f32
    %532 = vector.broadcast %cst_159 : f32 to vector<16x128xf32>
    %533 = arith.subf %532, %526 : vector<16x128xf32>
    %534 = arith.mulf %533, %531 : vector<16x128xf32>
    %535 = arith.mulf %526, %504 : vector<16x128xf32>
    %536 = arith.addf %534, %535 : vector<16x128xf32>
    %537 = arith.truncf %536 : vector<16x128xf32> to vector<16x128xbf16>
    %cst_160 = arith.constant dense<0.000000e+00> : vector<16x384xf32>
    %538 = tpu.matmul %537, %309, %cst_160 {dimension_numbers = #tpu.dot_dimension_numbers<[1], [0], [0], [1], [0, 0, 1, 1], [], []>} : vector<16x128xbf16>, vector<128x384xbf16>, vector<16x384xf32> -> vector<16x384xf32>
    %539 = vector.broadcast %311 : vector<1x384xf32> to vector<16x384xf32>
    %540 = arith.addf %538, %539 : vector<16x384xf32>
    %c7_161 = arith.constant 7 : index
    %c0_162 = arith.constant 0 : index
    %c0_163 = arith.constant 0 : index
    %541 = vector.load %arg13[%c7_161, %c0_162, %c0_163] : memref<8x16x384xf32, #tpu.memory_space<vmem>>, vector<1x16x384xf32>
    %542 = vector.shape_cast %541 : vector<1x16x384xf32> to vector<16x384xf32>
    %543 = vector.extract_strided_slice %542 {offsets = [0, 0], sizes = [16, 128], strides = [1, 1]} : vector<16x384xf32> to vector<16x128xf32>
    %544 = vector.extract_strided_slice %540 {offsets = [0, 0], sizes = [16, 128], strides = [1, 1]} : vector<16x384xf32> to vector<16x128xf32>
    %545 = arith.addf %543, %544 : vector<16x128xf32>
    %546 = arith.negf %545 : vector<16x128xf32>
    %547 = math.exp %546 : vector<16x128xf32>
    %cst_164 = arith.constant 1.000000e+00 : f32
    %548 = vector.broadcast %cst_164 : f32 to vector<16x128xf32>
    %549 = arith.addf %548, %547 : vector<16x128xf32>
    %550 = arith.divf %548, %549 : vector<16x128xf32>
    %551 = vector.extract_strided_slice %542 {offsets = [0, 128], sizes = [16, 128], strides = [1, 1]} : vector<16x384xf32> to vector<16x128xf32>
    %552 = vector.extract_strided_slice %540 {offsets = [0, 128], sizes = [16, 128], strides = [1, 1]} : vector<16x384xf32> to vector<16x128xf32>
    %553 = arith.addf %551, %552 : vector<16x128xf32>
    %554 = arith.negf %553 : vector<16x128xf32>
    %555 = math.exp %554 : vector<16x128xf32>
    %cst_165 = arith.constant 1.000000e+00 : f32
    %556 = vector.broadcast %cst_165 : f32 to vector<16x128xf32>
    %557 = arith.addf %556, %555 : vector<16x128xf32>
    %558 = arith.divf %556, %557 : vector<16x128xf32>
    %559 = vector.extract_strided_slice %542 {offsets = [0, 256], sizes = [16, 128], strides = [1, 1]} : vector<16x384xf32> to vector<16x128xf32>
    %560 = vector.extract_strided_slice %540 {offsets = [0, 256], sizes = [16, 128], strides = [1, 1]} : vector<16x384xf32> to vector<16x128xf32>
    %561 = arith.mulf %550, %560 : vector<16x128xf32>
    %562 = arith.addf %559, %561 : vector<16x128xf32>
    %563 = math.tanh %562 : vector<16x128xf32>
    %cst_166 = arith.constant 1.000000e+00 : f32
    %564 = vector.broadcast %cst_166 : f32 to vector<16x128xf32>
    %565 = arith.subf %564, %558 : vector<16x128xf32>
    %566 = arith.mulf %565, %563 : vector<16x128xf32>
    %567 = arith.mulf %558, %536 : vector<16x128xf32>
    %568 = arith.addf %566, %567 : vector<16x128xf32>
    %569 = arith.truncf %568 : vector<16x128xf32> to vector<16x128xbf16>
    %c0_167 = arith.constant 0 : index
    %c0_168 = arith.constant 0 : index
    %570 = vector.load %arg6[%c0_167, %c0_168] : memref<128x256xbf16, #tpu.memory_space<vmem>>, vector<128x256xbf16>
    %cst_169 = arith.constant dense<0.000000e+00> : vector<16x256xf32>
    %571 = tpu.matmul %569, %570, %cst_169 {dimension_numbers = #tpu.dot_dimension_numbers<[1], [0], [0], [1], [0, 0, 1, 1], [], []>} : vector<16x128xbf16>, vector<128x256xbf16>, vector<16x256xf32> -> vector<16x256xf32>
    %c0_170 = arith.constant 0 : index
    %c0_171 = arith.constant 0 : index
    %572 = vector.load %arg7[%c0_170, %c0_171] : memref<1x256xf32, #tpu.memory_space<vmem>>, vector<1x256xf32>
    %573 = vector.broadcast %572 : vector<1x256xf32> to vector<16x256xf32>
    %574 = arith.addf %571, %573 : vector<16x256xf32>
    %cst_172 = arith.constant 0.000000e+00 : f32
    %575 = vector.broadcast %cst_172 : f32 to vector<16x256xf32>
    %576 = arith.cmpf ogt, %574, %575 : vector<16x256xf32>
    %577 = math.exp %574 : vector<16x256xf32>
    %cst_173 = arith.constant 1.000000e+00 : f32
    %578 = vector.broadcast %cst_173 : f32 to vector<16x256xf32>
    %579 = arith.subf %577, %578 : vector<16x256xf32>
    %cst_174 = arith.constant 1.67326319 : f32
    %580 = vector.broadcast %cst_174 : f32 to vector<16x256xf32>
    %581 = arith.mulf %580, %579 : vector<16x256xf32>
    %582 = arith.select %576, %574, %581 : vector<16x256xi1>, vector<16x256xf32>
    %cst_175 = arith.constant 1.05070102 : f32
    %583 = vector.broadcast %cst_175 : f32 to vector<16x256xf32>
    %584 = arith.mulf %583, %582 : vector<16x256xf32>
    %585 = arith.truncf %584 : vector<16x256xf32> to vector<16x256xbf16>
    %c0_176 = arith.constant 0 : index
    %c0_177 = arith.constant 0 : index
    %586 = vector.load %arg8[%c0_176, %c0_177] : memref<256x128xbf16, #tpu.memory_space<vmem>>, vector<256x128xbf16>
    %cst_178 = arith.constant dense<0.000000e+00> : vector<16x128xf32>
    %587 = tpu.matmul %585, %586, %cst_178 {dimension_numbers = #tpu.dot_dimension_numbers<[1], [0], [0], [1], [0, 0, 1, 1], [], []>} : vector<16x256xbf16>, vector<256x128xbf16>, vector<16x128xf32> -> vector<16x128xf32>
    %c0_179 = arith.constant 0 : index
    %c0_180 = arith.constant 0 : index
    %588 = vector.load %arg9[%c0_179, %c0_180] : memref<1x128xf32, #tpu.memory_space<vmem>>, vector<1x128xf32>
    %589 = vector.broadcast %588 : vector<1x128xf32> to vector<16x128xf32>
    %590 = arith.addf %587, %589 : vector<16x128xf32>
    %cst_181 = arith.constant 0.000000e+00 : f32
    %591 = vector.broadcast %cst_181 : f32 to vector<16x128xf32>
    %592 = arith.cmpf ogt, %590, %591 : vector<16x128xf32>
    %593 = math.exp %590 : vector<16x128xf32>
    %cst_182 = arith.constant 1.000000e+00 : f32
    %594 = vector.broadcast %cst_182 : f32 to vector<16x128xf32>
    %595 = arith.subf %593, %594 : vector<16x128xf32>
    %cst_183 = arith.constant 1.67326319 : f32
    %596 = vector.broadcast %cst_183 : f32 to vector<16x128xf32>
    %597 = arith.mulf %596, %595 : vector<16x128xf32>
    %598 = arith.select %592, %590, %597 : vector<16x128xi1>, vector<16x128xf32>
    %cst_184 = arith.constant 1.05070102 : f32
    %599 = vector.broadcast %cst_184 : f32 to vector<16x128xf32>
    %600 = arith.mulf %599, %598 : vector<16x128xf32>
    %601 = arith.truncf %600 : vector<16x128xf32> to vector<16x128xbf16>
    %c0_185 = arith.constant 0 : index
    %c0_186 = arith.constant 0 : index
    %602 = vector.load %arg10[%c0_185, %c0_186] : memref<128x128xbf16, #tpu.memory_space<vmem>>, vector<128x128xbf16>
    %cst_187 = arith.constant dense<0.000000e+00> : vector<16x128xf32>
    %603 = tpu.matmul %601, %602, %cst_187 {dimension_numbers = #tpu.dot_dimension_numbers<[1], [0], [0], [1], [0, 0, 1, 1], [], []>} : vector<16x128xbf16>, vector<128x128xbf16>, vector<16x128xf32> -> vector<16x128xf32>
    %c0_188 = arith.constant 0 : index
    %c0_189 = arith.constant 0 : index
    %604 = vector.load %arg11[%c0_188, %c0_189] : memref<1x128xf32, #tpu.memory_space<vmem>>, vector<1x128xf32>
    %605 = vector.broadcast %604 : vector<1x128xf32> to vector<16x128xf32>
    %606 = arith.addf %603, %605 : vector<16x128xf32>
    %c0_190 = arith.constant 0 : index
    %c0_191 = arith.constant 0 : index
    %607 = vector.load %arg12[%c0_190, %c0_191] : memref<16x128xf32, #tpu.memory_space<vmem>>, vector<16x128xf32>
    tpu.vector_store %arg12[%c0_190, %c0_191], %606 {strides = array<i32>} : memref<16x128xf32, #tpu.memory_space<vmem>>, vector<16x128xf32>,
    return
  }
  func.func @transform_0(%arg0: i32) -> (i32, i32, i32) {
    %c0_i32 = arith.constant 0 : i32
    %c0_i32_0 = arith.constant 0 : i32
    %c0_i32_1 = arith.constant 0 : i32
    return %c0_i32, %arg0, %c0_i32_0 : i32, i32, i32
  }
  func.func @transform_1(%arg0: i32) -> (i32, i32, i32) {
    %c0_i32 = arith.constant 0 : i32
    %c0_i32_0 = arith.constant 0 : i32
    %c0_i32_1 = arith.constant 0 : i32
    %c0_i32_2 = arith.constant 0 : i32
    return %c0_i32, %c0_i32_0, %c0_i32_1 : i32, i32, i32
  }
  func.func @transform_2(%arg0: i32) -> (i32, i32, i32) {
    %c0_i32 = arith.constant 0 : i32
    %c0_i32_0 = arith.constant 0 : i32
    %c0_i32_1 = arith.constant 0 : i32
    %c0_i32_2 = arith.constant 0 : i32
    return %c0_i32, %c0_i32_0, %c0_i32_1 : i32, i32, i32
  }
  func.func @transform_3(%arg0: i32) -> (i32, i32, i32) {
    %c0_i32 = arith.constant 0 : i32
    %c0_i32_0 = arith.constant 0 : i32
    %c0_i32_1 = arith.constant 0 : i32
    %c0_i32_2 = arith.constant 0 : i32
    return %c0_i32, %c0_i32_0, %c0_i32_1 : i32, i32, i32
  }
  func.func @transform_4(%arg0: i32) -> (i32, i32, i32) {
    %c0_i32 = arith.constant 0 : i32
    %c0_i32_0 = arith.constant 0 : i32
    %c0_i32_1 = arith.constant 0 : i32
    %c0_i32_2 = arith.constant 0 : i32
    return %c0_i32, %c0_i32_0, %c0_i32_1 : i32, i32, i32
  }
  func.func @transform_5(%arg0: i32) -> (i32, i32) {
    %c0_i32 = arith.constant 0 : i32
    %c0_i32_0 = arith.constant 0 : i32
    %c0_i32_1 = arith.constant 0 : i32
    return %c0_i32, %c0_i32_0 : i32, i32
  }
  func.func @transform_6(%arg0: i32) -> (i32, i32) {
    %c0_i32 = arith.constant 0 : i32
    %c0_i32_0 = arith.constant 0 : i32
    %c0_i32_1 = arith.constant 0 : i32
    return %c0_i32, %c0_i32_0 : i32, i32
  }
  func.func @transform_7(%arg0: i32) -> (i32, i32) {
    %c0_i32 = arith.constant 0 : i32
    %c0_i32_0 = arith.constant 0 : i32
    %c0_i32_1 = arith.constant 0 : i32
    return %c0_i32, %c0_i32_0 : i32, i32
  }
  func.func @transform_8(%arg0: i32) -> (i32, i32) {
    %c0_i32 = arith.constant 0 : i32
    %c0_i32_0 = arith.constant 0 : i32
    %c0_i32_1 = arith.constant 0 : i32
    return %c0_i32, %c0_i32_0 : i32, i32
  }
  func.func @transform_9(%arg0: i32) -> (i32, i32) {
    %c0_i32 = arith.constant 0 : i32
    %c0_i32_0 = arith.constant 0 : i32
    %c0_i32_1 = arith.constant 0 : i32
    return %c0_i32, %c0_i32_0 : i32, i32
  }
  func.func @transform_10(%arg0: i32) -> (i32, i32) {
    %c0_i32 = arith.constant 0 : i32
    %c0_i32_0 = arith.constant 0 : i32
    %c0_i32_1 = arith.constant 0 : i32
    return %c0_i32, %c0_i32_0 : i32, i32
  }
  func.func @transform_11(%arg0: i32) -> (i32, i32) {
    %c0_i32 = arith.constant 0 : i32
    %c0_i32_0 = arith.constant 0 : i32
    return %arg0, %c0_i32 : i32, i32
  }
}

</mosaic_0001>

<bundles_post_ra>
// kernel: gru_model_forward.1
= control target key start
LH: loop header
LB: loop body
LE: loop exit
PB: predicated region body
PF: predicated region fallthrough
CT: control target
= control target key end

     0   :  { %16 = vsyncpa [#allocation5], 0  ;;  %s7156_s0 = inlined_call_operand.vmem [shape: bf16[8,16,128], index: 0, kind: input, shape index: {}]   ;;  %s7157_s1 = inlined_call_operand.hbm [shape: bf16[2,128,384], index: 1, kind: input, shape index: {}]   ;;  %s7158_s2 = inlined_call_operand.hbm [shape: bf16[2,128,384], index: 2, kind: input, shape index: {}]   ;;  %s7159_s3 = inlined_call_operand.vmem [shape: f32[2,1,384], index: 3, kind: input, shape index: {}]   ;;  %s7160_s4 = inlined_call_operand.vmem [shape: f32[2,1,384], index: 4, kind: input, shape index: {}]   ;;  %s7161_s5 = inlined_call_operand.hbm [shape: bf16[128,256], index: 5, kind: input, shape index: {}]   ;;  %s7162_s6 = inlined_call_operand.vmem [shape: f32[1,256], index: 6, kind: input, shape index: {}]   ;;  %s7163_s7 = inlined_call_operand.hbm [shape: bf16[256,128], index: 7, kind: input, shape index: {}]   ;;  %s7164_s8 = inlined_call_operand.vmem [shape: f32[1,128], index: 8, kind: input, shape index: {}]   ;;  %s7165_s9 = inlined_call_operand.vmem [shape: bf16[128,128], index: 9, kind: input, shape index: {}]   ;;  %s7166_s10 = inlined_call_operand.vmem [shape: f32[1,128], index: 10, kind: input, shape index: {}]   ;;  %s7167_s11 = inlined_call_operand.vmem [shape: f32[16,128], index: 11, kind: output, shape index: {}]  }
   0x1   :  { %17 = vsyncpa [#allocation7], 0 }
   0x2   :  { %18 = vsyncpa [#allocation10], 0  ;;  %s5752_s17 = smov [#allocation6]   ;;  %s5753_s19 = smov [#allocation4]  }
   0x3   :  { %s38_s18 = sshll.u32 %s5752_s17, 4  ;;  %s26_s20 = sshll.u32 %s5753_s19, 4  ;;  %s39_s18 = int_to_ptr.vmem [resolvable:$true] %s38_s18  ;;  %s5825_s20 = int_to_ptr.vmem [resolvable:$true] %s26_s20 }
   0x4   :  { %s5658_s23 = scalar_lea.hbm %s7158_s2, 6144 }
   0x5   :  { %p5659_p0 = scmp.ne.s32.totalorder %s7158_s2, %s5658_s23  ;;  %p5662_p1 = scmp.lt.u32.totalorder %s5658_s23, %s7158_s2 }
   0x7   :  { %p5664_p2 = pnand %p5662_p1, %p5659_p0 }
   0x9   :  { %5667 = shalt.err (!%p5664_p2)
}
   0xa   :  { %s5668_s28 = scalar_lea.vmem %s39_s18, 6144  ;;  %p5673_p4 = scmp.lt.s32.totalorder %s39_s18, %s39_s18 }
   0xb   :  { %p5669_p3 = scmp.ne.s32.totalorder %s39_s18, %s5668_s28  ;;  %p5674_p5 = scmp.lt.s32.totalorder %s5668_s28, %s5668_s28 }
   0xd   :  { %p5675_p6 = por %p5674_p5, %p5673_p4 }
   0xf   :  { %p5676_p7 = pnand %p5675_p6, %p5669_p3 }
  0x11   :  { %5679 = shalt.err (!%p5676_p7)
}
  0x12   :  { %s5754_s29 = smov 192   ;;  %s5755_s30 = smov 12  }
  0x13   :  { %44 = dma.hbm_to_vmem [thread:$0]  %s7158_s2, 6144, %s39_s18, [#allocation7], %s5754_s29, %s5754_s29, %s5755_s30  }
  0x14   :  { %s5680_s16 = scalar_lea.hbm %s7157_s1, 6144 }
  0x15   :  { %p5681_p8 = scmp.ne.s32.totalorder %s7157_s1, %s5680_s16  ;;  %p5684_p9 = scmp.lt.u32.totalorder %s5680_s16, %s7157_s1 }
  0x17   :  { %p5686_p10 = pnand %p5684_p9, %p5681_p8 }
  0x19   :  { %5689 = shalt.err (!%p5686_p10)
}
  0x1a   :  { %s5690_s23 = scalar_lea.vmem %s5825_s20, 6144  ;;  %p5695_p12 = scmp.lt.s32.totalorder %s5825_s20, %s5825_s20 }
  0x1b   :  { %p5691_p11 = scmp.ne.s32.totalorder %s5825_s20, %s5690_s23  ;;  %p5696_p13 = scmp.lt.s32.totalorder %s5690_s23, %s5690_s23 }
  0x1d   :  { %p5697_p0 = por %p5696_p13, %p5695_p12 }
  0x1f   :  { %p5698_p1 = pnand %p5697_p0, %p5691_p11 }
  0x21   :  { %5701 = shalt.err (!%p5698_p1)
}
  0x22   :  { %32 = dma.hbm_to_vmem [thread:$0]  %s7157_s1, 6144, %s5825_s20, [#allocation5], %s5754_s29, %s5754_s29, %s5755_s30  }
  0x23   :  { %s5756_s24 = smov [#allocation8]   ;;  %s5702_s28 = scalar_lea.hbm %s7161_s5, 2048 }
  0x24   :  { %s54_s25 = sshll.u32 %s5756_s24, 4  ;;  %p5703_p2 = scmp.ne.s32.totalorder %s7161_s5, %s5702_s28  ;;  %s55_s25 = int_to_ptr.vmem [resolvable:$true] %s54_s25 }
  0x25   :  { %p5706_p3 = scmp.lt.u32.totalorder %s5702_s28, %s7161_s5 }
  0x27   :  { %p5708_p4 = pnand %p5706_p3, %p5703_p2 }
  0x29   :  { %5711 = shalt.err (!%p5708_p4)
}
  0x2a   :  { %s5712_s16 = scalar_lea.vmem %s55_s25, 2048  ;;  %p5717_p6 = scmp.lt.s32.totalorder %s55_s25, %s55_s25 }
  0x2b   :  { %p5713_p5 = scmp.ne.s32.totalorder %s55_s25, %s5712_s16  ;;  %p5718_p7 = scmp.lt.s32.totalorder %s5712_s16, %s5712_s16 }
  0x2d   :  { %p5719_p8 = por %p5718_p7, %p5717_p6 }
  0x2f   :  { %p5720_p9 = pnand %p5719_p8, %p5713_p5 }
  0x31   :  { %5723 = shalt.err (!%p5720_p9)
}
  0x32   :  { %s5757_s1 = smov 128   ;;  %s5758_s20 = smov 8  }
  0x33   :  { %60 = dma.hbm_to_vmem [thread:$0]  %s7161_s5, 2048, %s55_s25, [#allocation7], %s5757_s1, %s5757_s1, %s5758_s20  }
  0x34   :  { %s5759_s17 = smov [#allocation9]   ;;  %s5724_s23 = scalar_lea.hbm %s7163_s7, 2048 }
  0x35   :  { %s68_s19 = sshll.u32 %s5759_s17, 4  ;;  %p5725_p10 = scmp.ne.s32.totalorder %s7163_s7, %s5724_s23  ;;  %s69_s19 = int_to_ptr.vmem [resolvable:$true] %s68_s19 }
  0x36   :  { %p5728_p11 = scmp.lt.u32.totalorder %s5724_s23, %s7163_s7 }
  0x38   :  { %p5730_p12 = pnand %p5728_p11, %p5725_p10 }
  0x3a   :  { %5733 = shalt.err (!%p5730_p12)
}
  0x3b   :  { %s5734_s27 = scalar_lea.vmem %s69_s19, 2048  ;;  %p5739_p0 = scmp.lt.s32.totalorder %s69_s19, %s69_s19 }
  0x3c   :  { %p5735_p13 = scmp.ne.s32.totalorder %s69_s19, %s5734_s27  ;;  %p5740_p1 = scmp.lt.s32.totalorder %s5734_s27, %s5734_s27 }
  0x3e   :  { %p5741_p2 = por %p5740_p1, %p5739_p0 }
  0x40   :  { %p5742_p3 = pnand %p5741_p2, %p5735_p13 }
  0x42   :  { %5745 = shalt.err (!%p5742_p3)
}
  0x43   :  { %s5760_s5 = smov 64   ;;  %s5761_s25 = smov 4  }
  0x44   :  { %74 = dma.hbm_to_vmem [thread:$0]  %s7163_s7, 2048, %s69_s19, [#allocation10], %s5760_s5, %s5760_s5, %s5761_s25  }
  0x45   :  { %5746 = dma.done.wait [#allocation5], 6144  }
  0x46   :  { %5747 = vsyncadd [#allocation5], 4294961152 }
  0x47   :  { %5748 = dma.done.wait [#allocation7], 8192  }
  0x48   :  { %5749 = vsyncadd [#allocation7], 4294959104 }
  0x49   :  { %5750 = dma.done.wait [#allocation10], 2048  }
  0x4a   :  { %5751 = vsyncadd [#allocation10], 4294965248  ;;  %v7168_v0 = vmov 0   ;;  %v5094_v1 = vld [vmem:[#allocation4 + $0x4] ss:$12 sps:$4 sm:$0xff]   ;;  %v5122_v29 = vld [vmem:[%s7156_s0 + $0x8] sm:$0xff]   ;;  %v144_v58 = vlaneseq }
  0x4b   :  { %367 = vmatprep.mubr.bf16.mxu0 %v7168_v0  ;;  %v5096_v2 = vld [vmem:[#allocation4] ss:$12 sps:$4 sm:$0xff]   ;;  %335 = vmatprep.subr.bf16.mxu0 %v5094_v1  ;;  %v5097_v3 = vld [vmem:[#allocation4 + $0x1c] ss:$12 sps:$4 sm:$0xff]   ;;  %v5099_v4 = vld [vmem:[#allocation4 + $0x18] ss:$12 sps:$4 sm:$0xff]  }
  0x4c   :  { %336 = vmatpush1.bf16.msra.mxu0 %v5096_v2  ;;  %v5100_v5 = vld [vmem:[#allocation4 + $0x34] ss:$12 sps:$4 sm:$0xff]   ;;  %v5102_v6 = vld [vmem:[#allocation4 + $0x30] ss:$12 sps:$4 sm:$0xff]   ;;  %v5103_v7 = vld [vmem:[#allocation4 + $0x4c] ss:$12 sps:$4 sm:$0xff]  }
  0x4d   :  { %337 = vmatprep.subr.bf16.mxu0 %v5097_v3  ;;  %v5105_v8 = vld [vmem:[#allocation4 + $0x48] ss:$12 sps:$4 sm:$0xff]   ;;  %v5118_v9 = vld [vmem:[%s7156_s0] sm:$0xff]   ;;  %v5114_v17 = vld [vmem:[#allocation4 + $0x90] ss:$12 sps:$4 sm:$0xff]   ;;  %v7170_v43 = vmov 0.0  }
  0x4e   :  { %v5106_v10 = vld [vmem:[#allocation4 + $0x64] ss:$12 sps:$4 sm:$0xff]   ;;  %4501 = vmatprep.mubr.bf16.mxu1 %v5118_v9  ;;  %v5108_v11 = vld [vmem:[#allocation4 + $0x60] ss:$12 sps:$4 sm:$0xff]   ;;  %v5109_v12 = vld [vmem:[#allocation4 + $0x7c] ss:$12 sps:$4 sm:$0xff]  }
  0x4f   :  { %v5111_v13 = vld [vmem:[#allocation4 + $0x78] ss:$12 sps:$4 sm:$0xff]   ;;  %v5131_v14 = vld [vmem:[#allocation4 + $0x8] ss:$12 sps:$4 sm:$0xff]   ;;  %v5135_v16 = vld [vmem:[#allocation4 + $0x20] ss:$12 sps:$4 sm:$0xff]  }
  0x50   :  { %338 = vmatpush1.bf16.msra.mxu0 %v5099_v4  ;;  %v5112_v15 = vld [vmem:[#allocation4 + $0x94] ss:$12 sps:$4 sm:$0xff]   ;;  %4485 = vmatprep.subr.bf16.mxu1 %v5131_v14  ;;  %v5137_v18 = vld [vmem:[#allocation4 + $0x38] ss:$12 sps:$4 sm:$0xff]   ;;  %v5141_v21 = vld [vmem:[#allocation4 + $0x50] ss:$12 sps:$4 sm:$0xff]  }
  0x51   :  { %339 = vmatprep.subr.bf16.mxu0 %v5100_v5  ;;  %4486 = vmatpush3.bf16.msra.mxu1 %v5131_v14  ;;  %v5115_v19 = vld [vmem:[#allocation4 + $0xac] ss:$12 sps:$4 sm:$0xff]   ;;  %v5117_v20 = vld [vmem:[#allocation4 + $0xa8] ss:$12 sps:$4 sm:$0xff]   ;;  %v5884_v22 = vld [vmem:[#allocation6 + $0x4] ss:$12 sps:$4 sm:$0xff]  }
  0x52   :  { %4487 = vmatprep.subr.bf16.mxu1 %v5135_v16  ;;  %v5886_v23 = vld [vmem:[#allocation6] ss:$12 sps:$4 sm:$0xff]   ;;  %v5888_v24 = vld [vmem:[#allocation6 + $0x1c] ss:$12 sps:$4 sm:$0xff]   ;;  %v5891_v26 = vld [vmem:[#allocation6 + $0x18] ss:$12 sps:$4 sm:$0xff]  }
  0x53   :  { %v5143_v25 = vld [vmem:[#allocation4 + $0x68] ss:$12 sps:$4 sm:$0xff]   ;;  %v5147_v27 = vld [vmem:[#allocation4 + $0x80] ss:$12 sps:$4 sm:$0xff]   ;;  %v5901_v30 = vld [vmem:[#allocation6 + $0x30] ss:$12 sps:$4 sm:$0xff]  }
  0x54   :  { %340 = vmatpush1.bf16.msra.mxu0 %v5102_v6  ;;  %v5896_v28 = vld [vmem:[#allocation6 + $0x34] ss:$12 sps:$4 sm:$0xff]   ;;  %v5904_v31 = vld [vmem:[#allocation6 + $0x4c] ss:$12 sps:$4 sm:$0xff]   ;;  %v5153_v34 = vld [vmem:[#allocation4 + $0xb0] ss:$12 sps:$4 sm:$0xff]  }
  0x55   :  { %341 = vmatprep.subr.bf16.mxu0 %v5103_v7  ;;  %4488 = vmatpush3.bf16.msra.mxu1 %v5135_v16  ;;  %v5149_v32 = vld [vmem:[#allocation4 + $0x98] ss:$12 sps:$4 sm:$0xff]   ;;  %v5907_v33 = vld [vmem:[#allocation6 + $0x48] ss:$12 sps:$4 sm:$0xff]   ;;  %v5917_v37 = vld [vmem:[#allocation6 + $0x60] ss:$12 sps:$4 sm:$0xff]  }
  0x56   :  { %4489 = vmatprep.subr.bf16.mxu1 %v5137_v18  ;;  %v5912_v35 = vld [vmem:[#allocation6 + $0x64] ss:$12 sps:$4 sm:$0xff]   ;;  %v5919_v38 = vld [vmem:[#allocation6 + $0x7c] ss:$12 sps:$4 sm:$0xff]   ;;  %v5927_v41 = vld [vmem:[#allocation6 + $0x94] ss:$12 sps:$4 sm:$0xff]  }
  0x57   :  { %v5126_v36 = vld [vmem:[%s7156_s0 + $0x10] sm:$0xff]   ;;  %v5925_v40 = vld [vmem:[#allocation6 + $0x78] ss:$12 sps:$4 sm:$0xff]   ;;  %v5936_v44 = vld [vmem:[#allocation6 + $0x20] ss:$12 sps:$4 sm:$0xff]   ;;  %vm5764_vm0 = vmmov 0  }
  0x58   :  { %342 = vmatpush1.bf16.msra.mxu0 %v5105_v8  ;;  %v5923_v39 = vld [vmem:[#allocation6 + $0x8] ss:$12 sps:$4 sm:$0xff]   ;;  %v5130_v42 = vld [vmem:[%s7156_s0 + $0x18] sm:$0xff]   ;;  %v5136_v49 = vld [vmem:[%s7156_s0 + $0x20] sm:$0xff]   ;;  %v145_v59 = vshrl.u32 %v144_v58, 7 }
  0x59   :  { %343 = vmatprep.subr.bf16.mxu0 %v5106_v10  ;;  %4490 = vmatpush3.bf16.msra.mxu1 %v5137_v18  ;;  %v5938_v45 = vld [vmem:[#allocation6 + $0x90] ss:$12 sps:$4 sm:$0xff]   ;;  %v5940_v46 = vld [vmem:[#allocation6 + $0xac] ss:$12 sps:$4 sm:$0xff]   ;;  %v5948_v48 = vld [vmem:[#allocation6 + $0xa8] ss:$12 sps:$4 sm:$0xff]  }
  0x5a   :  { %4491 = vmatprep.subr.bf16.mxu1 %v5141_v21  ;;  %v5946_v47 = vld [vmem:[#allocation6 + $0x38] ss:$12 sps:$4 sm:$0xff]   ;;  %v5958_v50 = vld [vmem:[#allocation6 + $0x50] ss:$12 sps:$4 sm:$0xff]   ;;  %v5963_v51 = vld [vmem:[#allocation6 + $0x68] ss:$12 sps:$4 sm:$0xff]  }
  0x5b   :  { %v5142_v52 = vld [vmem:[%s7156_s0 + $0x28] sm:$0xff]   ;;  %v5148_v53 = vld [vmem:[%s7156_s0 + $0x30] sm:$0xff]   ;;  %v5979_v55 = vld [vmem:[#allocation6 + $0x98] ss:$12 sps:$4 sm:$0xff]   ;;  %v6034_v60 = vsub.s32 2, %v145_v59 }
  0x5c   :  { %344 = vmatpush1.bf16.msra.mxu0 %v5108_v11  ;;  %v5975_v54 = vld [vmem:[#allocation6 + $0x80] ss:$12 sps:$4 sm:$0xff]   ;;  %v5154_v56 = vld [vmem:[%s7156_s0 + $0x38] sm:$0xff]  }
  0x5d   :  { %345 = vmatprep.subr.bf16.mxu0 %v5109_v12  ;;  %4492 = vmatpush3.bf16.msra.mxu1 %v5141_v21  ;;  %v5987_v57 = vld [vmem:[#allocation6 + $0xb0] ss:$12 sps:$4 sm:$0xff]   ;;  %7180 = vst [vmem:[#allocation14_spill] sm:$0xff] %v6034_v60  ;;  %v142_v61 = vld [vmem:[%s7159_s3] sm:$0x7] }
  0x5e   :  { %4493 = vmatprep.subr.bf16.mxu1 %v5143_v25  ;;  %v6040_v62 = vrot.slane %v142_v61, %v6034_v60 }
  0x60   :  { %346 = vmatpush1.bf16.msra.mxu0 %v5111_v13 }
  0x61   :  { %347 = vmatprep.subr.bf16.mxu0 %v5112_v15  ;;  %4494 = vmatpush3.bf16.msra.mxu1 %v5143_v25 }
  0x62   :  { %4495 = vmatprep.subr.bf16.mxu1 %v5147_v27 }
  0x64   :  { %348 = vmatpush1.bf16.msra.mxu0 %v5114_v17 }
  0x65   :  { %349 = vmatprep.subr.bf16.mxu0 %v5115_v19  ;;  %4496 = vmatpush3.bf16.msra.mxu1 %v5147_v27 }
  0x66   :  { %4497 = vmatprep.subr.bf16.mxu1 %v5149_v32 }
  0x68   :  { %350 = vmatpush1.bf16.msra.mxu0 %v5117_v20 }
  0x69   :  { %770 = vmatprep.subr.bf16.mxu0 %v5884_v22  ;;  %4498 = vmatpush3.bf16.msra.mxu1 %v5149_v32 }
  0x6a   :  { %4499 = vmatprep.subr.bf16.mxu1 %v5153_v34 }
  0x6b   :  { %368 = vmatmul.mubr.bf16.vlgmr.msra.gmra.mrb[0].mxu0 %v5118_v9 }
  0x6c   :  { %771 = vmatpush1.bf16.msra.mxu0 %v5886_v23  ;;  %377 = vmatprep.mubr.bf16.mxu0 %v7168_v0 }
  0x6d   :  { %772 = vmatprep.subr.bf16.mxu0 %v5888_v24  ;;  %4500 = vmatpush3.bf16.msra.mxu1 %v5153_v34 }
  0x6e   :  { %4517 = vmatprep.subr.bf16.mxu1 %v7170_v43 }
  0x70   :  { %773 = vmatpush1.bf16.msra.mxu0 %v5891_v26  ;;  %4502 = vmatmul.mubr.bf16.vlgmr.msra.gmra.mrb[0].mxu1 %v5122_v29 }
  0x71   :  { %774 = vmatprep.subr.bf16.mxu0 %v5896_v28  ;;  %4518 = vmatpush3.bf16.msra.mxu1 %v5923_v39 }
  0x72   :  { %4505 = vmatprep.mubr.bf16.mxu1 %v5126_v36  ;;  %4519 = vmatprep.subr.bf16.mxu1 %v7170_v43 }
  0x73   :  { %378 = vmatmul.mubr.bf16.gmra.mrb[4].mxu0 %v5122_v29 }
  0x74   :  { %387 = vmatprep.mubr.bf16.mxu0 %v7168_v0  ;;  %775 = vmatpush1.bf16.msra.mxu0 %v5901_v30 }
  0x75   :  { %776 = vmatprep.subr.bf16.mxu0 %v5904_v31  ;;  %4520 = vmatpush3.bf16.msra.mxu1 %v5936_v44 }
  0x76   :  { %4521 = vmatprep.subr.bf16.mxu1 %v7170_v43 }
  0x78   :  { %777 = vmatpush1.bf16.msra.mxu0 %v5907_v33  ;;  %4506 = vmatmul.mubr.bf16.gmra.mrb[4].mxu1 %v5130_v42 }
  0x79   :  { %778 = vmatprep.subr.bf16.mxu0 %v5912_v35  ;;  %4522 = vmatpush3.bf16.msra.mxu1 %v5946_v47 }
  0x7a   :  { %4509 = vmatprep.mubr.bf16.mxu1 %v5136_v49  ;;  %4523 = vmatprep.subr.bf16.mxu1 %v7170_v43 }
  0x7b   :  { %388 = vmatmul.mubr.bf16.gmra.mrb[8].mxu0 %v5126_v36 }
  0x7c   :  { %397 = vmatprep.mubr.bf16.mxu0 %v7168_v0  ;;  %779 = vmatpush1.bf16.msra.mxu0 %v5917_v37 }
  0x7d   :  { %780 = vmatprep.subr.bf16.mxu0 %v5919_v38  ;;  %4524 = vmatpush3.bf16.msra.mxu1 %v5958_v50 }
  0x7e   :  { %4525 = vmatprep.subr.bf16.mxu1 %v7170_v43 }
  0x80   :  { %781 = vmatpush1.bf16.msra.mxu0 %v5925_v40  ;;  %4510 = vmatmul.mubr.bf16.gmra.mrb[8].mxu1 %v5142_v52 }
  0x81   :  { %782 = vmatprep.subr.bf16.mxu0 %v5927_v41  ;;  %4526 = vmatpush3.bf16.msra.mxu1 %v5963_v51 }
  0x82   :  { %4513 = vmatprep.mubr.bf16.mxu1 %v5148_v53  ;;  %4527 = vmatprep.subr.bf16.mxu1 %v7170_v43 }
  0x83   :  { %398 = vmatmul.mubr.bf16.gmra.mrb[12].mxu0 %v5130_v42 }
  0x84   :  { %407 = vmatprep.mubr.bf16.mxu0 %v7168_v0  ;;  %783 = vmatpush1.bf16.msra.mxu0 %v5938_v45 }
  0x85   :  { %784 = vmatprep.subr.bf16.mxu0 %v5940_v46  ;;  %4528 = vmatpush3.bf16.msra.mxu1 %v5975_v54 }
  0x86   :  { %4529 = vmatprep.subr.bf16.mxu1 %v7170_v43 }
  0x88   :  { %785 = vmatpush1.bf16.msra.mxu0 %v5948_v48  ;;  %4514 = vmatmul.mubr.bf16.gmra.mrb[12].mxu1 %v5154_v56 }
  0x89   :  { %905 = vmatprep.subr.bf16.mxu0 %v5884_v22  ;;  %4530 = vmatpush3.bf16.msra.mxu1 %v5979_v55 }
  0x8a   :  { %4533 = vmatprep.mubr.msk.bf16.mxu1 %vm5764_vm0, %v7170_v43  ;;  %4531 = vmatprep.subr.bf16.mxu1 %v7170_v43 }
  0x8b   :  { %408 = vmatmul.mubr.bf16.gmra.mrb[16].mxu0 %v5136_v49 }
  0x8c   :  { %417 = vmatprep.mubr.bf16.mxu0 %v7168_v0 }
  0x8d   :  { %4532 = vmatpush3.bf16.msra.mxu1 %v5987_v57 }
  0x8e   :  { %4537 = vmatprep.subr.bf16.mxu1 %v7170_v43 }
  0x90   :  { %4534 = vmatmul.mubr.bf16.vlgmr.msra.gmra.mrb[16].mxu1 %v7168_v0 }
  0x91   :  { %4538 = vmatpush3.bf16.msra.mxu1 %v5923_v39  ;;  %4553 = vmatprep.mubr.msk.bf16.mxu1 %vm5764_vm0, %v7170_v43 }
  0x92   :  { %4539 = vmatprep.subr.bf16.mxu1 %v7170_v43 }
  0x93   :  { %418 = vmatmul.mubr.bf16.gmra.mrb[20].mxu0 %v5142_v52 }
  0x94   :  { %427 = vmatprep.mubr.bf16.mxu0 %v7168_v0 }
  0x95   :  { %4540 = vmatpush3.bf16.msra.mxu1 %v5936_v44 }
  0x96   :  { %4541 = vmatprep.subr.bf16.mxu1 %v7170_v43 }
  0x99   :  { %4542 = vmatpush3.bf16.msra.mxu1 %v5946_v47 }
  0x9a   :  { %4543 = vmatprep.subr.bf16.mxu1 %v7170_v43 }
  0x9b   :  { %428 = vmatmul.mubr.bf16.gmra.mrb[24].mxu0 %v5148_v53 }
  0x9c   :  { %437 = vmatprep.mubr.bf16.mxu0 %v7168_v0 }
  0x9d   :  { %4544 = vmatpush3.bf16.msra.mxu1 %v5958_v50 }
  0x9e   :  { %4545 = vmatprep.subr.bf16.mxu1 %v7170_v43 }
  0xa1   :  { %4546 = vmatpush3.bf16.msra.mxu1 %v5963_v51 }
  0xa2   :  { %4547 = vmatprep.subr.bf16.mxu1 %v7170_v43 }
  0xa3   :  { %438 = vmatmul.mubr.bf16.gmra.mrb[28].mxu0 %v5154_v56  ;;  %v6088_v56 = vsub.s32 0, %v145_v59 }
  0xa4   :  { %802 = vmatprep.mubr.bf16.mxu0 %v7168_v0 }
  0xa5   :  { %4548 = vmatpush3.bf16.msra.mxu1 %v5975_v54  ;;  %7181 = vst [vmem:[#allocation15_spill] sm:$0xff] %v6088_v56 }
  0xa6   :  { %4549 = vmatprep.subr.bf16.mxu1 %v7170_v43 }
  0xa9   :  { %4550 = vmatpush3.bf16.msra.mxu1 %v5979_v55 }
  0xaa   :  { %4551 = vmatprep.subr.bf16.mxu1 %v7170_v43 }
  0xab   :  { %803 = vmatmul.mubr.bf16.vlgmr.msra.gmra.mrb[0].mxu0 %v7168_v0 }
  0xac   :  { %906 = vmatpush1.bf16.msra.mxu0 %v5886_v23  ;;  %937 = vmatprep.mubr.bf16.mxu0 %v7168_v0 }
  0xad   :  { %907 = vmatprep.subr.bf16.mxu0 %v5888_v24  ;;  %4552 = vmatpush3.bf16.msra.mxu1 %v5987_v57 }
  0xae   :  { %4557 = vmatprep.subr.bf16.mxu1 %v7170_v43 }
  0xb0   :  { %908 = vmatpush1.bf16.msra.mxu0 %v5891_v26 }
  0xb1   :  { %909 = vmatprep.subr.bf16.mxu0 %v5896_v28 }
  0xb4   :  { %910 = vmatpush1.bf16.msra.mxu0 %v5901_v30 }
  0xb5   :  { %911 = vmatprep.subr.bf16.mxu0 %v5904_v31 }
  0xb8   :  { %912 = vmatpush1.bf16.msra.mxu0 %v5907_v33 }
  0xb9   :  { %913 = vmatprep.subr.bf16.mxu0 %v5912_v35 }
  0xbc   :  { %914 = vmatpush1.bf16.msra.mxu0 %v5917_v37 }
  0xbd   :  { %915 = vmatprep.subr.bf16.mxu0 %v5919_v38 }
  0xc0   :  { %916 = vmatpush1.bf16.msra.mxu0 %v5925_v40 }
  0xc1   :  { %917 = vmatprep.subr.bf16.mxu0 %v5927_v41 }
  0xc4   :  { %918 = vmatpush1.bf16.msra.mxu0 %v5938_v45 }
  0xc5   :  { %919 = vmatprep.subr.bf16.mxu0 %v5940_v46 }
  0xc8   :  { %920 = vmatpush1.bf16.msra.mxu0 %v5948_v48 }
  0xc9   :  { %1042 = vmatprep.subr.bf16.mxu0 %v5884_v22 }
 0x143   :  { %v4503_v63 = vpop.f32.mrb[0].mxu1 }
 0x144   :  { %v6043_v1 = vadd.f32 %v4503_v63, %v6040_v62  ;;  %v6045_v2 = vpop.f32.mrb[1].mxu1  ;;  %v625_v63 = vld [vmem:[%s7160_s4] sm:$0x7] }
 0x145   :  { %v4504_v3 = vpop.f32.mrb[2].mxu1 }
 0x146   :  { %v6048_v4 = vadd.f32 %v4504_v3, %v6040_v62  ;;  %v6050_v5 = vpop.f32.mrb[3].mxu1 }
 0x14b   :  { %v4507_v6 = vpop.f32.mrb[4].mxu1 }
 0x14c   :  { %v6053_v7 = vadd.f32 %v4507_v6, %v6040_v62  ;;  %v498_v8 = vpop.f32.mrb[5].mxu1  ;;  %v6093_v6 = vsub.s32 1, %v145_v59 }
 0x14d   :  { %v6056_v9 = vadd.f32 %v498_v8, %v6040_v62  ;;  %v4508_v10 = vpop.f32.mrb[6].mxu1  ;;  %v147_v8 = vrot.slane %v142_v61, %v6088_v56 }
 0x14e   :  { %v6059_v11 = vadd.f32 %v4508_v10, %v6040_v62  ;;  %v501_v12 = vpop.f32.mrb[7].mxu1  ;;  %7182 = vst [vmem:[#allocation16_spill] sm:$0xff] %v6093_v6  ;;  %v630_v10 = vrot.slane %v625_v63, %v6088_v56 }
 0x14f   :  { %v6062_v13 = vadd.f32 %v501_v12, %v6040_v62  ;;  %v151_v12 = vrot.slane %v142_v61, %v6093_v6 }
 0x153   :  { %v4511_v14 = vpop.f32.mrb[8].mxu1 }
 0x154   :  { %v6065_v15 = vadd.f32 %v4511_v14, %v6040_v62  ;;  %v514_v16 = vpop.f32.mrb[9].mxu1  ;;  %v634_v14 = vrot.slane %v625_v63, %v6093_v6 }
 0x155   :  { %v6068_v17 = vadd.f32 %v514_v16, %v6040_v62  ;;  %v4512_v18 = vpop.f32.mrb[10].mxu1  ;;  %v6099_v16 = vadd.f32 %v630_v10, %v147_v8 }
 0x156   :  { %v6071_v19 = vadd.f32 %v4512_v18, %v6040_v62  ;;  %v517_v20 = vpop.f32.mrb[11].mxu1 }
 0x157   :  { %v6074_v21 = vadd.f32 %v517_v20, %v6040_v62  ;;  %v6101_v20 = vadd.f32 %v634_v14, %v151_v12 }
 0x15b   :  { %v4515_v25 = vpop.f32.mrb[12].mxu1 }
 0x15c   :  { %v6077_v27 = vadd.f32 %v4515_v25, %v6040_v62  ;;  %v530_v29 = vpop.f32.mrb[13].mxu1 }
 0x15d   :  { %v6080_v32 = vadd.f32 %v530_v29, %v6040_v62  ;;  %v4516_v34 = vpop.f32.mrb[14].mxu1 }
 0x15e   :  { %v6083_v36 = vadd.f32 %v4516_v34, %v6040_v62  ;;  %v533_v42 = vpop.f32.mrb[15].mxu1 }
 0x15f   :  { %v6086_v49 = vadd.f32 %v533_v42, %v6040_v62 }
 0x163   :  { %v847_v52 = vpop.f32.mrb[16].mxu1 }
 0x164   :  { %v4535_v53 = vpop.f32.mrb[17].mxu1 }
 0x165   :  { %v850_v58 = vpop.f32.mrb[18].mxu1 }
 0x166   :  { %v4536_v3 = vpop.f32.mrb[19].mxu1 }
 0x17e   :  { %v804_v18 = vpop.f32.mrb[0].mxu0 }
 0x17f   :  { %v4890_v25 = vadd.f32 %v6099_v16, %v804_v18  ;;  %v806_v29 = vpop.f32.mrb[1].mxu0 }
 0x180   :  { %v808_v34 = vpop.f32.mrb[2].mxu0  ;;  %v4892_v3 = vadd.f32 %v6101_v20, %v806_v29 }
 0x181   :  { %v4116_v42 = vmul.f32 -1.442695, %v4890_v25  ;;  %v4894_v59 = vadd.f32 %v6099_v16, %v808_v34  ;;  %v810_v53 = vpop.f32.mrb[3].mxu0  ;;  %v6108_v25 = vrot.slane %v625_v63, %v6034_v60 }
 0x182   :  { %v4896_v61 = vadd.f32 %v6101_v20, %v810_v53  ;;  %v4118_v8 = vmul.f32 -1.442695, %v4892_v3  ;;  %v483_v3 = vadd.f32 %v6045_v2, %v6040_v62 }
 0x183   :  { %5278 = vpow2.f32 %v4116_v42  ;;  %v4117_v0 = vmul.f32 -1.442695, %v4894_v59  ;;  %v848_v59 = vadd.f32 %v847_v52, %v6108_v25 }
 0x184   :  { %v4119_v10 = vmul.f32 -1.442695, %v4896_v61 }
 0x185   :  { %5280 = vpow2.f32 %v4117_v0 }
 0x186   :  { %5282 = vpow2.f32 %v4118_v8  ;;  %v851_v8 = vadd.f32 %v850_v58, %v6108_v25 }
 0x187   :  { %5284 = vpow2.f32 %v4119_v10 }
 0x18d   :  { %v5279_v12 = vpop.eup %5278 }
 0x18e   :  { %v868_v14 = vadd.f32 1.0, %v5279_v12 }
 0x18f   :  { %v5281_v18 = vpop.eup %5280 }
 0x190   :  { %5286 = vrcp.f32 %v868_v14  ;;  %v869_v43 = vadd.f32 1.0, %v5281_v18  ;;  %v5283_v34 = vpop.eup %5282 }
 0x191   :  { %v5285_v29 = vpop.eup %5284  ;;  %v882_v42 = vadd.f32 1.0, %v5283_v34 }
 0x192   :  { %5288 = vrcp.f32 %v869_v43  ;;  %v883_v53 = vadd.f32 1.0, %v5285_v29  ;;  %v486_v43 = vadd.f32 %v6050_v5, %v6040_v62  ;;  %v7184_v5 = vmov 0  }
 0x193   :  { %5290 = vrcp.f32 %v882_v42 }
 0x194   :  { %5292 = vrcp.f32 %v883_v53 }
 0x19a   :  { %v5287_v0 = vpop.eup %5286 }
 0x19b   :  { %v888_v61 = vmul.f32 %v5287_v0, %v848_v59 }
 0x19c   :  { %v5289_v10 = vpop.eup %5288 }
 0x19d   :  { %v890_v63 = vadd.f32 %v888_v61, %v483_v3  ;;  %v889_v12 = vmul.f32 %v5289_v10, %v851_v8  ;;  %v5291_v52 = vpop.eup %5290 }
 0x19e   :  { %v5293_v18 = vpop.eup %5292  ;;  %v894_v34 = vsub.f32 1.0, %v5291_v52  ;;  %v898_v42 = vmul.f32 0.0, %v5291_v52 }
 0x19f   :  { %5294 = vtanh.f32 %v890_v63  ;;  %v891_v14 = vadd.f32 %v889_v12, %v486_v43  ;;  %v895_v60 = vsub.f32 1.0, %v5293_v18  ;;  %v899_v58 = vmul.f32 0.0, %v5293_v18 }
 0x1a1   :  { %5296 = vtanh.f32 %v891_v14 }
 0x1a9   :  { %v5295_v29 = vpop.eup %5294 }
 0x1aa   :  { %v896_v2 = vmul.f32 %v5295_v29, %v894_v34 }
 0x1ab   :  { %v5297_v59 = vpop.eup %5296 }
 0x1ac   :  { %v897_v0 = vmul.f32 %v5297_v59, %v895_v60  ;;  %v6116_v6 = vadd.f32 %v898_v42, %v896_v2  ;;  %v7183_v60 = vmov 0.0  }
 0x1ae   :  { %v6118_v56 = vadd.f32 %v899_v58, %v897_v0 }
 0x1b0   :  { %v6122_v62 = vpack.c.bf16 %v6118_v56, %v6116_v6 }
 0x1b2   :  { %938 = vmatmul.mubr.bf16.vlgmr.msra.gmra.mrb[4].mxu0 %v6122_v62  ;;  %4554 = vmatmul.mubr.bf16.vlgmr.msra.gmra.mrb[20].mxu1 %v6122_v62 }
 0x1b3   :  { %1043 = vmatpush1.bf16.msra.mxu0 %v5886_v23  ;;  %4558 = vmatpush3.bf16.msra.mxu1 %v5923_v39 }
 0x1b4   :  { %1044 = vmatprep.subr.bf16.mxu0 %v5888_v24  ;;  %4559 = vmatprep.subr.bf16.mxu1 %v7183_v60 }
 0x1b5   :  { %1074 = vmatprep.mubr.bf16.mxu0 %v7184_v5  ;;  %4573 = vmatprep.mubr.msk.bf16.mxu1 %vm5764_vm0, %v7183_v60 }
 0x1b7   :  { %1045 = vmatpush1.bf16.msra.mxu0 %v5891_v26  ;;  %4560 = vmatpush3.bf16.msra.mxu1 %v5936_v44 }
 0x1b8   :  { %1046 = vmatprep.subr.bf16.mxu0 %v5896_v28  ;;  %4561 = vmatprep.subr.bf16.mxu1 %v7183_v60 }
 0x1bb   :  { %1047 = vmatpush1.bf16.msra.mxu0 %v5901_v30  ;;  %4562 = vmatpush3.bf16.msra.mxu1 %v5946_v47 }
 0x1bc   :  { %1048 = vmatprep.subr.bf16.mxu0 %v5904_v31  ;;  %4563 = vmatprep.subr.bf16.mxu1 %v7183_v60 }
 0x1bf   :  { %1049 = vmatpush1.bf16.msra.mxu0 %v5907_v33  ;;  %4564 = vmatpush3.bf16.msra.mxu1 %v5958_v50 }
 0x1c0   :  { %1050 = vmatprep.subr.bf16.mxu0 %v5912_v35  ;;  %4565 = vmatprep.subr.bf16.mxu1 %v7183_v60 }
 0x1c3   :  { %1051 = vmatpush1.bf16.msra.mxu0 %v5917_v37  ;;  %4566 = vmatpush3.bf16.msra.mxu1 %v5963_v51 }
 0x1c4   :  { %1052 = vmatprep.subr.bf16.mxu0 %v5919_v38  ;;  %4567 = vmatprep.subr.bf16.mxu1 %v7183_v60 }
 0x1c7   :  { %1053 = vmatpush1.bf16.msra.mxu0 %v5925_v40  ;;  %4568 = vmatpush3.bf16.msra.mxu1 %v5975_v54 }
 0x1c8   :  { %1054 = vmatprep.subr.bf16.mxu0 %v5927_v41  ;;  %4569 = vmatprep.subr.bf16.mxu1 %v7183_v60 }
 0x1cb   :  { %1055 = vmatpush1.bf16.msra.mxu0 %v5938_v45  ;;  %4570 = vmatpush3.bf16.msra.mxu1 %v5979_v55 }
 0x1cc   :  { %1056 = vmatprep.subr.bf16.mxu0 %v5940_v46  ;;  %4571 = vmatprep.subr.bf16.mxu1 %v7183_v60 }
 0x1cf   :  { %1057 = vmatpush1.bf16.msra.mxu0 %v5948_v48  ;;  %4572 = vmatpush3.bf16.msra.mxu1 %v5987_v57 }
 0x1d0   :  { %1179 = vmatprep.subr.bf16.mxu0 %v5884_v22  ;;  %4577 = vmatprep.subr.bf16.mxu1 %v7183_v60 }
 0x285   :  { %v939_v53 = vpop.f32.mrb[4].mxu0  ;;  %v982_v3 = vpop.f32.mrb[20].mxu1 }
 0x286   :  { %v4898_v61 = vadd.f32 %v6099_v16, %v939_v53  ;;  %v941_v8 = vpop.f32.mrb[5].mxu0  ;;  %v4555_v10 = vpop.f32.mrb[21].mxu1 }
 0x287   :  { %v943_v43 = vpop.f32.mrb[6].mxu0  ;;  %v985_v63 = vpop.f32.mrb[22].mxu1  ;;  %v4900_v34 = vadd.f32 %v6101_v20, %v941_v8  ;;  %v983_v8 = vadd.f32 %v982_v3, %v6108_v25 }
 0x288   :  { %v4120_v12 = vmul.f32 -1.442695, %v4898_v61  ;;  %v4902_v14 = vadd.f32 %v6099_v16, %v943_v43  ;;  %v945_v52 = vpop.f32.mrb[7].mxu0  ;;  %v4556_v18 = vpop.f32.mrb[23].mxu1 }
 0x289   :  { %v4904_v22 = vadd.f32 %v6101_v20, %v945_v52  ;;  %v4122_v2 = vmul.f32 -1.442695, %v4900_v34  ;;  %v986_v52 = vadd.f32 %v985_v63, %v6108_v25 }
 0x28a   :  { %5298 = vpow2.f32 %v4120_v12  ;;  %v4121_v29 = vmul.f32 -1.442695, %v4902_v14 }
 0x28b   :  { %v4123_v42 = vmul.f32 -1.442695, %v4904_v22 }
 0x28c   :  { %5300 = vpow2.f32 %v4121_v29 }
 0x28d   :  { %5302 = vpow2.f32 %v4122_v2 }
 0x28e   :  { %5304 = vpow2.f32 %v4123_v42 }
 0x294   :  { %v5299_v59 = vpop.eup %5298 }
 0x295   :  { %v1004_v0 = vadd.f32 1.0, %v5299_v59 }
 0x296   :  { %v5301_v58 = vpop.eup %5300 }
 0x297   :  { %5306 = vrcp.f32 %v1004_v0  ;;  %v1005_v53 = vadd.f32 1.0, %v5301_v58  ;;  %v5303_v61 = vpop.eup %5302 }
 0x298   :  { %v5305_v10 = vpop.eup %5304  ;;  %v1018_v43 = vadd.f32 1.0, %v5303_v61 }
 0x299   :  { %5308 = vrcp.f32 %v1005_v53  ;;  %v1019_v12 = vadd.f32 1.0, %v5305_v10 }
 0x29a   :  { %5310 = vrcp.f32 %v1018_v43 }
 0x29b   :  { %5312 = vrcp.f32 %v1019_v12 }
 0x2a1   :  { %v5307_v14 = vpop.eup %5306 }
 0x2a2   :  { %v1024_v18 = vmul.f32 %v5307_v14, %v983_v8 }
 0x2a3   :  { %v5309_v34 = vpop.eup %5308 }
 0x2a4   :  { %v1026_v29 = vadd.f32 %v1024_v18, %v6043_v1  ;;  %v1025_v22 = vmul.f32 %v5309_v34, %v986_v52  ;;  %v5311_v42 = vpop.eup %5310 }
 0x2a5   :  { %v5313_v59 = vpop.eup %5312  ;;  %v1030_v0 = vsub.f32 1.0, %v5311_v42  ;;  %v1034_v61 = vmul.f32 %v5311_v42, %v6116_v6 }
 0x2a6   :  { %5314 = vtanh.f32 %v1026_v29  ;;  %v1027_v2 = vadd.f32 %v1025_v22, %v6048_v4  ;;  %v1031_v3 = vsub.f32 1.0, %v5313_v59  ;;  %v1035_v63 = vmul.f32 %v5313_v59, %v6118_v56 }
 0x2a8   :  { %5316 = vtanh.f32 %v1027_v2 }
 0x2b0   :  { %v5315_v58 = vpop.eup %5314 }
 0x2b1   :  { %v1032_v53 = vmul.f32 %v5315_v58, %v1030_v0 }
 0x2b2   :  { %v5317_v10 = vpop.eup %5316 }
 0x2b3   :  { %v1033_v43 = vmul.f32 %v5317_v10, %v1031_v3  ;;  %v6171_v8 = vadd.f32 %v1034_v61, %v1032_v53 }
 0x2b5   :  { %v6173_v1 = vadd.f32 %v1035_v63, %v1033_v43 }
 0x2b7   :  { %v6177_v4 = vpack.c.bf16 %v6173_v1, %v6171_v8 }
 0x2b9   :  { %1075 = vmatmul.mubr.bf16.vlgmr.msra.gmra.mrb[8].mxu0 %v6177_v4  ;;  %4574 = vmatmul.mubr.bf16.vlgmr.msra.gmra.mrb[24].mxu1 %v6177_v4 }
 0x2ba   :  { %1180 = vmatpush1.bf16.msra.mxu0 %v5886_v23  ;;  %4578 = vmatpush3.bf16.msra.mxu1 %v5923_v39  ;;  %v6214_v23 = vld [vmem:[#allocation6 + $0x4] ss:$12 sps:$4 sm:$0xff]  }
 0x2bb   :  { %1181 = vmatprep.subr.bf16.mxu0 %v5888_v24  ;;  %4579 = vmatprep.subr.bf16.mxu1 %v7183_v60 }
 0x2bc   :  { %1211 = vmatprep.mubr.bf16.mxu0 %v7184_v5  ;;  %4593 = vmatprep.mubr.msk.bf16.mxu1 %vm5764_vm0, %v7183_v60 }
 0x2be   :  { %1182 = vmatpush1.bf16.msra.mxu0 %v5891_v26  ;;  %4580 = vmatpush3.bf16.msra.mxu1 %v5936_v44 }
 0x2bf   :  { %1183 = vmatprep.subr.bf16.mxu0 %v5896_v28  ;;  %4581 = vmatprep.subr.bf16.mxu1 %v7183_v60 }
 0x2c2   :  { %1184 = vmatpush1.bf16.msra.mxu0 %v5901_v30  ;;  %4582 = vmatpush3.bf16.msra.mxu1 %v5946_v47 }
 0x2c3   :  { %1185 = vmatprep.subr.bf16.mxu0 %v5904_v31  ;;  %4583 = vmatprep.subr.bf16.mxu1 %v7183_v60 }
 0x2c6   :  { %1186 = vmatpush1.bf16.msra.mxu0 %v5907_v33  ;;  %4584 = vmatpush3.bf16.msra.mxu1 %v5958_v50 }
 0x2c7   :  { %1187 = vmatprep.subr.bf16.mxu0 %v5912_v35  ;;  %4585 = vmatprep.subr.bf16.mxu1 %v7183_v60 }
 0x2ca   :  { %1188 = vmatpush1.bf16.msra.mxu0 %v5917_v37  ;;  %4586 = vmatpush3.bf16.msra.mxu1 %v5963_v51 }
 0x2cb   :  { %1189 = vmatprep.subr.bf16.mxu0 %v5919_v38  ;;  %4587 = vmatprep.subr.bf16.mxu1 %v7183_v60 }
 0x2ce   :  { %1190 = vmatpush1.bf16.msra.mxu0 %v5925_v40  ;;  %4588 = vmatpush3.bf16.msra.mxu1 %v5975_v54 }
 0x2cf   :  { %1191 = vmatprep.subr.bf16.mxu0 %v5927_v41  ;;  %4589 = vmatprep.subr.bf16.mxu1 %v7183_v60 }
 0x2d2   :  { %1192 = vmatpush1.bf16.msra.mxu0 %v5938_v45  ;;  %4590 = vmatpush3.bf16.msra.mxu1 %v5979_v55 }
 0x2d3   :  { %1193 = vmatprep.subr.bf16.mxu0 %v5940_v46  ;;  %4591 = vmatprep.subr.bf16.mxu1 %v7183_v60 }
 0x2d6   :  { %1194 = vmatpush1.bf16.msra.mxu0 %v5948_v48  ;;  %4592 = vmatpush3.bf16.msra.mxu1 %v5987_v57 }
 0x2d7   :  { %1316 = vmatprep.subr.bf16.mxu0 %v6214_v23  ;;  %4597 = vmatprep.subr.bf16.mxu1 %v7183_v60 }
 0x38c   :  { %v1076_v24 = vpop.f32.mrb[8].mxu0  ;;  %v1119_v26 = vpop.f32.mrb[24].mxu1 }
 0x38d   :  { %v4906_v28 = vadd.f32 %v6099_v16, %v1076_v24  ;;  %v1078_v30 = vpop.f32.mrb[9].mxu0  ;;  %v4575_v31 = vpop.f32.mrb[25].mxu1  ;;  %v1120_v0 = vadd.f32 %v1119_v26, %v6108_v25 }
 0x38e   :  { %v1080_v33 = vpop.f32.mrb[10].mxu0  ;;  %v1122_v35 = vpop.f32.mrb[26].mxu1  ;;  %v4908_v56 = vadd.f32 %v6101_v20, %v1078_v30 }
 0x38f   :  { %v4124_v37 = vmul.f32 -1.442695, %v4906_v28  ;;  %v4910_v38 = vadd.f32 %v6099_v16, %v1080_v33  ;;  %v1082_v40 = vpop.f32.mrb[11].mxu0  ;;  %v4576_v41 = vpop.f32.mrb[27].mxu1  ;;  %v1123_v61 = vadd.f32 %v1122_v35, %v6108_v25 }
 0x390   :  { %v4912_v12 = vadd.f32 %v6101_v20, %v1082_v40  ;;  %v4126_v14 = vmul.f32 -1.442695, %v4908_v56 }
 0x391   :  { %5318 = vpow2.f32 %v4124_v37  ;;  %v4125_v6 = vmul.f32 -1.442695, %v4910_v38 }
 0x392   :  { %v4127_v18 = vmul.f32 -1.442695, %v4912_v12  ;;  %v6253_v12 = vld [vmem:[#allocation6 + $0x34] ss:$12 sps:$4 sm:$0xff]  }
 0x393   :  { %5320 = vpow2.f32 %v4125_v6  ;;  %v6238_v6 = vld [vmem:[#allocation6] ss:$12 sps:$4 sm:$0xff]  }
 0x394   :  { %5322 = vpow2.f32 %v4126_v14  ;;  %v6261_v14 = vld [vmem:[#allocation6 + $0x4c] ss:$12 sps:$4 sm:$0xff]  }
 0x395   :  { %5324 = vpow2.f32 %v4127_v18  ;;  %v6265_v18 = vld [vmem:[#allocation6 + $0x48] ss:$12 sps:$4 sm:$0xff]  }
 0x39b   :  { %v5319_v52 = vpop.eup %5318 }
 0x39c   :  { %v1141_v34 = vadd.f32 1.0, %v5319_v52  ;;  %v6273_v52 = vld [vmem:[#allocation6 + $0x60] ss:$12 sps:$4 sm:$0xff]  }
 0x39d   :  { %v5321_v29 = vpop.eup %5320 }
 0x39e   :  { %5326 = vrcp.f32 %v1141_v34  ;;  %v1142_v22 = vadd.f32 1.0, %v5321_v29  ;;  %v5323_v2 = vpop.eup %5322  ;;  %v6281_v34 = vld [vmem:[#allocation6 + $0x78] ss:$12 sps:$4 sm:$0xff]  }
 0x39f   :  { %v5325_v42 = vpop.eup %5324  ;;  %v1155_v59 = vadd.f32 1.0, %v5323_v2 }
 0x3a0   :  { %5328 = vrcp.f32 %v1142_v22  ;;  %v1156_v58 = vadd.f32 1.0, %v5325_v42 }
 0x3a1   :  { %5330 = vrcp.f32 %v1155_v59 }
 0x3a2   :  { %5332 = vrcp.f32 %v1156_v58 }
 0x3a8   :  { %v5327_v3 = vpop.eup %5326 }
 0x3a9   :  { %v1161_v53 = vmul.f32 %v5327_v3, %v1120_v0 }
 0x3aa   :  { %v5329_v10 = vpop.eup %5328 }
 0x3ab   :  { %v1163_v43 = vadd.f32 %v1161_v53, %v6056_v9  ;;  %v1162_v63 = vmul.f32 %v5329_v10, %v1123_v61  ;;  %v5331_v28 = vpop.eup %5330 }
 0x3ac   :  { %v5333_v30 = vpop.eup %5332  ;;  %v1167_v31 = vsub.f32 1.0, %v5331_v28  ;;  %v1171_v38 = vmul.f32 %v5331_v28, %v6171_v8  ;;  %v6242_v8 = vld [vmem:[#allocation6 + $0x1c] ss:$12 sps:$4 sm:$0xff]  }
 0x3ad   :  { %5334 = vtanh.f32 %v1163_v43  ;;  %v1164_v24 = vadd.f32 %v1162_v63, %v6062_v13  ;;  %v1168_v26 = vsub.f32 1.0, %v5333_v30  ;;  %v1172_v35 = vmul.f32 %v5333_v30, %v6173_v1  ;;  %v6249_v1 = vld [vmem:[#allocation6 + $0x18] ss:$12 sps:$4 sm:$0xff]  }
 0x3af   :  { %5336 = vtanh.f32 %v1164_v24 }
 0x3b7   :  { %v5335_v33 = vpop.eup %5334 }
 0x3b8   :  { %v1169_v37 = vmul.f32 %v5335_v33, %v1167_v31 }
 0x3b9   :  { %v5337_v40 = vpop.eup %5336 }
 0x3ba   :  { %v1170_v41 = vmul.f32 %v5337_v40, %v1168_v26  ;;  %v6228_v56 = vadd.f32 %v1171_v38, %v1169_v37 }
 0x3bc   :  { %v6230_v9 = vadd.f32 %v1172_v35, %v1170_v41 }
 0x3be   :  { %v6234_v13 = vpack.c.bf16 %v6230_v9, %v6228_v56 }
 0x3c0   :  { %1212 = vmatmul.mubr.bf16.vlgmr.msra.gmra.mrb[12].mxu0 %v6234_v13  ;;  %4594 = vmatmul.mubr.bf16.vlgmr.msra.gmra.mrb[28].mxu1 %v6234_v13 }
 0x3c1   :  { %1317 = vmatpush1.bf16.msra.mxu0 %v6238_v6  ;;  %4598 = vmatpush3.bf16.msra.mxu1 %v5923_v39  ;;  %v6257_v39 = vld [vmem:[#allocation6 + $0x30] ss:$12 sps:$4 sm:$0xff]  }
 0x3c2   :  { %1318 = vmatprep.subr.bf16.mxu0 %v6242_v8  ;;  %4599 = vmatprep.subr.bf16.mxu1 %v7183_v60 }
 0x3c3   :  { %1348 = vmatprep.mubr.bf16.mxu0 %v7184_v5  ;;  %4613 = vmatprep.mubr.msk.bf16.mxu1 %vm5764_vm0, %v7183_v60 }
 0x3c5   :  { %1319 = vmatpush1.bf16.msra.mxu0 %v6249_v1  ;;  %4600 = vmatpush3.bf16.msra.mxu1 %v5936_v44  ;;  %v6269_v44 = vld [vmem:[#allocation6 + $0x64] ss:$12 sps:$4 sm:$0xff]  }
 0x3c6   :  { %1320 = vmatprep.subr.bf16.mxu0 %v6253_v12  ;;  %4601 = vmatprep.subr.bf16.mxu1 %v7183_v60 }
 0x3c9   :  { %1321 = vmatpush1.bf16.msra.mxu0 %v6257_v39  ;;  %4602 = vmatpush3.bf16.msra.mxu1 %v5946_v47  ;;  %v6277_v47 = vld [vmem:[#allocation6 + $0x7c] ss:$12 sps:$4 sm:$0xff]  }
 0x3ca   :  { %1322 = vmatprep.subr.bf16.mxu0 %v6261_v14  ;;  %4603 = vmatprep.subr.bf16.mxu1 %v7183_v60 }
 0x3cd   :  { %1323 = vmatpush1.bf16.msra.mxu0 %v6265_v18  ;;  %4604 = vmatpush3.bf16.msra.mxu1 %v5958_v50  ;;  %v6285_v50 = vld [vmem:[#allocation6 + $0x94] ss:$12 sps:$4 sm:$0xff]  }
 0x3ce   :  { %1324 = vmatprep.subr.bf16.mxu0 %v6269_v44  ;;  %4605 = vmatprep.subr.bf16.mxu1 %v7183_v60 }
 0x3d1   :  { %1325 = vmatpush1.bf16.msra.mxu0 %v6273_v52  ;;  %4606 = vmatpush3.bf16.msra.mxu1 %v5963_v51 }
 0x3d2   :  { %1326 = vmatprep.subr.bf16.mxu0 %v6277_v47  ;;  %4607 = vmatprep.subr.bf16.mxu1 %v7183_v60 }
 0x3d5   :  { %1327 = vmatpush1.bf16.msra.mxu0 %v6281_v34  ;;  %4608 = vmatpush3.bf16.msra.mxu1 %v5975_v54 }
 0x3d6   :  { %1328 = vmatprep.subr.bf16.mxu0 %v6285_v50  ;;  %4609 = vmatprep.subr.bf16.mxu1 %v7183_v60 }
 0x3d9   :  { %1329 = vmatpush1.bf16.msra.mxu0 %v5938_v45  ;;  %4610 = vmatpush3.bf16.msra.mxu1 %v5979_v55 }
 0x3da   :  { %1330 = vmatprep.subr.bf16.mxu0 %v5940_v46  ;;  %4611 = vmatprep.subr.bf16.mxu1 %v7183_v60 }
 0x3dd   :  { %1331 = vmatpush1.bf16.msra.mxu0 %v5948_v48  ;;  %4612 = vmatpush3.bf16.msra.mxu1 %v5987_v57 }
 0x3de   :  { %1453 = vmatprep.subr.bf16.mxu0 %v6214_v23  ;;  %4617 = vmatprep.subr.bf16.mxu1 %v7183_v60 }
 0x493   :  { %v1213_v51 = vpop.f32.mrb[12].mxu0  ;;  %v1256_v54 = vpop.f32.mrb[28].mxu1 }
 0x494   :  { %v4914_v29 = vadd.f32 %v6099_v16, %v1213_v51  ;;  %v1215_v22 = vpop.f32.mrb[13].mxu0  ;;  %v4595_v45 = vpop.f32.mrb[29].mxu1  ;;  %v1257_v26 = vadd.f32 %v1256_v54, %v6108_v25 }
 0x495   :  { %v1217_v2 = vpop.f32.mrb[14].mxu0  ;;  %v1259_v42 = vpop.f32.mrb[30].mxu1  ;;  %v4916_v48 = vadd.f32 %v6101_v20, %v1215_v22 }
 0x496   :  { %v4128_v59 = vmul.f32 -1.442695, %v4914_v29  ;;  %v4918_v46 = vadd.f32 %v6099_v16, %v1217_v2  ;;  %v1219_v0 = vpop.f32.mrb[15].mxu0  ;;  %v4596_v58 = vpop.f32.mrb[31].mxu1  ;;  %v1260_v41 = vadd.f32 %v1259_v42, %v6108_v25 }
 0x497   :  { %v4920_v53 = vadd.f32 %v6101_v20, %v1219_v0  ;;  %v4130_v61 = vmul.f32 -1.442695, %v4916_v48 }
 0x498   :  { %5338 = vpow2.f32 %v4128_v59  ;;  %v4129_v3 = vmul.f32 -1.442695, %v4918_v46 }
 0x499   :  { %v4131_v10 = vmul.f32 -1.442695, %v4920_v53 }
 0x49a   :  { %5340 = vpow2.f32 %v4129_v3 }
 0x49b   :  { %5342 = vpow2.f32 %v4130_v61  ;;  %v6318_v61 = vld [vmem:[#allocation6 + $0x8] ss:$12 sps:$4 sm:$0xff]  }
 0x49c   :  { %5344 = vpow2.f32 %v4131_v10  ;;  %v6339_v10 = vld [vmem:[#allocation6 + $0x50] ss:$12 sps:$4 sm:$0xff]  }
 0x4a2   :  { %v5339_v43 = vpop.eup %5338 }
 0x4a3   :  { %v1278_v63 = vadd.f32 1.0, %v5339_v43  ;;  %v6345_v43 = vld [vmem:[#allocation6 + $0x68] ss:$12 sps:$4 sm:$0xff]  }
 0x4a4   :  { %v5341_v24 = vpop.eup %5340 }
 0x4a5   :  { %5346 = vrcp.f32 %v1278_v63  ;;  %v1279_v28 = vadd.f32 1.0, %v5341_v24  ;;  %v5343_v30 = vpop.eup %5342  ;;  %v6351_v63 = vld [vmem:[#allocation6 + $0x80] ss:$12 sps:$4 sm:$0xff]   ;;  %v6356_v24 = vld [vmem:[#allocation6 + $0x90] ss:$12 sps:$4 sm:$0xff]  }
 0x4a6   :  { %v5345_v31 = vpop.eup %5344  ;;  %v1292_v33 = vadd.f32 1.0, %v5343_v30  ;;  %v6364_v30 = vld [vmem:[#allocation6 + $0xa8] ss:$12 sps:$4 sm:$0xff]  }
 0x4a7   :  { %5348 = vrcp.f32 %v1279_v28  ;;  %v1293_v37 = vadd.f32 1.0, %v5345_v31  ;;  %v6360_v28 = vld [vmem:[#allocation6 + $0xac] ss:$12 sps:$4 sm:$0xff]  }
 0x4a8   :  { %5350 = vrcp.f32 %v1292_v33 }
 0x4a9   :  { %5352 = vrcp.f32 %v1293_v37 }
 0x4af   :  { %v5347_v38 = vpop.eup %5346 }
 0x4b0   :  { %v1298_v40 = vmul.f32 %v5347_v38, %v1257_v26 }
 0x4b1   :  { %v5349_v35 = vpop.eup %5348 }
 0x4b2   :  { %v1300_v51 = vadd.f32 %v1298_v40, %v6053_v7  ;;  %v1299_v29 = vmul.f32 %v5349_v35, %v1260_v41  ;;  %v5351_v45 = vpop.eup %5350 }
 0x4b3   :  { %v5353_v2 = vpop.eup %5352  ;;  %v1304_v59 = vsub.f32 1.0, %v5351_v45  ;;  %v1308_v58 = vmul.f32 %v5351_v45, %v6228_v56  ;;  %v6327_v56 = vld [vmem:[#allocation6 + $0x20] ss:$12 sps:$4 sm:$0xff]  }
 0x4b4   :  { %5354 = vtanh.f32 %v1300_v51  ;;  %v1301_v22 = vadd.f32 %v1299_v29, %v6059_v11  ;;  %v1305_v54 = vsub.f32 1.0, %v5353_v2  ;;  %v1309_v42 = vmul.f32 %v5353_v2, %v6230_v9  ;;  %v6333_v9 = vld [vmem:[#allocation6 + $0x38] ss:$12 sps:$4 sm:$0xff]  }
 0x4b6   :  { %5356 = vtanh.f32 %v1301_v22 }
 0x4be   :  { %v5355_v46 = vpop.eup %5354 }
 0x4bf   :  { %v1306_v0 = vmul.f32 %v5355_v46, %v1304_v59 }
 0x4c0   :  { %v5357_v48 = vpop.eup %5356 }
 0x4c1   :  { %v1307_v3 = vmul.f32 %v5357_v48, %v1305_v54  ;;  %v6307_v53 = vadd.f32 %v1308_v58, %v1306_v0 }
 0x4c3   :  { %v6309_v7 = vadd.f32 %v1309_v42, %v1307_v3 }
 0x4c5   :  { %v6313_v11 = vpack.c.bf16 %v6309_v7, %v6307_v53 }
 0x4c7   :  { %1349 = vmatmul.mubr.bf16.vlgmr.msra.gmra.mrb[16].mxu0 %v6313_v11  ;;  %4614 = vmatmul.mubr.bf16.vlgmr.msra.gmra.mrb[32].mxu1 %v6313_v11 }
 0x4c8   :  { %1454 = vmatpush1.bf16.msra.mxu0 %v6238_v6  ;;  %4618 = vmatpush3.bf16.msra.mxu1 %v6318_v61 }
 0x4c9   :  { %1455 = vmatprep.subr.bf16.mxu0 %v6242_v8  ;;  %4619 = vmatprep.subr.bf16.mxu1 %v7183_v60 }
 0x4ca   :  { %1485 = vmatprep.mubr.bf16.mxu0 %v7184_v5  ;;  %4633 = vmatprep.mubr.msk.bf16.mxu1 %vm5764_vm0, %v7183_v60 }
 0x4cc   :  { %1456 = vmatpush1.bf16.msra.mxu0 %v6249_v1  ;;  %4620 = vmatpush3.bf16.msra.mxu1 %v6327_v56 }
 0x4cd   :  { %1457 = vmatprep.subr.bf16.mxu0 %v6253_v12  ;;  %4621 = vmatprep.subr.bf16.mxu1 %v7183_v60 }
 0x4d0   :  { %1458 = vmatpush1.bf16.msra.mxu0 %v6257_v39  ;;  %4622 = vmatpush3.bf16.msra.mxu1 %v6333_v9 }
 0x4d1   :  { %1459 = vmatprep.subr.bf16.mxu0 %v6261_v14  ;;  %4623 = vmatprep.subr.bf16.mxu1 %v7183_v60 }
 0x4d4   :  { %1460 = vmatpush1.bf16.msra.mxu0 %v6265_v18  ;;  %4624 = vmatpush3.bf16.msra.mxu1 %v6339_v10 }
 0x4d5   :  { %1461 = vmatprep.subr.bf16.mxu0 %v6269_v44  ;;  %4625 = vmatprep.subr.bf16.mxu1 %v7183_v60 }
 0x4d8   :  { %1462 = vmatpush1.bf16.msra.mxu0 %v6273_v52  ;;  %4626 = vmatpush3.bf16.msra.mxu1 %v6345_v43 }
 0x4d9   :  { %1463 = vmatprep.subr.bf16.mxu0 %v6277_v47  ;;  %4627 = vmatprep.subr.bf16.mxu1 %v7183_v60 }
 0x4dc   :  { %1464 = vmatpush1.bf16.msra.mxu0 %v6281_v34  ;;  %4628 = vmatpush3.bf16.msra.mxu1 %v6351_v63 }
 0x4dd   :  { %1465 = vmatprep.subr.bf16.mxu0 %v6285_v50  ;;  %4629 = vmatprep.subr.bf16.mxu1 %v7183_v60 }
 0x4e0   :  { %1466 = vmatpush1.bf16.msra.mxu0 %v6356_v24  ;;  %4630 = vmatpush3.bf16.msra.mxu1 %v5979_v55 }
 0x4e1   :  { %1467 = vmatprep.subr.bf16.mxu0 %v6360_v28  ;;  %4631 = vmatprep.subr.bf16.mxu1 %v7183_v60 }
 0x4e4   :  { %1468 = vmatpush1.bf16.msra.mxu0 %v6364_v30  ;;  %4632 = vmatpush3.bf16.msra.mxu1 %v5987_v57 }
 0x4e5   :  { %1590 = vmatprep.subr.bf16.mxu0 %v6214_v23  ;;  %4637 = vmatprep.subr.bf16.mxu1 %v7183_v60 }
 0x59a   :  { %v1350_v31 = vpop.f32.mrb[16].mxu0  ;;  %v1393_v33 = vpop.f32.mrb[32].mxu1 }
 0x59b   :  { %v4922_v55 = vadd.f32 %v6099_v16, %v1350_v31  ;;  %v1352_v26 = vpop.f32.mrb[17].mxu0  ;;  %v4615_v37 = vpop.f32.mrb[33].mxu1  ;;  %v1394_v31 = vadd.f32 %v1393_v33, %v6108_v25 }
 0x59c   :  { %v1354_v38 = vpop.f32.mrb[18].mxu0  ;;  %v1396_v40 = vpop.f32.mrb[34].mxu1  ;;  %v4924_v22 = vadd.f32 %v6101_v20, %v1352_v26 }
 0x59d   :  { %v4132_v41 = vmul.f32 -1.442695, %v4922_v55  ;;  %v4926_v35 = vadd.f32 %v6099_v16, %v1354_v38  ;;  %v1356_v51 = vpop.f32.mrb[19].mxu0  ;;  %v4616_v29 = vpop.f32.mrb[35].mxu1  ;;  %v1397_v38 = vadd.f32 %v1396_v40, %v6108_v25 }
 0x59e   :  { %v4928_v45 = vadd.f32 %v6101_v20, %v1356_v51  ;;  %v4134_v2 = vmul.f32 -1.442695, %v4924_v22 }
 0x59f   :  { %5358 = vpow2.f32 %v4132_v41  ;;  %v4133_v57 = vmul.f32 -1.442695, %v4926_v35 }
 0x5a0   :  { %v4135_v59 = vmul.f32 -1.442695, %v4928_v45 }
 0x5a1   :  { %5360 = vpow2.f32 %v4133_v57 }
 0x5a2   :  { %5362 = vpow2.f32 %v4134_v2 }
 0x5a3   :  { %5364 = vpow2.f32 %v4135_v59 }
 0x5a9   :  { %v5359_v46 = vpop.eup %5358 }
 0x5aa   :  { %v1415_v54 = vadd.f32 1.0, %v5359_v46 }
 0x5ab   :  { %v5361_v0 = vpop.eup %5360 }
 0x5ac   :  { %5366 = vrcp.f32 %v1415_v54  ;;  %v1416_v58 = vadd.f32 1.0, %v5361_v0  ;;  %v5363_v48 = vpop.eup %5362 }
 0x5ad   :  { %v5365_v3 = vpop.eup %5364  ;;  %v1429_v42 = vadd.f32 1.0, %v5363_v48 }
 0x5ae   :  { %5368 = vrcp.f32 %v1416_v58  ;;  %v1430_v55 = vadd.f32 1.0, %v5365_v3 }
 0x5af   :  { %5370 = vrcp.f32 %v1429_v42 }
 0x5b0   :  { %5372 = vrcp.f32 %v1430_v55 }
 0x5b6   :  { %v5367_v26 = vpop.eup %5366 }
 0x5b7   :  { %v1435_v37 = vmul.f32 %v5367_v26, %v1394_v31 }
 0x5b8   :  { %v5369_v41 = vpop.eup %5368 }
 0x5b9   :  { %v1437_v35 = vadd.f32 %v1435_v37, %v6068_v17  ;;  %v1436_v51 = vmul.f32 %v5369_v41, %v1397_v38  ;;  %v5371_v22 = vpop.eup %5370 }
 0x5ba   :  { %v5373_v57 = vpop.eup %5372  ;;  %v1441_v45 = vsub.f32 1.0, %v5371_v22  ;;  %v1445_v46 = vmul.f32 %v5371_v22, %v6307_v53  ;;  %v6418_v53 = vld [vmem:[#allocation6 + $0x98] ss:$12 sps:$4 sm:$0xff]  }
 0x5bb   :  { %5374 = vtanh.f32 %v1437_v35  ;;  %v1438_v29 = vadd.f32 %v1436_v51, %v6074_v21  ;;  %v1442_v33 = vsub.f32 1.0, %v5373_v57  ;;  %v1446_v40 = vmul.f32 %v5373_v57, %v6309_v7  ;;  %v6424_v7 = vld [vmem:[#allocation6 + $0xb0] ss:$12 sps:$4 sm:$0xff]  }
 0x5bd   :  { %5376 = vtanh.f32 %v1438_v29 }
 0x5c5   :  { %v5375_v2 = vpop.eup %5374 }
 0x5c6   :  { %v1443_v59 = vmul.f32 %v5375_v2, %v1441_v45 }
 0x5c7   :  { %v5377_v54 = vpop.eup %5376 }
 0x5c8   :  { %v1444_v0 = vmul.f32 %v5377_v54, %v1442_v33  ;;  %v6380_v58 = vadd.f32 %v1445_v46, %v1443_v59 }
 0x5ca   :  { %v6382_v17 = vadd.f32 %v1446_v40, %v1444_v0 }
 0x5cc   :  { %v6386_v21 = vpack.c.bf16 %v6382_v17, %v6380_v58 }
 0x5ce   :  { %1486 = vmatmul.mubr.bf16.vlgmr.msra.gmra.mrb[20].mxu0 %v6386_v21  ;;  %4634 = vmatmul.mubr.bf16.vlgmr.msra.gmra.mrb[36].mxu1 %v6386_v21 }
 0x5cf   :  { %1591 = vmatpush1.bf16.msra.mxu0 %v6238_v6  ;;  %4638 = vmatpush3.bf16.msra.mxu1 %v6318_v61 }
 0x5d0   :  { %1592 = vmatprep.subr.bf16.mxu0 %v6242_v8  ;;  %4639 = vmatprep.subr.bf16.mxu1 %v7183_v60 }
 0x5d1   :  { %1622 = vmatprep.mubr.bf16.mxu0 %v7184_v5  ;;  %4653 = vmatprep.mubr.msk.bf16.mxu1 %vm5764_vm0, %v7183_v60 }
 0x5d3   :  { %1593 = vmatpush1.bf16.msra.mxu0 %v6249_v1  ;;  %4640 = vmatpush3.bf16.msra.mxu1 %v6327_v56 }
 0x5d4   :  { %1594 = vmatprep.subr.bf16.mxu0 %v6253_v12  ;;  %4641 = vmatprep.subr.bf16.mxu1 %v7183_v60 }
 0x5d7   :  { %1595 = vmatpush1.bf16.msra.mxu0 %v6257_v39  ;;  %4642 = vmatpush3.bf16.msra.mxu1 %v6333_v9 }
 0x5d8   :  { %1596 = vmatprep.subr.bf16.mxu0 %v6261_v14  ;;  %4643 = vmatprep.subr.bf16.mxu1 %v7183_v60 }
 0x5db   :  { %1597 = vmatpush1.bf16.msra.mxu0 %v6265_v18  ;;  %4644 = vmatpush3.bf16.msra.mxu1 %v6339_v10 }
 0x5dc   :  { %1598 = vmatprep.subr.bf16.mxu0 %v6269_v44  ;;  %4645 = vmatprep.subr.bf16.mxu1 %v7183_v60 }
 0x5df   :  { %1599 = vmatpush1.bf16.msra.mxu0 %v6273_v52  ;;  %4646 = vmatpush3.bf16.msra.mxu1 %v6345_v43 }
 0x5e0   :  { %1600 = vmatprep.subr.bf16.mxu0 %v6277_v47  ;;  %4647 = vmatprep.subr.bf16.mxu1 %v7183_v60 }
 0x5e3   :  { %1601 = vmatpush1.bf16.msra.mxu0 %v6281_v34  ;;  %4648 = vmatpush3.bf16.msra.mxu1 %v6351_v63 }
 0x5e4   :  { %1602 = vmatprep.subr.bf16.mxu0 %v6285_v50  ;;  %4649 = vmatprep.subr.bf16.mxu1 %v7183_v60 }
 0x5e7   :  { %1603 = vmatpush1.bf16.msra.mxu0 %v6356_v24  ;;  %4650 = vmatpush3.bf16.msra.mxu1 %v6418_v53 }
 0x5e8   :  { %1604 = vmatprep.subr.bf16.mxu0 %v6360_v28  ;;  %4651 = vmatprep.subr.bf16.mxu1 %v7183_v60 }
 0x5eb   :  { %1605 = vmatpush1.bf16.msra.mxu0 %v6364_v30  ;;  %4652 = vmatpush3.bf16.msra.mxu1 %v6424_v7 }
 0x5ec   :  { %1727 = vmatprep.subr.bf16.mxu0 %v6214_v23  ;;  %4657 = vmatprep.subr.bf16.mxu1 %v7183_v60 }
 0x6a1   :  { %v1487_v48 = vpop.f32.mrb[20].mxu0  ;;  %v1530_v3 = vpop.f32.mrb[36].mxu1 }
 0x6a2   :  { %v4930_v42 = vadd.f32 %v6099_v16, %v1487_v48  ;;  %v1489_v31 = vpop.f32.mrb[21].mxu0  ;;  %v4635_v55 = vpop.f32.mrb[37].mxu1  ;;  %v1531_v48 = vadd.f32 %v1530_v3, %v6108_v25 }
 0x6a3   :  { %v1491_v26 = vpop.f32.mrb[22].mxu0  ;;  %v1533_v37 = vpop.f32.mrb[38].mxu1  ;;  %v4932_v29 = vadd.f32 %v6101_v20, %v1489_v31 }
 0x6a4   :  { %v4136_v38 = vmul.f32 -1.442695, %v4930_v42  ;;  %v4934_v41 = vadd.f32 %v6099_v16, %v1491_v26  ;;  %v1493_v35 = vpop.f32.mrb[23].mxu0  ;;  %v4636_v51 = vpop.f32.mrb[39].mxu1  ;;  %v1534_v26 = vadd.f32 %v1533_v37, %v6108_v25 }
 0x6a5   :  { %v4936_v23 = vadd.f32 %v6101_v20, %v1493_v35  ;;  %v4138_v57 = vmul.f32 -1.442695, %v4932_v29 }
 0x6a6   :  { %5378 = vpow2.f32 %v4136_v38  ;;  %v4137_v22 = vmul.f32 -1.442695, %v4934_v41 }
 0x6a7   :  { %v4139_v45 = vmul.f32 -1.442695, %v4936_v23 }
 0x6a8   :  { %5380 = vpow2.f32 %v4137_v22 }
 0x6a9   :  { %5382 = vpow2.f32 %v4138_v57 }
 0x6aa   :  { %5384 = vpow2.f32 %v4139_v45 }
 0x6b0   :  { %v5379_v2 = vpop.eup %5378 }
 0x6b1   :  { %v1552_v33 = vadd.f32 1.0, %v5379_v2 }
 0x6b2   :  { %v5381_v59 = vpop.eup %5380 }
 0x6b3   :  { %5386 = vrcp.f32 %v1552_v33  ;;  %v1553_v46 = vadd.f32 1.0, %v5381_v59  ;;  %v5383_v54 = vpop.eup %5382 }
 0x6b4   :  { %v5385_v0 = vpop.eup %5384  ;;  %v1566_v40 = vadd.f32 1.0, %v5383_v54 }
 0x6b5   :  { %5388 = vrcp.f32 %v1553_v46  ;;  %v1567_v42 = vadd.f32 1.0, %v5385_v0 }
 0x6b6   :  { %5390 = vrcp.f32 %v1566_v40 }
 0x6b7   :  { %5392 = vrcp.f32 %v1567_v42 }
 0x6bd   :  { %v5387_v31 = vpop.eup %5386 }
 0x6be   :  { %v1572_v55 = vmul.f32 %v5387_v31, %v1531_v48 }
 0x6bf   :  { %v5389_v38 = vpop.eup %5388 }
 0x6c0   :  { %v1574_v41 = vadd.f32 %v1572_v55, %v6065_v15  ;;  %v1573_v35 = vmul.f32 %v5389_v38, %v1534_v26  ;;  %v5391_v29 = vpop.eup %5390 }
 0x6c1   :  { %v5393_v22 = vpop.eup %5392  ;;  %v1578_v23 = vsub.f32 1.0, %v5391_v29  ;;  %v1582_v2 = vmul.f32 %v5391_v29, %v6380_v58 }
 0x6c2   :  { %5394 = vtanh.f32 %v1574_v41  ;;  %v1575_v51 = vadd.f32 %v1573_v35, %v6071_v19  ;;  %v1579_v3 = vsub.f32 1.0, %v5393_v22  ;;  %v1583_v37 = vmul.f32 %v5393_v22, %v6382_v17 }
 0x6c4   :  { %5396 = vtanh.f32 %v1575_v51 }
 0x6cc   :  { %v5395_v57 = vpop.eup %5394 }
 0x6cd   :  { %v1580_v45 = vmul.f32 %v5395_v57, %v1578_v23 }
 0x6ce   :  { %v5397_v33 = vpop.eup %5396 }
 0x6cf   :  { %v1581_v59 = vmul.f32 %v5397_v33, %v1579_v3  ;;  %v6439_v46 = vadd.f32 %v1582_v2, %v1580_v45 }
 0x6d1   :  { %v6441_v15 = vadd.f32 %v1583_v37, %v1581_v59  ;;  %v5166_v59 = vld [vmem:[#allocation4 + $0xc0] ss:$12 sps:$4 sm:$0xff]   ;;  %v5172_v37 = vld [vmem:[#allocation4 + $0xdc] ss:$12 sps:$4 sm:$0xff]  }
 0x6d3   :  { %v6445_v19 = vpack.c.bf16 %v6441_v15, %v6439_v46 }
 0x6d5   :  { %1623 = vmatmul.mubr.bf16.vlgmr.msra.gmra.mrb[24].mxu0 %v6445_v19  ;;  %4654 = vmatmul.mubr.bf16.vlgmr.msra.gmra.mrb[40].mxu1 %v6445_v19 }
 0x6d6   :  { %1728 = vmatpush1.bf16.msra.mxu0 %v6238_v6  ;;  %4658 = vmatpush3.bf16.msra.mxu1 %v6318_v61  ;;  %v5168_v6 = vld [vmem:[#allocation4 + $0xc4] ss:$12 sps:$4 sm:$0xff]  }
 0x6d7   :  { %1729 = vmatprep.subr.bf16.mxu0 %v6242_v8  ;;  %4659 = vmatprep.subr.bf16.mxu1 %v7183_v60  ;;  %v6482_v8 = vld [vmem:[#allocation4 + $0xc8] ss:$12 sps:$4 sm:$0xff]  }
 0x6d8   :  { %1759 = vmatprep.mubr.bf16.mxu0 %v7184_v5  ;;  %4673 = vmatprep.mubr.msk.bf16.mxu1 %vm5764_vm0, %v7183_v60 }
 0x6da   :  { %1730 = vmatpush1.bf16.msra.mxu0 %v6249_v1  ;;  %4660 = vmatpush3.bf16.msra.mxu1 %v6327_v56 }
 0x6db   :  { %1731 = vmatprep.subr.bf16.mxu0 %v6253_v12  ;;  %4661 = vmatprep.subr.bf16.mxu1 %v7183_v60 }
 0x6de   :  { %1732 = vmatpush1.bf16.msra.mxu0 %v6257_v39  ;;  %4662 = vmatpush3.bf16.msra.mxu1 %v6333_v9 }
 0x6df   :  { %1733 = vmatprep.subr.bf16.mxu0 %v6261_v14  ;;  %4663 = vmatprep.subr.bf16.mxu1 %v7183_v60 }
 0x6e2   :  { %1734 = vmatpush1.bf16.msra.mxu0 %v6265_v18  ;;  %4664 = vmatpush3.bf16.msra.mxu1 %v6339_v10 }
 0x6e3   :  { %1735 = vmatprep.subr.bf16.mxu0 %v6269_v44  ;;  %4665 = vmatprep.subr.bf16.mxu1 %v7183_v60 }
 0x6e6   :  { %1736 = vmatpush1.bf16.msra.mxu0 %v6273_v52  ;;  %4666 = vmatpush3.bf16.msra.mxu1 %v6345_v43 }
 0x6e7   :  { %1737 = vmatprep.subr.bf16.mxu0 %v6277_v47  ;;  %4667 = vmatprep.subr.bf16.mxu1 %v7183_v60 }
 0x6ea   :  { %1738 = vmatpush1.bf16.msra.mxu0 %v6281_v34  ;;  %4668 = vmatpush3.bf16.msra.mxu1 %v6351_v63 }
 0x6eb   :  { %1739 = vmatprep.subr.bf16.mxu0 %v6285_v50  ;;  %4669 = vmatprep.subr.bf16.mxu1 %v7183_v60 }
 0x6ee   :  { %1740 = vmatpush1.bf16.msra.mxu0 %v6356_v24  ;;  %4670 = vmatpush3.bf16.msra.mxu1 %v6418_v53 }
 0x6ef   :  { %1741 = vmatprep.subr.bf16.mxu0 %v6360_v28  ;;  %4671 = vmatprep.subr.bf16.mxu1 %v7183_v60 }
 0x6f2   :  { %1742 = vmatpush1.bf16.msra.mxu0 %v6364_v30  ;;  %4672 = vmatpush3.bf16.msra.mxu1 %v6424_v7 }
 0x6f3   :  { %2066 = vmatprep.subr.bf16.mxu1 %v5168_v6  ;;  %4677 = vmatprep.subr.bf16.mxu0 %v6482_v8  ;;  %v5173_v6 = vld [vmem:[#allocation4 + $0xe0] ss:$12 sps:$4 sm:$0xff]  }
 0x7a8   :  { %v1624_v1 = vpop.f32.mrb[24].mxu0  ;;  %v1667_v12 = vpop.f32.mrb[40].mxu1 }
 0x7a9   :  { %v4938_v39 = vadd.f32 %v6099_v16, %v1624_v1  ;;  %v1626_v14 = vpop.f32.mrb[25].mxu0  ;;  %v4655_v18 = vpop.f32.mrb[41].mxu1  ;;  %v1668_v54 = vadd.f32 %v1667_v12, %v6108_v25  ;;  %v5177_v1 = vld [vmem:[#allocation4 + $0xf8] ss:$12 sps:$4 sm:$0xff]   ;;  %v5174_v12 = vld [vmem:[#allocation4 + $0xf0] ss:$12 sps:$4 sm:$0xff]  }
 0x7aa   :  { %v1628_v44 = vpop.f32.mrb[26].mxu0  ;;  %v1670_v52 = vpop.f32.mrb[42].mxu1  ;;  %v4940_v56 = vadd.f32 %v6101_v20, %v1626_v14  ;;  %v5181_v14 = vld [vmem:[#allocation4 + $0x110] ss:$12 sps:$4 sm:$0xff]   ;;  %v5178_v18 = vld [vmem:[#allocation4 + $0x108] ss:$12 sps:$4 sm:$0xff]  }
 0x7ab   :  { %v4140_v47 = vmul.f32 -1.442695, %v4938_v39  ;;  %v4942_v34 = vadd.f32 %v6099_v16, %v1628_v44  ;;  %v1630_v50 = vpop.f32.mrb[27].mxu0  ;;  %v4656_v61 = vpop.f32.mrb[43].mxu1  ;;  %v1671_v42 = vadd.f32 %v1670_v52, %v6108_v25  ;;  %v5180_v39 = vld [vmem:[#allocation4 + $0x10c] ss:$12 sps:$4 sm:$0xff]  }
 0x7ac   :  { %v4944_v10 = vadd.f32 %v6101_v20, %v1630_v50  ;;  %v4142_v43 = vmul.f32 -1.442695, %v4940_v56  ;;  %v5185_v44 = vld [vmem:[#allocation4 + $0x128] ss:$12 sps:$4 sm:$0xff]   ;;  %v5182_v52 = vld [vmem:[#allocation4 + $0x120] ss:$12 sps:$4 sm:$0xff]  }
 0x7ad   :  { %5398 = vpow2.f32 %v4140_v47  ;;  %v4141_v9 = vmul.f32 -1.442695, %v4942_v34  ;;  %v5188_v47 = vld [vmem:[#allocation4 + $0x13c] ss:$12 sps:$4 sm:$0xff]   ;;  %v5189_v34 = vld [vmem:[#allocation4 + $0x140] ss:$12 sps:$4 sm:$0xff]  }
 0x7ae   :  { %v4143_v63 = vmul.f32 -1.442695, %v4944_v10  ;;  %v5186_v50 = vld [vmem:[#allocation4 + $0x138] ss:$12 sps:$4 sm:$0xff]   ;;  %v5192_v61 = vld [vmem:[#allocation4 + $0x154] ss:$12 sps:$4 sm:$0xff]  }
 0x7af   :  { %5400 = vpow2.f32 %v4141_v9  ;;  %v5193_v56 = vld [vmem:[#allocation4 + $0x158] ss:$12 sps:$4 sm:$0xff]   ;;  %v5190_v9 = vld [vmem:[#allocation4 + $0x150] ss:$12 sps:$4 sm:$0xff]  }
 0x7b0   :  { %5402 = vpow2.f32 %v4142_v43  ;;  %v5196_v10 = vld [vmem:[#allocation4 + $0x16c] ss:$12 sps:$4 sm:$0xff]   ;;  %v5197_v43 = vld [vmem:[#allocation4 + $0x170] ss:$12 sps:$4 sm:$0xff]  }
 0x7b1   :  { %5404 = vpow2.f32 %v4143_v63  ;;  %v5194_v63 = vld [vmem:[#allocation4 + $0x168] ss:$12 sps:$4 sm:$0xff]  }
 0x7b7   :  { %v5399_v24 = vpop.eup %5398 }
 0x7b8   :  { %v1689_v28 = vadd.f32 1.0, %v5399_v24  ;;  %v6508_v24 = vld [vmem:[#allocation6 + $0xc4] ss:$12 sps:$4 sm:$0xff]  }
 0x7b9   :  { %v5401_v30 = vpop.eup %5400 }
 0x7ba   :  { %5406 = vrcp.f32 %v1689_v28  ;;  %v1690_v58 = vadd.f32 1.0, %v5401_v30  ;;  %v5403_v17 = vpop.eup %5402  ;;  %v6511_v28 = vld [vmem:[#allocation6 + $0xc0] ss:$12 sps:$4 sm:$0xff]   ;;  %v6552_v30 = vld [vmem:[#allocation6 + $0x124] ss:$12 sps:$4 sm:$0xff]  }
 0x7bb   :  { %v5405_v53 = vpop.eup %5404  ;;  %v1703_v7 = vadd.f32 1.0, %v5403_v17  ;;  %v6558_v17 = vld [vmem:[#allocation6 + $0x13c] ss:$12 sps:$4 sm:$0xff]  }
 0x7bc   :  { %5408 = vrcp.f32 %v1690_v58  ;;  %v1704_v0 = vadd.f32 1.0, %v5405_v53  ;;  %v6555_v58 = vld [vmem:[#allocation6 + $0x120] ss:$12 sps:$4 sm:$0xff]   ;;  %v6561_v53 = vld [vmem:[#allocation6 + $0x138] ss:$12 sps:$4 sm:$0xff]  }
 0x7bd   :  { %5410 = vrcp.f32 %v1703_v7  ;;  %v6564_v7 = vld [vmem:[#allocation6 + $0x154] ss:$12 sps:$4 sm:$0xff]  }
 0x7be   :  { %5412 = vrcp.f32 %v1704_v0  ;;  %v6570_v0 = vld [vmem:[#allocation6 + $0xc8] ss:$12 sps:$4 sm:$0xff]  }
 0x7c4   :  { %v5407_v40 = vpop.eup %5406 }
 0x7c5   :  { %v1709_v48 = vmul.f32 %v5407_v40, %v1668_v54  ;;  %v6567_v54 = vld [vmem:[#allocation6 + $0x150] ss:$12 sps:$4 sm:$0xff]   ;;  %v6572_v40 = vld [vmem:[#allocation6 + $0x16c] ss:$12 sps:$4 sm:$0xff]  }
 0x7c6   :  { %v5409_v31 = vpop.eup %5408 }
 0x7c7   :  { %v1711_v55 = vadd.f32 %v1709_v48, %v6080_v32  ;;  %v1710_v26 = vmul.f32 %v5409_v31, %v1671_v42  ;;  %v5411_v41 = vpop.eup %5410  ;;  %v6575_v48 = vld [vmem:[#allocation6 + $0xe0] ss:$12 sps:$4 sm:$0xff]   ;;  %v6578_v42 = vld [vmem:[#allocation6 + $0x168] ss:$12 sps:$4 sm:$0xff]   ;;  %v6585_v31 = vld [vmem:[#allocation6 + $0xf8] ss:$12 sps:$4 sm:$0xff]  }
 0x7c8   :  { %v5413_v35 = vpop.eup %5412  ;;  %v1715_v51 = vsub.f32 1.0, %v5411_v41  ;;  %v1719_v57 = vmul.f32 %v5411_v41, %v6439_v46  ;;  %v5170_v46 = vld [vmem:[#allocation4 + $0xd8] ss:$12 sps:$4 sm:$0xff]  }
 0x7c9   :  { %5414 = vtanh.f32 %v1711_v55  ;;  %v1712_v38 = vadd.f32 %v1710_v26, %v6086_v49  ;;  %v1716_v22 = vsub.f32 1.0, %v5413_v35  ;;  %v1720_v2 = vmul.f32 %v5413_v35, %v6441_v15  ;;  %v5176_v15 = vld [vmem:[#allocation4 + $0xf4] ss:$12 sps:$4 sm:$0xff]   ;;  %v6589_v55 = vld [vmem:[#allocation6 + $0x110] ss:$12 sps:$4 sm:$0xff]  }
 0x7ca   :  { %v6593_v26 = vld [vmem:[#allocation6 + $0x128] ss:$12 sps:$4 sm:$0xff]   ;;  %v6601_v41 = vld [vmem:[#allocation6 + $0x158] ss:$12 sps:$4 sm:$0xff]   ;;  %v6605_v35 = vld [vmem:[#allocation6 + $0x170] ss:$12 sps:$4 sm:$0xff]  }
 0x7cb   :  { %5416 = vtanh.f32 %v1712_v38  ;;  %v6597_v38 = vld [vmem:[#allocation6 + $0x140] ss:$12 sps:$4 sm:$0xff]  }
 0x7d3   :  { %v5415_v29 = vpop.eup %5414 }
 0x7d4   :  { %v1717_v23 = vmul.f32 %v5415_v29, %v1715_v51 }
 0x7d5   :  { %v5417_v3 = vpop.eup %5416 }
 0x7d6   :  { %v1718_v45 = vmul.f32 %v5417_v3, %v1716_v22  ;;  %v6495_v33 = vadd.f32 %v1719_v57, %v1717_v23 }
 0x7d8   :  { %v6497_v32 = vadd.f32 %v1720_v2, %v1718_v45 }
 0x7da   :  { %v6501_v49 = vpack.c.bf16 %v6497_v32, %v6495_v33 }
 0x7dc   :  { %1760 = vmatmul.mubr.bf16.vlgmr.msra.gmra.mrb[28].mxu0 %v6501_v49  ;;  %4674 = vmatmul.mubr.bf16.vlgmr.msra.gmra.mrb[44].mxu1 %v6501_v49 }
 0x7dd   :  { %2067 = vmatpush1.bf16.msra.mxu1 %v5166_v59  ;;  %4678 = vmatpush3.bf16.msra.mxu0 %v6482_v8  ;;  %v5184_v8 = vld [vmem:[#allocation4 + $0x124] ss:$12 sps:$4 sm:$0xff]  }
 0x7de   :  { %4693 = vmatprep.mubr.bf16.mxu0 %v6122_v62  ;;  %2068 = vmatprep.subr.bf16.mxu1 %v5172_v37 }
 0x7df   :  { %4679 = vmatprep.subr.bf16.mxu0 %v5173_v6  ;;  %2098 = vmatprep.mubr.bf16.mxu1 %v7184_v5 }
 0x7e1   :  { %2069 = vmatpush1.bf16.msra.mxu1 %v5170_v46  ;;  %4680 = vmatpush3.bf16.msra.mxu0 %v5173_v6 }
 0x7e2   :  { %2070 = vmatprep.subr.bf16.mxu1 %v5176_v15  ;;  %4681 = vmatprep.subr.bf16.mxu0 %v5177_v1 }
 0x7e5   :  { %2071 = vmatpush1.bf16.msra.mxu1 %v5174_v12  ;;  %4682 = vmatpush3.bf16.msra.mxu0 %v5177_v1 }
 0x7e6   :  { %2072 = vmatprep.subr.bf16.mxu1 %v5180_v39  ;;  %4683 = vmatprep.subr.bf16.mxu0 %v5181_v14 }
 0x7e9   :  { %2073 = vmatpush1.bf16.msra.mxu1 %v5178_v18  ;;  %4684 = vmatpush3.bf16.msra.mxu0 %v5181_v14 }
 0x7ea   :  { %2074 = vmatprep.subr.bf16.mxu1 %v5184_v8  ;;  %4685 = vmatprep.subr.bf16.mxu0 %v5185_v44 }
 0x7ed   :  { %2075 = vmatpush1.bf16.msra.mxu1 %v5182_v52  ;;  %4686 = vmatpush3.bf16.msra.mxu0 %v5185_v44 }
 0x7ee   :  { %2076 = vmatprep.subr.bf16.mxu1 %v5188_v47  ;;  %4687 = vmatprep.subr.bf16.mxu0 %v5189_v34 }
 0x7f1   :  { %2077 = vmatpush1.bf16.msra.mxu1 %v5186_v50  ;;  %4688 = vmatpush3.bf16.msra.mxu0 %v5189_v34 }
 0x7f2   :  { %2078 = vmatprep.subr.bf16.mxu1 %v5192_v61  ;;  %4689 = vmatprep.subr.bf16.mxu0 %v5193_v56 }
 0x7f5   :  { %2079 = vmatpush1.bf16.msra.mxu1 %v5190_v9  ;;  %4690 = vmatpush3.bf16.msra.mxu0 %v5193_v56 }
 0x7f6   :  { %2080 = vmatprep.subr.bf16.mxu1 %v5196_v10  ;;  %4691 = vmatprep.subr.bf16.mxu0 %v5197_v43 }
 0x7f9   :  { %2081 = vmatpush1.bf16.msra.mxu1 %v5194_v63  ;;  %4692 = vmatpush3.bf16.msra.mxu0 %v5197_v43 }
 0x7fa   :  { %2503 = vmatprep.subr.bf16.mxu1 %v6508_v24  ;;  %4709 = vmatprep.subr.bf16.mxu0 %v7183_v60 }
 0x7fc   :  { %2099 = vmatmul.mubr.bf16.vlgmr.msra.gmra.mrb[48].mxu1 %v6122_v62  ;;  %4694 = vmatmul.mubr.bf16.vlgmr.msra.gmra.mrb[32].mxu0 %v6177_v4  ;;  %v6535_v62 = vld [vmem:[#allocation6 + $0xdc] ss:$12 sps:$4 sm:$0xff]  }
 0x7fd   :  { %4697 = vmatprep.mubr.bf16.mxu0 %v6234_v13  ;;  %2108 = vmatprep.mubr.bf16.mxu1 %v7184_v5 }
 0x7fe   :  { %2504 = vmatpush1.bf16.msra.mxu1 %v6511_v28  ;;  %4710 = vmatpush3.bf16.msra.mxu0 %v6570_v0 }
 0x7ff   :  { %2505 = vmatprep.subr.bf16.mxu1 %v6535_v62  ;;  %4711 = vmatprep.subr.bf16.mxu0 %v7183_v60 }
 0x802   :  { %4712 = vmatpush3.bf16.msra.mxu0 %v6575_v48 }
 0x803   :  { %4713 = vmatprep.subr.bf16.mxu0 %v7183_v60 }
 0x804   :  { %2109 = vmatmul.mubr.bf16.gmra.mrb[52].mxu1 %v6177_v4  ;;  %4698 = vmatmul.mubr.bf16.gmra.mrb[36].mxu0 %v6313_v11  ;;  %v6537_v4 = vld [vmem:[#allocation6 + $0xd8] ss:$12 sps:$4 sm:$0xff]  }
 0x805   :  { %4701 = vmatprep.mubr.bf16.mxu0 %v6386_v21  ;;  %2118 = vmatprep.mubr.bf16.mxu1 %v7184_v5 }
 0x806   :  { %2506 = vmatpush1.bf16.msra.mxu1 %v6537_v4  ;;  %4714 = vmatpush3.bf16.msra.mxu0 %v6585_v31 }
 0x807   :  { %4715 = vmatprep.subr.bf16.mxu0 %v7183_v60 }
 0x80a   :  { %4716 = vmatpush3.bf16.msra.mxu0 %v6589_v55 }
 0x80b   :  { %4717 = vmatprep.subr.bf16.mxu0 %v7183_v60 }
 0x80c   :  { %2119 = vmatmul.mubr.bf16.gmra.mrb[56].mxu1 %v6234_v13  ;;  %4702 = vmatmul.mubr.bf16.gmra.mrb[40].mxu0 %v6445_v19  ;;  %v6541_v13 = vld [vmem:[#allocation6 + $0xf4] ss:$12 sps:$4 sm:$0xff]  }
 0x80d   :  { %4705 = vmatprep.mubr.bf16.mxu0 %v6501_v49  ;;  %2128 = vmatprep.mubr.bf16.mxu1 %v7184_v5 }
 0x80e   :  { %2507 = vmatprep.subr.bf16.mxu1 %v6541_v13  ;;  %4718 = vmatpush3.bf16.msra.mxu0 %v6593_v26 }
 0x80f   :  { %4719 = vmatprep.subr.bf16.mxu0 %v7183_v60 }
 0x812   :  { %4720 = vmatpush3.bf16.msra.mxu0 %v6597_v38 }
 0x813   :  { %4721 = vmatprep.subr.bf16.mxu0 %v7183_v60 }
 0x814   :  { %2129 = vmatmul.mubr.bf16.gmra.mrb[60].mxu1 %v6313_v11  ;;  %v6543_v11 = vld [vmem:[#allocation6 + $0xf0] ss:$12 sps:$4 sm:$0xff]  }
 0x815   :  { %2138 = vmatprep.mubr.bf16.mxu1 %v7184_v5  ;;  %2508 = vmatpush1.bf16.msra.mxu1 %v6543_v11 }
 0x816   :  { %4722 = vmatpush3.bf16.msra.mxu0 %v6601_v41 }
 0x817   :  { %4723 = vmatprep.subr.bf16.mxu0 %v7183_v60 }
 0x81a   :  { %4724 = vmatpush3.bf16.msra.mxu0 %v6605_v35 }
 0x81b   :  { %4729 = vmatprep.subr.bf16.mxu0 %v7183_v60 }
 0x81c   :  { %2139 = vmatmul.mubr.bf16.gmra.mrb[64].mxu1 %v6386_v21  ;;  %v6545_v21 = vld [vmem:[#allocation6 + $0x10c] ss:$12 sps:$4 sm:$0xff]  }
 0x81d   :  { %2148 = vmatprep.mubr.bf16.mxu1 %v7184_v5  ;;  %2509 = vmatprep.subr.bf16.mxu1 %v6545_v21 }
 0x824   :  { %2149 = vmatmul.mubr.bf16.gmra.mrb[68].mxu1 %v6445_v19  ;;  %v6549_v19 = vld [vmem:[#allocation6 + $0x108] ss:$12 sps:$4 sm:$0xff]  }
 0x825   :  { %2158 = vmatprep.mubr.bf16.mxu1 %v7184_v5  ;;  %2510 = vmatpush1.bf16.msra.mxu1 %v6549_v19 }
 0x826   :  { %2511 = vmatprep.subr.bf16.mxu1 %v6552_v30 }
 0x829   :  { %2512 = vmatpush1.bf16.msra.mxu1 %v6555_v58 }
 0x82a   :  { %2513 = vmatprep.subr.bf16.mxu1 %v6558_v17 }
 0x82c   :  { %2159 = vmatmul.mubr.bf16.gmra.mrb[72].mxu1 %v6501_v49 }
 0x82d   :  { %2168 = vmatprep.mubr.bf16.mxu1 %v7184_v5  ;;  %2514 = vmatpush1.bf16.msra.mxu1 %v6561_v53 }
 0x82e   :  { %2515 = vmatprep.subr.bf16.mxu1 %v6564_v7 }
 0x831   :  { %2516 = vmatpush1.bf16.msra.mxu1 %v6567_v54 }
 0x832   :  { %2517 = vmatprep.subr.bf16.mxu1 %v6572_v40 }
 0x835   :  { %2518 = vmatpush1.bf16.msra.mxu1 %v6578_v42 }
 0x836   :  { %2636 = vmatprep.subr.bf16.mxu1 %v6508_v24 }
 0x8af   :  { %v1761_v51 = vpop.f32.mrb[28].mxu0  ;;  %v1804_v29 = vpop.f32.mrb[44].mxu1 }
 0x8b0   :  { %v4946_v22 = vadd.f32 %v6099_v16, %v1761_v51  ;;  %v1763_v23 = vpop.f32.mrb[29].mxu0  ;;  %v4675_v57 = vpop.f32.mrb[45].mxu1  ;;  %v1805_v47 = vadd.f32 %v1804_v29, %v6108_v25 }
 0x8b1   :  { %v1765_v3 = vpop.f32.mrb[30].mxu0  ;;  %v1807_v45 = vpop.f32.mrb[46].mxu1  ;;  %v4948_v6 = vadd.f32 %v6101_v20, %v1763_v23 }
 0x8b2   :  { %v4144_v2 = vmul.f32 -1.442695, %v4946_v22  ;;  %v4950_v59 = vadd.f32 %v6099_v16, %v1765_v3  ;;  %v1767_v49 = vpop.f32.mrb[31].mxu0  ;;  %v4676_v37 = vpop.f32.mrb[47].mxu1 }
 0x8b3   :  { %v4952_v15 = vadd.f32 %v6101_v20, %v1767_v49  ;;  %v4146_v1 = vmul.f32 -1.442695, %v4948_v6  ;;  %v1808_v20 = vadd.f32 %v1807_v45, %v6108_v25 }
 0x8b4   :  { %5418 = vpow2.f32 %v4144_v2  ;;  %v4145_v46 = vmul.f32 -1.442695, %v4950_v59 }
 0x8b5   :  { %v4147_v12 = vmul.f32 -1.442695, %v4952_v15 }
 0x8b6   :  { %5420 = vpow2.f32 %v4145_v46 }
 0x8b7   :  { %5422 = vpow2.f32 %v4146_v1 }
 0x8b8   :  { %5424 = vpow2.f32 %v4147_v12 }
 0x8be   :  { %v5419_v39 = vpop.eup %5418 }
 0x8bf   :  { %v1826_v14 = vadd.f32 1.0, %v5419_v39 }
 0x8c0   :  { %v5421_v18 = vpop.eup %5420 }
 0x8c1   :  { %5426 = vrcp.f32 %v1826_v14  ;;  %v1827_v8 = vadd.f32 1.0, %v5421_v18  ;;  %v5423_v16 = vpop.eup %5422 }
 0x8c2   :  { %v5425_v44 = vpop.eup %5424  ;;  %v1840_v52 = vadd.f32 1.0, %v5423_v16 }
 0x8c3   :  { %5428 = vrcp.f32 %v1827_v8  ;;  %v1841_v34 = vadd.f32 1.0, %v5425_v44 }
 0x8c4   :  { %5430 = vrcp.f32 %v1840_v52  ;;  %v7186_v52 = vld [vmem:[#allocation15_spill] sm:$0xff] }
 0x8c5   :  { %5432 = vrcp.f32 %v1841_v34 }
 0x8cb   :  { %v5427_v50 = vpop.eup %5426 }
 0x8cc   :  { %v1846_v61 = vmul.f32 %v5427_v50, %v1805_v47 }
 0x8cd   :  { %v5429_v56 = vpop.eup %5428 }
 0x8ce   :  { %v1848_v9 = vadd.f32 %v1846_v61, %v6077_v27  ;;  %v1847_v10 = vmul.f32 %v5429_v56, %v1808_v20  ;;  %v5431_v23 = vpop.eup %5430  ;;  %v7188_v56 = vld [vmem:[#allocation16_spill] sm:$0xff] }
 0x8cf   :  { %v6617_v43 = vpop.f32.mrb[32].mxu0  ;;  %v5433_v25 = vpop.eup %5432  ;;  %v1852_v45 = vsub.f32 1.0, %v5431_v23  ;;  %v1856_v37 = vmul.f32 %v5431_v23, %v6495_v33  ;;  %v4173_v33 = vld [vmem:[%s7160_s4 + $0x3] sm:$0x7] }
 0x8d0   :  { %5434 = vtanh.f32 %v1848_v9  ;;  %v1849_v63 = vadd.f32 %v1847_v10, %v6083_v36  ;;  %v6620_v51 = vpop.f32.mrb[33].mxu0  ;;  %v1853_v36 = vsub.f32 1.0, %v5433_v25  ;;  %v1857_v15 = vmul.f32 %v5433_v25, %v6497_v32  ;;  %v4148_v32 = vld [vmem:[%s7159_s3 + $0x3] sm:$0x7] }
 0x8d1   :  { %v6622_v22 = vpop.f32.mrb[34].mxu0  ;;  %v1926_v47 = vrot.slane %v4148_v32, %v7186_v52  ;;  %v2363_v50 = vrot.slane %v4173_v33, %v7186_v52  ;;  %v1930_v9 = vrot.slane %v4148_v32, %v7188_v56  ;;  %v2367_v10 = vrot.slane %v4173_v33, %v7188_v56 }
 0x8d2   :  { %5436 = vtanh.f32 %v1849_v63  ;;  %v6624_v29 = vpop.f32.mrb[35].mxu0 }
 0x8d3   :  { %v6702_v63 = vadd.f32 %v2363_v50, %v1926_v47  ;;  %v6704_v25 = vadd.f32 %v2367_v10, %v1930_v9 }
 0x8d7   :  { %v6626_v57 = vpop.f32.mrb[36].mxu0 }
 0x8d8   :  { %v6628_v3 = vpop.f32.mrb[37].mxu0 }
 0x8d9   :  { %v6630_v27 = vpop.f32.mrb[38].mxu0 }
 0x8da   :  { %v5435_v2 = vpop.eup %5434  ;;  %v6632_v59 = vpop.f32.mrb[39].mxu0 }
 0x8db   :  { %v1854_v49 = vmul.f32 %v5435_v2, %v1852_v45 }
 0x8dc   :  { %v5437_v6 = vpop.eup %5436 }
 0x8dd   :  { %v1855_v46 = vmul.f32 %v5437_v6, %v1853_v36  ;;  %v1858_v1 = vadd.f32 %v1856_v37, %v1854_v49 }
 0x8df   :  { %v6636_v12 = vpop.f32.mrb[40].mxu0  ;;  %v1859_v39 = vadd.f32 %v1857_v15, %v1855_v46 }
 0x8e0   :  { %v6638_v14 = vpop.f32.mrb[41].mxu0 }
 0x8e1   :  { %v6640_v18 = vpop.f32.mrb[42].mxu0  ;;  %v1886_v8 = vpack.c.bf16 %v1859_v39, %v1858_v1 }
 0x8e2   :  { %v6642_v16 = vpop.f32.mrb[43].mxu0 }
 0x8e3   :  { %2169 = vmatmul.mubr.bf16.gmra.mrb[76].mxu1 %v1886_v8  ;;  %4706 = vmatmul.mubr.bf16.gmra.mrb[44].mxu0 %v1886_v8 }
 0x8e4   :  { %2535 = vmatprep.mubr.bf16.mxu1 %v7184_v5  ;;  %4725 = vmatprep.mubr.msk.bf16.mxu0 %vm5764_vm0, %v7183_v60 }
 0x8eb   :  { %2536 = vmatmul.mubr.bf16.vlgmr.msra.gmra.mrb[48].mxu1 %v7184_v5  ;;  %4726 = vmatmul.mubr.bf16.vlgmr.msra.gmra.mrb[48].mxu0 %v7184_v5 }
 0x8ec   :  { %2637 = vmatpush1.bf16.msra.mxu1 %v6511_v28  ;;  %4730 = vmatpush3.bf16.msra.mxu0 %v6570_v0 }
 0x8ed   :  { %2638 = vmatprep.subr.bf16.mxu1 %v6535_v62  ;;  %4731 = vmatprep.subr.bf16.mxu0 %v7183_v60 }
 0x8ee   :  { %2668 = vmatprep.mubr.bf16.mxu1 %v7184_v5  ;;  %4745 = vmatprep.mubr.msk.bf16.mxu0 %vm5764_vm0, %v7183_v60 }
 0x8f0   :  { %2639 = vmatpush1.bf16.msra.mxu1 %v6537_v4  ;;  %4732 = vmatpush3.bf16.msra.mxu0 %v6575_v48 }
 0x8f1   :  { %2640 = vmatprep.subr.bf16.mxu1 %v6541_v13  ;;  %4733 = vmatprep.subr.bf16.mxu0 %v7183_v60 }
 0x8f4   :  { %2641 = vmatpush1.bf16.msra.mxu1 %v6543_v11  ;;  %4734 = vmatpush3.bf16.msra.mxu0 %v6585_v31 }
 0x8f5   :  { %2642 = vmatprep.subr.bf16.mxu1 %v6545_v21  ;;  %4735 = vmatprep.subr.bf16.mxu0 %v7183_v60 }
 0x8f8   :  { %2643 = vmatpush1.bf16.msra.mxu1 %v6549_v19  ;;  %4736 = vmatpush3.bf16.msra.mxu0 %v6589_v55 }
 0x8f9   :  { %2644 = vmatprep.subr.bf16.mxu1 %v6552_v30  ;;  %4737 = vmatprep.subr.bf16.mxu0 %v7183_v60 }
 0x8fc   :  { %2645 = vmatpush1.bf16.msra.mxu1 %v6555_v58  ;;  %4738 = vmatpush3.bf16.msra.mxu0 %v6593_v26 }
 0x8fd   :  { %2646 = vmatprep.subr.bf16.mxu1 %v6558_v17  ;;  %4739 = vmatprep.subr.bf16.mxu0 %v7183_v60 }
 0x900   :  { %2647 = vmatpush1.bf16.msra.mxu1 %v6561_v53  ;;  %4740 = vmatpush3.bf16.msra.mxu0 %v6597_v38 }
 0x901   :  { %2648 = vmatprep.subr.bf16.mxu1 %v6564_v7  ;;  %4741 = vmatprep.subr.bf16.mxu0 %v7183_v60 }
 0x904   :  { %2649 = vmatpush1.bf16.msra.mxu1 %v6567_v54  ;;  %4742 = vmatpush3.bf16.msra.mxu0 %v6601_v41 }
 0x905   :  { %2650 = vmatprep.subr.bf16.mxu1 %v6572_v40  ;;  %4743 = vmatprep.subr.bf16.mxu0 %v7183_v60 }
 0x908   :  { %2651 = vmatpush1.bf16.msra.mxu1 %v6578_v42  ;;  %4744 = vmatpush3.bf16.msra.mxu0 %v6605_v35 }
 0x909   :  { %2769 = vmatprep.subr.bf16.mxu1 %v6508_v24  ;;  %4749 = vmatprep.subr.bf16.mxu0 %v7183_v60 }
 0x9b6   :  { %v6690_v44 = vpop.f32.mrb[44].mxu0 }
 0x9b7   :  { %7185 = vst [vmem:[#allocation17_spill] sm:$0xff] %v6690_v44  ;;  %v6693_v34 = vpop.f32.mrb[45].mxu0 }
 0x9b8   :  { %v6696_v61 = vpop.f32.mrb[46].mxu0 }
 0x9b9   :  { %7187 = vst [vmem:[#allocation18_spill] sm:$0xff] %v6696_v61  ;;  %v6698_v20 = vpop.f32.mrb[47].mxu0 }
 0x9be   :  { %v2537_v23 = vpop.f32.mrb[48].mxu1  ;;  %v2580_v45 = vpop.f32.mrb[48].mxu0 }
 0x9bf   :  { %v4954_v2 = vadd.f32 %v6702_v63, %v2537_v23  ;;  %v2539_v36 = vpop.f32.mrb[49].mxu1  ;;  %v4727_v49 = vpop.f32.mrb[49].mxu0 }
 0x9c0   :  { %v2541_v37 = vpop.f32.mrb[50].mxu1  ;;  %v2583_v6 = vpop.f32.mrb[50].mxu0  ;;  %v4956_v8 = vadd.f32 %v6704_v25, %v2539_v36 }
 0x9c1   :  { %v4198_v46 = vmul.f32 -1.442695, %v4954_v2  ;;  %v4958_v15 = vadd.f32 %v6702_v63, %v2541_v37  ;;  %v2543_v1 = vpop.f32.mrb[51].mxu1  ;;  %v4728_v39 = vpop.f32.mrb[51].mxu0  ;;  %v7189_v37 = vld [vmem:[#allocation14_spill] sm:$0xff] }
 0x9c2   :  { %v4960_v50 = vadd.f32 %v6704_v25, %v2543_v1  ;;  %v4200_v9 = vmul.f32 -1.442695, %v4956_v8  ;;  %v6711_v52 = vrot.slane %v4173_v33, %v7189_v37 }
 0x9c3   :  { %5438 = vpow2.f32 %v4198_v46  ;;  %v4199_v47 = vmul.f32 -1.442695, %v4958_v15  ;;  %v6714_v46 = vrot.slane %v4148_v32, %v7189_v37 }
 0x9c4   :  { %v4201_v10 = vmul.f32 -1.442695, %v4960_v50  ;;  %v2581_v1 = vadd.f32 %v2580_v45, %v6711_v52 }
 0x9c5   :  { %5440 = vpow2.f32 %v4199_v47  ;;  %v2214_v50 = vadd.f32 %v6620_v51, %v6714_v46  ;;  %v2217_v33 = vadd.f32 %v6624_v29, %v6714_v46 }
 0x9c6   :  { %5442 = vpow2.f32 %v4200_v9 }
 0x9c7   :  { %5444 = vpow2.f32 %v4201_v10 }
 0x9cd   :  { %v5439_v23 = vpop.eup %5438 }
 0x9ce   :  { %v2601_v49 = vadd.f32 1.0, %v5439_v23 }
 0x9cf   :  { %v5441_v56 = vpop.eup %5440 }
 0x9d0   :  { %5446 = vrcp.f32 %v2601_v49  ;;  %v2602_v2 = vadd.f32 1.0, %v5441_v56  ;;  %v5443_v39 = vpop.eup %5442  ;;  %v2584_v56 = vadd.f32 %v2583_v6, %v6711_v52 }
 0x9d1   :  { %v5445_v36 = vpop.eup %5444  ;;  %v2615_v15 = vadd.f32 1.0, %v5443_v39 }
 0x9d2   :  { %5448 = vrcp.f32 %v2602_v2  ;;  %v2616_v8 = vadd.f32 1.0, %v5445_v36 }
 0x9d3   :  { %5450 = vrcp.f32 %v2615_v15 }
 0x9d4   :  { %5452 = vrcp.f32 %v2616_v8 }
 0x9da   :  { %v5447_v47 = vpop.eup %5446 }
 0x9db   :  { %v2621_v9 = vmul.f32 %v5447_v47, %v2581_v1 }
 0x9dc   :  { %v5449_v10 = vpop.eup %5448 }
 0x9dd   :  { %v2623_v23 = vadd.f32 %v2621_v9, %v2214_v50  ;;  %v2622_v32 = vmul.f32 %v5449_v10, %v2584_v56  ;;  %v5451_v45 = vpop.eup %5450 }
 0x9de   :  { %v5453_v2 = vpop.eup %5452  ;;  %v2627_v37 = vsub.f32 1.0, %v5451_v45  ;;  %v2631_v15 = vmul.f32 0.0, %v5451_v45 }
 0x9df   :  { %5454 = vtanh.f32 %v2623_v23  ;;  %v2624_v49 = vadd.f32 %v2622_v32, %v2217_v33  ;;  %v2628_v36 = vsub.f32 1.0, %v5453_v2  ;;  %v2632_v6 = vmul.f32 0.0, %v5453_v2 }
 0x9e1   :  { %5456 = vtanh.f32 %v2624_v49 }
 0x9e9   :  { %v5455_v39 = vpop.eup %5454 }
 0x9ea   :  { %v2629_v51 = vmul.f32 %v5455_v39, %v2627_v37 }
 0x9eb   :  { %v5457_v1 = vpop.eup %5456 }
 0x9ec   :  { %v2630_v47 = vmul.f32 %v5457_v1, %v2628_v36  ;;  %v6722_v61 = vadd.f32 %v2631_v15, %v2629_v51 }
 0x9ee   :  { %v6724_v44 = vadd.f32 %v2632_v6, %v2630_v47 }
 0x9f0   :  { %v2635_v29 = vpack.c.bf16 %v6724_v44, %v6722_v61 }
 0x9f2   :  { %2669 = vmatmul.mubr.bf16.vlgmr.msra.gmra.mrb[52].mxu1 %v2635_v29  ;;  %4746 = vmatmul.mubr.bf16.vlgmr.msra.gmra.mrb[52].mxu0 %v2635_v29 }
 0x9f3   :  { %2770 = vmatpush1.bf16.msra.mxu1 %v6511_v28  ;;  %4750 = vmatpush3.bf16.msra.mxu0 %v6570_v0 }
 0x9f4   :  { %2771 = vmatprep.subr.bf16.mxu1 %v6535_v62  ;;  %4751 = vmatprep.subr.bf16.mxu0 %v7183_v60 }
 0x9f5   :  { %2801 = vmatprep.mubr.bf16.mxu1 %v7184_v5  ;;  %4765 = vmatprep.mubr.msk.bf16.mxu0 %vm5764_vm0, %v7183_v60 }
 0x9f7   :  { %2772 = vmatpush1.bf16.msra.mxu1 %v6537_v4  ;;  %4752 = vmatpush3.bf16.msra.mxu0 %v6575_v48 }
 0x9f8   :  { %2773 = vmatprep.subr.bf16.mxu1 %v6541_v13  ;;  %4753 = vmatprep.subr.bf16.mxu0 %v7183_v60 }
 0x9fb   :  { %2774 = vmatpush1.bf16.msra.mxu1 %v6543_v11  ;;  %4754 = vmatpush3.bf16.msra.mxu0 %v6585_v31 }
 0x9fc   :  { %2775 = vmatprep.subr.bf16.mxu1 %v6545_v21  ;;  %4755 = vmatprep.subr.bf16.mxu0 %v7183_v60 }
 0x9ff   :  { %2776 = vmatpush1.bf16.msra.mxu1 %v6549_v19  ;;  %4756 = vmatpush3.bf16.msra.mxu0 %v6589_v55 }
 0xa00   :  { %2777 = vmatprep.subr.bf16.mxu1 %v6552_v30  ;;  %4757 = vmatprep.subr.bf16.mxu0 %v7183_v60 }
 0xa03   :  { %2778 = vmatpush1.bf16.msra.mxu1 %v6555_v58  ;;  %4758 = vmatpush3.bf16.msra.mxu0 %v6593_v26 }
 0xa04   :  { %2779 = vmatprep.subr.bf16.mxu1 %v6558_v17  ;;  %4759 = vmatprep.subr.bf16.mxu0 %v7183_v60 }
 0xa07   :  { %2780 = vmatpush1.bf16.msra.mxu1 %v6561_v53  ;;  %4760 = vmatpush3.bf16.msra.mxu0 %v6597_v38 }
 0xa08   :  { %2781 = vmatprep.subr.bf16.mxu1 %v6564_v7  ;;  %4761 = vmatprep.subr.bf16.mxu0 %v7183_v60 }
 0xa0b   :  { %2782 = vmatpush1.bf16.msra.mxu1 %v6567_v54  ;;  %4762 = vmatpush3.bf16.msra.mxu0 %v6601_v41 }
 0xa0c   :  { %2783 = vmatprep.subr.bf16.mxu1 %v6572_v40  ;;  %4763 = vmatprep.subr.bf16.mxu0 %v7183_v60 }
 0xa0f   :  { %2784 = vmatpush1.bf16.msra.mxu1 %v6578_v42  ;;  %4764 = vmatpush3.bf16.msra.mxu0 %v6605_v35 }
 0xa10   :  { %2902 = vmatprep.subr.bf16.mxu1 %v6508_v24  ;;  %4769 = vmatprep.subr.bf16.mxu0 %v7183_v60 }
 0xac5   :  { %v2670_v8 = vpop.f32.mrb[52].mxu1  ;;  %v2713_v50 = vpop.f32.mrb[52].mxu0 }
 0xac6   :  { %v4962_v9 = vadd.f32 %v6702_v63, %v2670_v8  ;;  %v2672_v56 = vpop.f32.mrb[53].mxu1  ;;  %v4747_v10 = vpop.f32.mrb[53].mxu0 }
 0xac7   :  { %v2674_v33 = vpop.f32.mrb[54].mxu1  ;;  %v2716_v23 = vpop.f32.mrb[54].mxu0  ;;  %v4964_v37 = vadd.f32 %v6704_v25, %v2672_v56  ;;  %v2714_v56 = vadd.f32 %v2713_v50, %v6711_v52 }
 0xac8   :  { %v4202_v32 = vmul.f32 -1.442695, %v4962_v9  ;;  %v4966_v49 = vadd.f32 %v6702_v63, %v2674_v33  ;;  %v2676_v45 = vpop.f32.mrb[55].mxu1  ;;  %v4748_v2 = vpop.f32.mrb[55].mxu0 }
 0xac9   :  { %v4968_v36 = vadd.f32 %v6704_v25, %v2676_v45  ;;  %v4204_v51 = vmul.f32 -1.442695, %v4964_v37  ;;  %v2717_v2 = vadd.f32 %v2716_v23, %v6711_v52 }
 0xaca   :  { %5458 = vpow2.f32 %v4202_v32  ;;  %v4203_v39 = vmul.f32 -1.442695, %v4966_v49  ;;  %v2222_v49 = vadd.f32 %v6617_v43, %v6714_v46 }
 0xacb   :  { %v4205_v15 = vmul.f32 -1.442695, %v4968_v36 }
 0xacc   :  { %5460 = vpow2.f32 %v4203_v39  ;;  %v2225_v39 = vadd.f32 %v6622_v22, %v6714_v46 }
 0xacd   :  { %5462 = vpow2.f32 %v4204_v51 }
 0xace   :  { %5464 = vpow2.f32 %v4205_v15 }
 0xad4   :  { %v5459_v1 = vpop.eup %5458 }
 0xad5   :  { %v2734_v47 = vadd.f32 1.0, %v5459_v1 }
 0xad6   :  { %v5461_v6 = vpop.eup %5460 }
 0xad7   :  { %5466 = vrcp.f32 %v2734_v47  ;;  %v2735_v29 = vadd.f32 1.0, %v5461_v6  ;;  %v5463_v8 = vpop.eup %5462 }
 0xad8   :  { %v5465_v9 = vpop.eup %5464  ;;  %v2748_v10 = vadd.f32 1.0, %v5463_v8 }
 0xad9   :  { %5468 = vrcp.f32 %v2735_v29  ;;  %v2749_v33 = vadd.f32 1.0, %v5465_v9 }
 0xada   :  { %5470 = vrcp.f32 %v2748_v10 }
 0xadb   :  { %5472 = vrcp.f32 %v2749_v33 }
 0xae1   :  { %v5467_v32 = vpop.eup %5466 }
 0xae2   :  { %v2754_v45 = vmul.f32 %v5467_v32, %v2714_v56 }
 0xae3   :  { %v5469_v37 = vpop.eup %5468 }
 0xae4   :  { %v2756_v36 = vadd.f32 %v2754_v45, %v2222_v49  ;;  %v2755_v51 = vmul.f32 %v5469_v37, %v2717_v2  ;;  %v5471_v50 = vpop.eup %5470 }
 0xae5   :  { %v5473_v1 = vpop.eup %5472  ;;  %v2760_v47 = vsub.f32 1.0, %v5471_v50  ;;  %v2764_v8 = vmul.f32 %v5471_v50, %v6722_v61 }
 0xae6   :  { %5474 = vtanh.f32 %v2756_v36  ;;  %v2757_v15 = vadd.f32 %v2755_v51, %v2225_v39  ;;  %v2761_v29 = vsub.f32 1.0, %v5473_v1  ;;  %v2765_v10 = vmul.f32 %v5473_v1, %v6724_v44 }
 0xae8   :  { %5476 = vtanh.f32 %v2757_v15 }
 0xaf0   :  { %v5475_v6 = vpop.eup %5474 }
 0xaf1   :  { %v2762_v43 = vmul.f32 %v5475_v6, %v2760_v47 }
 0xaf2   :  { %v5477_v9 = vpop.eup %5476 }
 0xaf3   :  { %v2763_v23 = vmul.f32 %v5477_v9, %v2761_v29  ;;  %v6775_v56 = vadd.f32 %v2764_v8, %v2762_v43 }
 0xaf5   :  { %v6777_v22 = vadd.f32 %v2765_v10, %v2763_v23 }
 0xaf7   :  { %v2768_v33 = vpack.c.bf16 %v6777_v22, %v6775_v56 }
 0xaf9   :  { %2802 = vmatmul.mubr.bf16.vlgmr.msra.gmra.mrb[56].mxu1 %v2768_v33  ;;  %4766 = vmatmul.mubr.bf16.vlgmr.msra.gmra.mrb[56].mxu0 %v2768_v33 }
 0xafa   :  { %2903 = vmatpush1.bf16.msra.mxu1 %v6511_v28  ;;  %4770 = vmatpush3.bf16.msra.mxu0 %v6570_v0 }
 0xafb   :  { %2904 = vmatprep.subr.bf16.mxu1 %v6535_v62  ;;  %4771 = vmatprep.subr.bf16.mxu0 %v7183_v60 }
 0xafc   :  { %2934 = vmatprep.mubr.bf16.mxu1 %v7184_v5  ;;  %4785 = vmatprep.mubr.msk.bf16.mxu0 %vm5764_vm0, %v7183_v60 }
 0xafe   :  { %2905 = vmatpush1.bf16.msra.mxu1 %v6537_v4  ;;  %4772 = vmatpush3.bf16.msra.mxu0 %v6575_v48 }
 0xaff   :  { %2906 = vmatprep.subr.bf16.mxu1 %v6541_v13  ;;  %4773 = vmatprep.subr.bf16.mxu0 %v7183_v60 }
 0xb02   :  { %2907 = vmatpush1.bf16.msra.mxu1 %v6543_v11  ;;  %4774 = vmatpush3.bf16.msra.mxu0 %v6585_v31 }
 0xb03   :  { %2908 = vmatprep.subr.bf16.mxu1 %v6545_v21  ;;  %4775 = vmatprep.subr.bf16.mxu0 %v7183_v60 }
 0xb06   :  { %2909 = vmatpush1.bf16.msra.mxu1 %v6549_v19  ;;  %4776 = vmatpush3.bf16.msra.mxu0 %v6589_v55 }
 0xb07   :  { %2910 = vmatprep.subr.bf16.mxu1 %v6552_v30  ;;  %4777 = vmatprep.subr.bf16.mxu0 %v7183_v60 }
 0xb0a   :  { %2911 = vmatpush1.bf16.msra.mxu1 %v6555_v58  ;;  %4778 = vmatpush3.bf16.msra.mxu0 %v6593_v26 }
 0xb0b   :  { %2912 = vmatprep.subr.bf16.mxu1 %v6558_v17  ;;  %4779 = vmatprep.subr.bf16.mxu0 %v7183_v60 }
 0xb0e   :  { %2913 = vmatpush1.bf16.msra.mxu1 %v6561_v53  ;;  %4780 = vmatpush3.bf16.msra.mxu0 %v6597_v38 }
 0xb0f   :  { %2914 = vmatprep.subr.bf16.mxu1 %v6564_v7  ;;  %4781 = vmatprep.subr.bf16.mxu0 %v7183_v60 }
 0xb12   :  { %2915 = vmatpush1.bf16.msra.mxu1 %v6567_v54  ;;  %4782 = vmatpush3.bf16.msra.mxu0 %v6601_v41 }
 0xb13   :  { %2916 = vmatprep.subr.bf16.mxu1 %v6572_v40  ;;  %4783 = vmatprep.subr.bf16.mxu0 %v7183_v60 }
 0xb16   :  { %2917 = vmatpush1.bf16.msra.mxu1 %v6578_v42  ;;  %4784 = vmatpush3.bf16.msra.mxu0 %v6605_v35 }
 0xb17   :  { %3035 = vmatprep.subr.bf16.mxu1 %v6508_v24  ;;  %4789 = vmatprep.subr.bf16.mxu0 %v7183_v60 }
 0xbcc   :  { %v2803_v44 = vpop.f32.mrb[56].mxu1  ;;  %v2846_v61 = vpop.f32.mrb[56].mxu0 }
 0xbcd   :  { %v4970_v32 = vadd.f32 %v6702_v63, %v2803_v44  ;;  %v2805_v49 = vpop.f32.mrb[57].mxu1  ;;  %v4767_v45 = vpop.f32.mrb[57].mxu0 }
 0xbce   :  { %v2807_v2 = vpop.f32.mrb[58].mxu1  ;;  %v2849_v37 = vpop.f32.mrb[58].mxu0  ;;  %v4972_v50 = vadd.f32 %v6704_v25, %v2805_v49 }
 0xbcf   :  { %v4206_v39 = vmul.f32 -1.442695, %v4970_v32  ;;  %v4974_v36 = vadd.f32 %v6702_v63, %v2807_v2  ;;  %v2809_v51 = vpop.f32.mrb[59].mxu1  ;;  %v4768_v15 = vpop.f32.mrb[59].mxu0  ;;  %v2847_v32 = vadd.f32 %v2846_v61, %v6711_v52  ;;  %v2230_v2 = vadd.f32 %v6628_v3, %v6714_v46 }
 0xbd0   :  { %v4976_v47 = vadd.f32 %v6704_v25, %v2809_v51  ;;  %v4208_v6 = vmul.f32 -1.442695, %v4972_v50  ;;  %v2233_v15 = vadd.f32 %v6632_v59, %v6714_v46 }
 0xbd1   :  { %5478 = vpow2.f32 %v4206_v39  ;;  %v4207_v1 = vmul.f32 -1.442695, %v4974_v36  ;;  %v2850_v36 = vadd.f32 %v2849_v37, %v6711_v52 }
 0xbd2   :  { %v4209_v29 = vmul.f32 -1.442695, %v4976_v47 }
 0xbd3   :  { %5480 = vpow2.f32 %v4207_v1 }
 0xbd4   :  { %5482 = vpow2.f32 %v4208_v6 }
 0xbd5   :  { %5484 = vpow2.f32 %v4209_v29 }
 0xbdb   :  { %v5479_v43 = vpop.eup %5478 }
 0xbdc   :  { %v2867_v8 = vadd.f32 1.0, %v5479_v43 }
 0xbdd   :  { %v5481_v9 = vpop.eup %5480 }
 0xbde   :  { %5486 = vrcp.f32 %v2867_v8  ;;  %v2868_v23 = vadd.f32 1.0, %v5481_v9  ;;  %v5483_v10 = vpop.eup %5482 }
 0xbdf   :  { %v5485_v33 = vpop.eup %5484  ;;  %v2881_v44 = vadd.f32 1.0, %v5483_v10 }
 0xbe0   :  { %5488 = vrcp.f32 %v2868_v23  ;;  %v2882_v49 = vadd.f32 1.0, %v5485_v33 }
 0xbe1   :  { %5490 = vrcp.f32 %v2881_v44 }
 0xbe2   :  { %5492 = vrcp.f32 %v2882_v49 }
 0xbe8   :  { %v5487_v45 = vpop.eup %5486 }
 0xbe9   :  { %v2887_v39 = vmul.f32 %v5487_v45, %v2847_v32 }
 0xbea   :  { %v5489_v51 = vpop.eup %5488 }
 0xbeb   :  { %v2889_v50 = vadd.f32 %v2887_v39, %v2230_v2  ;;  %v2888_v1 = vmul.f32 %v5489_v51, %v2850_v36  ;;  %v5491_v61 = vpop.eup %5490 }
 0xbec   :  { %v5493_v6 = vpop.eup %5492  ;;  %v2893_v29 = vsub.f32 1.0, %v5491_v61  ;;  %v2897_v9 = vmul.f32 %v5491_v61, %v6775_v56 }
 0xbed   :  { %5494 = vtanh.f32 %v2889_v50  ;;  %v2890_v47 = vadd.f32 %v2888_v1, %v2233_v15  ;;  %v2894_v8 = vsub.f32 1.0, %v5493_v6  ;;  %v2898_v10 = vmul.f32 %v5493_v6, %v6777_v22 }
 0xbee   :  { %v2238_v50 = vadd.f32 %v6626_v57, %v6714_v46  ;;  %v2241_v6 = vadd.f32 %v6630_v27, %v6714_v46 }
 0xbef   :  { %5496 = vtanh.f32 %v2890_v47 }
 0xbf7   :  { %v5495_v43 = vpop.eup %5494 }
 0xbf8   :  { %v2895_v3 = vmul.f32 %v5495_v43, %v2893_v29 }
 0xbf9   :  { %v5497_v23 = vpop.eup %5496 }
 0xbfa   :  { %v2896_v37 = vmul.f32 %v5497_v23, %v2894_v8  ;;  %v6828_v33 = vadd.f32 %v2897_v9, %v2895_v3 }
 0xbfc   :  { %v6830_v59 = vadd.f32 %v2898_v10, %v2896_v37 }
 0xbfe   :  { %v2901_v44 = vpack.c.bf16 %v6830_v59, %v6828_v33 }
 0xc00   :  { %2935 = vmatmul.mubr.bf16.vlgmr.msra.gmra.mrb[60].mxu1 %v2901_v44  ;;  %4786 = vmatmul.mubr.bf16.vlgmr.msra.gmra.mrb[60].mxu0 %v2901_v44 }
 0xc01   :  { %3036 = vmatpush1.bf16.msra.mxu1 %v6511_v28  ;;  %4790 = vmatpush3.bf16.msra.mxu0 %v6570_v0 }
 0xc02   :  { %3037 = vmatprep.subr.bf16.mxu1 %v6535_v62  ;;  %4791 = vmatprep.subr.bf16.mxu0 %v7183_v60 }
 0xc03   :  { %3067 = vmatprep.mubr.bf16.mxu1 %v7184_v5  ;;  %4805 = vmatprep.mubr.msk.bf16.mxu0 %vm5764_vm0, %v7183_v60 }
 0xc05   :  { %3038 = vmatpush1.bf16.msra.mxu1 %v6537_v4  ;;  %4792 = vmatpush3.bf16.msra.mxu0 %v6575_v48 }
 0xc06   :  { %3039 = vmatprep.subr.bf16.mxu1 %v6541_v13  ;;  %4793 = vmatprep.subr.bf16.mxu0 %v7183_v60 }
 0xc09   :  { %3040 = vmatpush1.bf16.msra.mxu1 %v6543_v11  ;;  %4794 = vmatpush3.bf16.msra.mxu0 %v6585_v31 }
 0xc0a   :  { %3041 = vmatprep.subr.bf16.mxu1 %v6545_v21  ;;  %4795 = vmatprep.subr.bf16.mxu0 %v7183_v60 }
 0xc0d   :  { %3042 = vmatpush1.bf16.msra.mxu1 %v6549_v19  ;;  %4796 = vmatpush3.bf16.msra.mxu0 %v6589_v55 }
 0xc0e   :  { %3043 = vmatprep.subr.bf16.mxu1 %v6552_v30  ;;  %4797 = vmatprep.subr.bf16.mxu0 %v7183_v60 }
 0xc11   :  { %3044 = vmatpush1.bf16.msra.mxu1 %v6555_v58  ;;  %4798 = vmatpush3.bf16.msra.mxu0 %v6593_v26 }
 0xc12   :  { %3045 = vmatprep.subr.bf16.mxu1 %v6558_v17  ;;  %4799 = vmatprep.subr.bf16.mxu0 %v7183_v60 }
 0xc15   :  { %3046 = vmatpush1.bf16.msra.mxu1 %v6561_v53  ;;  %4800 = vmatpush3.bf16.msra.mxu0 %v6597_v38 }
 0xc16   :  { %3047 = vmatprep.subr.bf16.mxu1 %v6564_v7  ;;  %4801 = vmatprep.subr.bf16.mxu0 %v7183_v60 }
 0xc19   :  { %3048 = vmatpush1.bf16.msra.mxu1 %v6567_v54  ;;  %4802 = vmatpush3.bf16.msra.mxu0 %v6601_v41 }
 0xc1a   :  { %3049 = vmatprep.subr.bf16.mxu1 %v6572_v40  ;;  %4803 = vmatprep.subr.bf16.mxu0 %v7183_v60 }
 0xc1d   :  { %3050 = vmatpush1.bf16.msra.mxu1 %v6578_v42  ;;  %4804 = vmatpush3.bf16.msra.mxu0 %v6605_v35 }
 0xc1e   :  { %3168 = vmatprep.subr.bf16.mxu1 %v6508_v24  ;;  %4809 = vmatprep.subr.bf16.mxu0 %v7183_v60 }
 0xcd3   :  { %v2936_v28 = vpop.f32.mrb[60].mxu1  ;;  %v2979_v62 = vpop.f32.mrb[60].mxu0 }
 0xcd4   :  { %v4978_v4 = vadd.f32 %v6702_v63, %v2936_v28  ;;  %v2938_v13 = vpop.f32.mrb[61].mxu1  ;;  %v4787_v11 = vpop.f32.mrb[61].mxu0  ;;  %v2980_v36 = vadd.f32 %v2979_v62, %v6711_v52 }
 0xcd5   :  { %v2940_v21 = vpop.f32.mrb[62].mxu1  ;;  %v2982_v19 = vpop.f32.mrb[62].mxu0  ;;  %v4980_v7 = vadd.f32 %v6704_v25, %v2938_v13 }
 0xcd6   :  { %v4210_v30 = vmul.f32 -1.442695, %v4978_v4  ;;  %v4982_v58 = vadd.f32 %v6702_v63, %v2940_v21  ;;  %v2942_v17 = vpop.f32.mrb[63].mxu1  ;;  %v4788_v53 = vpop.f32.mrb[63].mxu0  ;;  %v2983_v47 = vadd.f32 %v2982_v19, %v6711_v52  ;;  %v6887_v21 = vld [vmem:[#allocation6 + $0xc0] ss:$12 sps:$4 sm:$0xff]  }
 0xcd7   :  { %v4984_v24 = vadd.f32 %v6704_v25, %v2942_v17  ;;  %v4212_v40 = vmul.f32 -1.442695, %v4980_v7  ;;  %v6902_v19 = vld [vmem:[#allocation6 + $0xf4] ss:$12 sps:$4 sm:$0xff]   ;;  %v6930_v53 = vld [vmem:[#allocation6 + $0x138] ss:$12 sps:$4 sm:$0xff]  }
 0xcd8   :  { %5498 = vpow2.f32 %v4210_v30  ;;  %v4211_v54 = vmul.f32 -1.442695, %v4982_v58  ;;  %v6910_v30 = vld [vmem:[#allocation6 + $0x10c] ss:$12 sps:$4 sm:$0xff]   ;;  %v6914_v58 = vld [vmem:[#allocation6 + $0x108] ss:$12 sps:$4 sm:$0xff]  }
 0xcd9   :  { %v4213_v42 = vmul.f32 -1.442695, %v4984_v24  ;;  %v6922_v17 = vld [vmem:[#allocation6 + $0x120] ss:$12 sps:$4 sm:$0xff]   ;;  %v6938_v7 = vld [vmem:[#allocation6 + $0x150] ss:$12 sps:$4 sm:$0xff]  }
 0xcda   :  { %5500 = vpow2.f32 %v4211_v54  ;;  %v6946_v54 = vld [vmem:[#allocation6 + $0x168] ss:$12 sps:$4 sm:$0xff]  }
 0xcdb   :  { %5502 = vpow2.f32 %v4212_v40 }
 0xcdc   :  { %5504 = vpow2.f32 %v4213_v42 }
 0xce2   :  { %v5499_v56 = vpop.eup %5498 }
 0xce3   :  { %v3000_v22 = vadd.f32 1.0, %v5499_v56 }
 0xce4   :  { %v5501_v32 = vpop.eup %5500 }
 0xce5   :  { %5506 = vrcp.f32 %v3000_v22  ;;  %v3001_v49 = vadd.f32 1.0, %v5501_v32  ;;  %v5503_v45 = vpop.eup %5502 }
 0xce6   :  { %v5505_v2 = vpop.eup %5504  ;;  %v3014_v39 = vadd.f32 1.0, %v5503_v45 }
 0xce7   :  { %5508 = vrcp.f32 %v3001_v49  ;;  %v3015_v51 = vadd.f32 1.0, %v5505_v2 }
 0xce8   :  { %5510 = vrcp.f32 %v3014_v39 }
 0xce9   :  { %5512 = vrcp.f32 %v3015_v51 }
 0xcef   :  { %v5507_v15 = vpop.eup %5506 }
 0xcf0   :  { %v3020_v1 = vmul.f32 %v5507_v15, %v2980_v36 }
 0xcf1   :  { %v5509_v61 = vpop.eup %5508 }
 0xcf2   :  { %v3022_v29 = vadd.f32 %v3020_v1, %v2238_v50  ;;  %v3021_v43 = vmul.f32 %v5509_v61, %v2983_v47  ;;  %v5511_v3 = vpop.eup %5510 }
 0xcf3   :  { %v5513_v9 = vpop.eup %5512  ;;  %v3026_v23 = vsub.f32 1.0, %v5511_v3  ;;  %v3030_v44 = vmul.f32 %v5511_v3, %v6828_v33  ;;  %v6891_v33 = vld [vmem:[#allocation6 + $0xdc] ss:$12 sps:$4 sm:$0xff]  }
 0xcf4   :  { %5514 = vtanh.f32 %v3022_v29  ;;  %v3023_v8 = vadd.f32 %v3021_v43, %v2241_v6  ;;  %v3027_v10 = vsub.f32 1.0, %v5513_v9  ;;  %v3031_v4 = vmul.f32 %v5513_v9, %v6830_v59  ;;  %v6898_v59 = vld [vmem:[#allocation6 + $0xd8] ss:$12 sps:$4 sm:$0xff]  }
 0xcf6   :  { %5516 = vtanh.f32 %v3023_v8 }
 0xcfe   :  { %v5515_v37 = vpop.eup %5514 }
 0xcff   :  { %v3028_v57 = vmul.f32 %v5515_v37, %v3026_v23  ;;  %v2246_v37 = vadd.f32 %v6638_v14, %v6714_v46 }
 0xd00   :  { %v5517_v28 = vpop.eup %5516 }
 0xd01   :  { %v3029_v62 = vmul.f32 %v5517_v28, %v3027_v10  ;;  %v6881_v13 = vadd.f32 %v3030_v44, %v3028_v57  ;;  %v2249_v28 = vadd.f32 %v6642_v16, %v6714_v46 }
 0xd03   :  { %v6883_v27 = vadd.f32 %v3031_v4, %v3029_v62 }
 0xd05   :  { %v3034_v11 = vpack.c.bf16 %v6883_v27, %v6881_v13 }
 0xd07   :  { %3068 = vmatmul.mubr.bf16.vlgmr.msra.gmra.mrb[64].mxu1 %v3034_v11  ;;  %4806 = vmatmul.mubr.bf16.vlgmr.msra.gmra.mrb[64].mxu0 %v3034_v11 }
 0xd08   :  { %3169 = vmatpush1.bf16.msra.mxu1 %v6887_v21  ;;  %4810 = vmatpush3.bf16.msra.mxu0 %v6570_v0  ;;  %v6906_v0 = vld [vmem:[#allocation6 + $0xf0] ss:$12 sps:$4 sm:$0xff]  }
 0xd09   :  { %3170 = vmatprep.subr.bf16.mxu1 %v6891_v33  ;;  %4811 = vmatprep.subr.bf16.mxu0 %v7183_v60 }
 0xd0a   :  { %3200 = vmatprep.mubr.bf16.mxu1 %v7184_v5  ;;  %4825 = vmatprep.mubr.msk.bf16.mxu0 %vm5764_vm0, %v7183_v60 }
 0xd0c   :  { %3171 = vmatpush1.bf16.msra.mxu1 %v6898_v59  ;;  %4812 = vmatpush3.bf16.msra.mxu0 %v6575_v48  ;;  %v6918_v48 = vld [vmem:[#allocation6 + $0x124] ss:$12 sps:$4 sm:$0xff]  }
 0xd0d   :  { %3172 = vmatprep.subr.bf16.mxu1 %v6902_v19  ;;  %4813 = vmatprep.subr.bf16.mxu0 %v7183_v60 }
 0xd10   :  { %3173 = vmatpush1.bf16.msra.mxu1 %v6906_v0  ;;  %4814 = vmatpush3.bf16.msra.mxu0 %v6585_v31  ;;  %v6926_v31 = vld [vmem:[#allocation6 + $0x13c] ss:$12 sps:$4 sm:$0xff]  }
 0xd11   :  { %3174 = vmatprep.subr.bf16.mxu1 %v6910_v30  ;;  %4815 = vmatprep.subr.bf16.mxu0 %v7183_v60 }
 0xd14   :  { %3175 = vmatpush1.bf16.msra.mxu1 %v6914_v58  ;;  %4816 = vmatpush3.bf16.msra.mxu0 %v6589_v55  ;;  %v6934_v55 = vld [vmem:[#allocation6 + $0x154] ss:$12 sps:$4 sm:$0xff]  }
 0xd15   :  { %3176 = vmatprep.subr.bf16.mxu1 %v6918_v48  ;;  %4817 = vmatprep.subr.bf16.mxu0 %v7183_v60 }
 0xd18   :  { %3177 = vmatpush1.bf16.msra.mxu1 %v6922_v17  ;;  %4818 = vmatpush3.bf16.msra.mxu0 %v6593_v26  ;;  %v6942_v26 = vld [vmem:[#allocation6 + $0x16c] ss:$12 sps:$4 sm:$0xff]  }
 0xd19   :  { %3178 = vmatprep.subr.bf16.mxu1 %v6926_v31  ;;  %4819 = vmatprep.subr.bf16.mxu0 %v7183_v60 }
 0xd1c   :  { %3179 = vmatpush1.bf16.msra.mxu1 %v6930_v53  ;;  %4820 = vmatpush3.bf16.msra.mxu0 %v6597_v38  ;;  %v6950_v38 = vld [vmem:[#allocation6 + $0xc4] ss:$12 sps:$4 sm:$0xff]  }
 0xd1d   :  { %3180 = vmatprep.subr.bf16.mxu1 %v6934_v55  ;;  %4821 = vmatprep.subr.bf16.mxu0 %v7183_v60 }
 0xd20   :  { %3181 = vmatpush1.bf16.msra.mxu1 %v6938_v7  ;;  %4822 = vmatpush3.bf16.msra.mxu0 %v6601_v41 }
 0xd21   :  { %3182 = vmatprep.subr.bf16.mxu1 %v6942_v26  ;;  %4823 = vmatprep.subr.bf16.mxu0 %v7183_v60 }
 0xd24   :  { %3183 = vmatpush1.bf16.msra.mxu1 %v6946_v54  ;;  %4824 = vmatpush3.bf16.msra.mxu0 %v6605_v35 }
 0xd25   :  { %3301 = vmatprep.subr.bf16.mxu1 %v6950_v38  ;;  %4829 = vmatprep.subr.bf16.mxu0 %v7183_v60 }
 0xdda   :  { %v3069_v24 = vpop.f32.mrb[64].mxu1  ;;  %v3112_v41 = vpop.f32.mrb[64].mxu0 }
 0xddb   :  { %v4986_v40 = vadd.f32 %v6702_v63, %v3069_v24  ;;  %v3071_v42 = vpop.f32.mrb[65].mxu1  ;;  %v4807_v56 = vpop.f32.mrb[65].mxu0  ;;  %v3113_v3 = vadd.f32 %v3112_v41, %v6711_v52 }
 0xddc   :  { %v3073_v22 = vpop.f32.mrb[66].mxu1  ;;  %v3115_v32 = vpop.f32.mrb[66].mxu0  ;;  %v4988_v35 = vadd.f32 %v6704_v25, %v3071_v42 }
 0xddd   :  { %v4214_v49 = vmul.f32 -1.442695, %v4986_v40  ;;  %v4990_v45 = vadd.f32 %v6702_v63, %v3073_v22  ;;  %v3075_v2 = vpop.f32.mrb[67].mxu1  ;;  %v4808_v39 = vpop.f32.mrb[67].mxu0  ;;  %v3116_v57 = vadd.f32 %v3115_v32, %v6711_v52 }
 0xdde   :  { %v4992_v51 = vadd.f32 %v6704_v25, %v3075_v2  ;;  %v4216_v15 = vmul.f32 -1.442695, %v4988_v35  ;;  %v6973_v35 = vld [vmem:[#allocation6 + $0xc8] ss:$12 sps:$4 sm:$0xff]  }
 0xddf   :  { %5518 = vpow2.f32 %v4214_v49  ;;  %v4215_v36 = vmul.f32 -1.442695, %v4990_v45 }
 0xde0   :  { %v4217_v50 = vmul.f32 -1.442695, %v4992_v51  ;;  %v7000_v51 = vld [vmem:[#allocation6 + $0x128] ss:$12 sps:$4 sm:$0xff]  }
 0xde1   :  { %5520 = vpow2.f32 %v4215_v36  ;;  %v6994_v36 = vld [vmem:[#allocation6 + $0x110] ss:$12 sps:$4 sm:$0xff]  }
 0xde2   :  { %5522 = vpow2.f32 %v4216_v15  ;;  %v7006_v15 = vld [vmem:[#allocation6 + $0x140] ss:$12 sps:$4 sm:$0xff]  }
 0xde3   :  { %5524 = vpow2.f32 %v4217_v50  ;;  %v7012_v50 = vld [vmem:[#allocation6 + $0x158] ss:$12 sps:$4 sm:$0xff]  }
 0xde9   :  { %v5519_v1 = vpop.eup %5518 }
 0xdea   :  { %v3133_v47 = vadd.f32 1.0, %v5519_v1  ;;  %v7018_v1 = vld [vmem:[#allocation6 + $0x170] ss:$12 sps:$4 sm:$0xff]  }
 0xdeb   :  { %v5521_v61 = vpop.eup %5520 }
 0xdec   :  { %5526 = vrcp.f32 %v3133_v47  ;;  %v3134_v6 = vadd.f32 1.0, %v5521_v61  ;;  %v5523_v29 = vpop.eup %5522 }
 0xded   :  { %v5525_v43 = vpop.eup %5524  ;;  %v3147_v8 = vadd.f32 1.0, %v5523_v29 }
 0xdee   :  { %5528 = vrcp.f32 %v3134_v6  ;;  %v3148_v9 = vadd.f32 1.0, %v5525_v43 }
 0xdef   :  { %5530 = vrcp.f32 %v3147_v8 }
 0xdf0   :  { %5532 = vrcp.f32 %v3148_v9 }
 0xdf6   :  { %v5527_v23 = vpop.eup %5526 }
 0xdf7   :  { %v3153_v10 = vmul.f32 %v5527_v23, %v3113_v3 }
 0xdf8   :  { %v5529_v44 = vpop.eup %5528 }
 0xdf9   :  { %v3155_v62 = vadd.f32 %v3153_v10, %v2246_v37  ;;  %v3154_v4 = vmul.f32 %v5529_v44, %v3116_v57  ;;  %v5531_v24 = vpop.eup %5530 }
 0xdfa   :  { %v5533_v41 = vpop.eup %5532  ;;  %v3159_v40 = vsub.f32 1.0, %v5531_v24  ;;  %v3163_v22 = vmul.f32 %v5531_v24, %v6881_v13  ;;  %v6982_v13 = vld [vmem:[#allocation6 + $0xe0] ss:$12 sps:$4 sm:$0xff]  }
 0xdfb   :  { %5534 = vtanh.f32 %v3155_v62  ;;  %v3156_v11 = vadd.f32 %v3154_v4, %v2249_v28  ;;  %v3160_v56 = vsub.f32 1.0, %v5533_v41  ;;  %v3164_v45 = vmul.f32 %v5533_v41, %v6883_v27  ;;  %v6988_v27 = vld [vmem:[#allocation6 + $0xf8] ss:$12 sps:$4 sm:$0xff]  }
 0xdfd   :  { %5536 = vtanh.f32 %v3156_v11 }
 0xe05   :  { %v5535_v42 = vpop.eup %5534 }
 0xe06   :  { %v3161_v14 = vmul.f32 %v5535_v42, %v3159_v40 }
 0xe07   :  { %v5537_v49 = vpop.eup %5536 }
 0xe08   :  { %v3162_v32 = vmul.f32 %v5537_v49, %v3160_v56  ;;  %v6966_v2 = vadd.f32 %v3163_v22, %v3161_v14 }
 0xe0a   :  { %v6968_v16 = vadd.f32 %v3164_v45, %v3162_v32  ;;  %v2254_v32 = vadd.f32 %v6636_v12, %v6714_v46 }
 0xe0c   :  { %v3167_v39 = vpack.c.bf16 %v6968_v16, %v6966_v2 }
 0xe0e   :  { %3201 = vmatmul.mubr.bf16.vlgmr.msra.gmra.mrb[68].mxu1 %v3167_v39  ;;  %4826 = vmatmul.mubr.bf16.vlgmr.msra.gmra.mrb[68].mxu0 %v3167_v39 }
 0xe0f   :  { %3302 = vmatpush1.bf16.msra.mxu1 %v6887_v21  ;;  %4830 = vmatpush3.bf16.msra.mxu0 %v6973_v35 }
 0xe10   :  { %3303 = vmatprep.subr.bf16.mxu1 %v6891_v33  ;;  %4831 = vmatprep.subr.bf16.mxu0 %v7183_v60 }
 0xe11   :  { %3333 = vmatprep.mubr.bf16.mxu1 %v7184_v5  ;;  %4845 = vmatprep.mubr.msk.bf16.mxu0 %vm5764_vm0, %v7183_v60 }
 0xe13   :  { %3304 = vmatpush1.bf16.msra.mxu1 %v6898_v59  ;;  %4832 = vmatpush3.bf16.msra.mxu0 %v6982_v13 }
 0xe14   :  { %3305 = vmatprep.subr.bf16.mxu1 %v6902_v19  ;;  %4833 = vmatprep.subr.bf16.mxu0 %v7183_v60 }
 0xe17   :  { %3306 = vmatpush1.bf16.msra.mxu1 %v6906_v0  ;;  %4834 = vmatpush3.bf16.msra.mxu0 %v6988_v27 }
 0xe18   :  { %3307 = vmatprep.subr.bf16.mxu1 %v6910_v30  ;;  %4835 = vmatprep.subr.bf16.mxu0 %v7183_v60 }
 0xe1b   :  { %3308 = vmatpush1.bf16.msra.mxu1 %v6914_v58  ;;  %4836 = vmatpush3.bf16.msra.mxu0 %v6994_v36 }
 0xe1c   :  { %3309 = vmatprep.subr.bf16.mxu1 %v6918_v48  ;;  %4837 = vmatprep.subr.bf16.mxu0 %v7183_v60 }
 0xe1f   :  { %3310 = vmatpush1.bf16.msra.mxu1 %v6922_v17  ;;  %4838 = vmatpush3.bf16.msra.mxu0 %v7000_v51 }
 0xe20   :  { %3311 = vmatprep.subr.bf16.mxu1 %v6926_v31  ;;  %4839 = vmatprep.subr.bf16.mxu0 %v7183_v60 }
 0xe23   :  { %3312 = vmatpush1.bf16.msra.mxu1 %v6930_v53  ;;  %4840 = vmatpush3.bf16.msra.mxu0 %v7006_v15 }
 0xe24   :  { %3313 = vmatprep.subr.bf16.mxu1 %v6934_v55  ;;  %4841 = vmatprep.subr.bf16.mxu0 %v7183_v60 }
 0xe27   :  { %3314 = vmatpush1.bf16.msra.mxu1 %v6938_v7  ;;  %4842 = vmatpush3.bf16.msra.mxu0 %v7012_v50 }
 0xe28   :  { %3315 = vmatprep.subr.bf16.mxu1 %v6942_v26  ;;  %4843 = vmatprep.subr.bf16.mxu0 %v7183_v60 }
 0xe2b   :  { %3316 = vmatpush1.bf16.msra.mxu1 %v6946_v54  ;;  %4844 = vmatpush3.bf16.msra.mxu0 %v7018_v1 }
 0xe2c   :  { %3434 = vmatprep.subr.bf16.mxu1 %v6950_v38  ;;  %4849 = vmatprep.subr.bf16.mxu0 %v7183_v60 }
 0xee1   :  { %v3202_v47 = vpop.f32.mrb[68].mxu1  ;;  %v3245_v61 = vpop.f32.mrb[68].mxu0 }
 0xee2   :  { %v4994_v6 = vadd.f32 %v6702_v63, %v3202_v47  ;;  %v3204_v29 = vpop.f32.mrb[69].mxu1  ;;  %v4827_v43 = vpop.f32.mrb[69].mxu0  ;;  %v3246_v14 = vadd.f32 %v3245_v61, %v6711_v52 }
 0xee3   :  { %v3206_v8 = vpop.f32.mrb[70].mxu1  ;;  %v3248_v3 = vpop.f32.mrb[70].mxu0  ;;  %v4996_v57 = vadd.f32 %v6704_v25, %v3204_v29 }
 0xee4   :  { %v4218_v9 = vmul.f32 -1.442695, %v4994_v6  ;;  %v4998_v23 = vadd.f32 %v6702_v63, %v3206_v8  ;;  %v3208_v37 = vpop.f32.mrb[71].mxu1  ;;  %v4828_v10 = vpop.f32.mrb[71].mxu0  ;;  %v3249_v39 = vadd.f32 %v3248_v3, %v6711_v52  ;;  %v2257_v6 = vadd.f32 %v6640_v18, %v6714_v46 }
 0xee5   :  { %v5000_v38 = vadd.f32 %v6704_v25, %v3208_v37  ;;  %v4220_v28 = vmul.f32 -1.442695, %v4996_v57 }
 0xee6   :  { %5538 = vpow2.f32 %v4218_v9  ;;  %v4219_v44 = vmul.f32 -1.442695, %v4998_v23 }
 0xee7   :  { %v4221_v62 = vmul.f32 -1.442695, %v5000_v38 }
 0xee8   :  { %5540 = vpow2.f32 %v4219_v44 }
 0xee9   :  { %5542 = vpow2.f32 %v4220_v28 }
 0xeea   :  { %5544 = vpow2.f32 %v4221_v62 }
 0xef0   :  { %v5539_v4 = vpop.eup %5538 }
 0xef1   :  { %v3266_v11 = vadd.f32 1.0, %v5539_v4 }
 0xef2   :  { %v5541_v24 = vpop.eup %5540 }
 0xef3   :  { %5546 = vrcp.f32 %v3266_v11  ;;  %v3267_v41 = vadd.f32 1.0, %v5541_v24  ;;  %v5543_v40 = vpop.eup %5542  ;;  %v2262_v11 = vadd.f32 %v6693_v34, %v6714_v46 }
 0xef4   :  { %v5545_v42 = vpop.eup %5544  ;;  %v3280_v56 = vadd.f32 1.0, %v5543_v40 }
 0xef5   :  { %5548 = vrcp.f32 %v3267_v41  ;;  %v3281_v22 = vadd.f32 1.0, %v5545_v42  ;;  %v2265_v42 = vadd.f32 %v6698_v20, %v6714_v46 }
 0xef6   :  { %5550 = vrcp.f32 %v3280_v56 }
 0xef7   :  { %5552 = vrcp.f32 %v3281_v22 }
 0xefd   :  { %v5547_v49 = vpop.eup %5546 }
 0xefe   :  { %v3286_v45 = vmul.f32 %v5547_v49, %v3246_v14 }
 0xeff   :  { %v5549_v47 = vpop.eup %5548 }
 0xf00   :  { %v3288_v29 = vadd.f32 %v3286_v45, %v2254_v32  ;;  %v3287_v43 = vmul.f32 %v5549_v47, %v3249_v39  ;;  %v5551_v61 = vpop.eup %5550 }
 0xf01   :  { %v5553_v9 = vpop.eup %5552  ;;  %v3292_v23 = vsub.f32 1.0, %v5551_v61  ;;  %v3296_v57 = vmul.f32 %v5551_v61, %v6966_v2 }
 0xf02   :  { %5554 = vtanh.f32 %v3288_v29  ;;  %v3289_v8 = vadd.f32 %v3287_v43, %v2257_v6  ;;  %v3293_v10 = vsub.f32 1.0, %v5553_v9  ;;  %v3297_v38 = vmul.f32 %v5553_v9, %v6968_v16 }
 0xf04   :  { %5556 = vtanh.f32 %v3289_v8 }
 0xf0c   :  { %v5555_v37 = vpop.eup %5554 }
 0xf0d   :  { %v3294_v12 = vmul.f32 %v5555_v37, %v3292_v23  ;;  %v5232_v23 = vld [vmem:[#allocation8 + $0x4] ss:$8 sps:$4 sm:$0xff]   ;;  %v5230_v37 = vld [vmem:[#allocation8] ss:$8 sps:$4 sm:$0xff]  }
 0xf0e   :  { %v5557_v44 = vpop.eup %5556 }
 0xf0f   :  { %v3295_v3 = vmul.f32 %v5557_v44, %v3293_v10  ;;  %v7035_v28 = vadd.f32 %v3296_v57, %v3294_v12  ;;  %v5235_v10 = vld [vmem:[#allocation8 + $0x14] ss:$8 sps:$4 sm:$0xff]   ;;  %v5233_v12 = vld [vmem:[#allocation8 + $0x10] ss:$8 sps:$4 sm:$0xff]   ;;  %v5238_v57 = vld [vmem:[#allocation8 + $0x24] ss:$8 sps:$4 sm:$0xff]  }
 0xf10   :  { %v5236_v44 = vld [vmem:[#allocation8 + $0x20] ss:$8 sps:$4 sm:$0xff]  }
 0xf11   :  { %v7037_v18 = vadd.f32 %v3297_v38, %v3295_v3  ;;  %v5241_v3 = vld [vmem:[#allocation8 + $0x34] ss:$8 sps:$4 sm:$0xff]   ;;  %v5239_v38 = vld [vmem:[#allocation8 + $0x30] ss:$8 sps:$4 sm:$0xff]  }
 0xf13   :  { %v3300_v62 = vpack.c.bf16 %v7037_v18, %v7035_v28 }
 0xf15   :  { %3334 = vmatmul.mubr.bf16.vlgmr.msra.gmra.mrb[72].mxu1 %v3300_v62  ;;  %4846 = vmatmul.mubr.bf16.vlgmr.msra.gmra.mrb[72].mxu0 %v3300_v62  ;;  %v5247_v62 = vld [vmem:[#allocation8 + $0x54] ss:$8 sps:$4 sm:$0xff]  }
 0xf16   :  { %3435 = vmatpush1.bf16.msra.mxu1 %v6887_v21  ;;  %4850 = vmatpush3.bf16.msra.mxu0 %v6973_v35 }
 0xf17   :  { %3436 = vmatprep.subr.bf16.mxu1 %v6891_v33  ;;  %4851 = vmatprep.subr.bf16.mxu0 %v7183_v60 }
 0xf18   :  { %3466 = vmatprep.mubr.bf16.mxu1 %v7184_v5  ;;  %4865 = vmatprep.mubr.msk.bf16.mxu0 %vm5764_vm0, %v7183_v60 }
 0xf1a   :  { %3437 = vmatpush1.bf16.msra.mxu1 %v6898_v59  ;;  %4852 = vmatpush3.bf16.msra.mxu0 %v6982_v13 }
 0xf1b   :  { %3438 = vmatprep.subr.bf16.mxu1 %v6902_v19  ;;  %4853 = vmatprep.subr.bf16.mxu0 %v7183_v60 }
 0xf1e   :  { %3439 = vmatpush1.bf16.msra.mxu1 %v6906_v0  ;;  %4854 = vmatpush3.bf16.msra.mxu0 %v6988_v27 }
 0xf1f   :  { %3440 = vmatprep.subr.bf16.mxu1 %v6910_v30  ;;  %4855 = vmatprep.subr.bf16.mxu0 %v7183_v60 }
 0xf22   :  { %3441 = vmatpush1.bf16.msra.mxu1 %v6914_v58  ;;  %4856 = vmatpush3.bf16.msra.mxu0 %v6994_v36 }
 0xf23   :  { %3442 = vmatprep.subr.bf16.mxu1 %v6918_v48  ;;  %4857 = vmatprep.subr.bf16.mxu0 %v7183_v60 }
 0xf26   :  { %3443 = vmatpush1.bf16.msra.mxu1 %v6922_v17  ;;  %4858 = vmatpush3.bf16.msra.mxu0 %v7000_v51 }
 0xf27   :  { %3444 = vmatprep.subr.bf16.mxu1 %v6926_v31  ;;  %4859 = vmatprep.subr.bf16.mxu0 %v7183_v60 }
 0xf2a   :  { %3445 = vmatpush1.bf16.msra.mxu1 %v6930_v53  ;;  %4860 = vmatpush3.bf16.msra.mxu0 %v7006_v15 }
 0xf2b   :  { %3446 = vmatprep.subr.bf16.mxu1 %v6934_v55  ;;  %4861 = vmatprep.subr.bf16.mxu0 %v7183_v60 }
 0xf2e   :  { %3447 = vmatpush1.bf16.msra.mxu1 %v6938_v7  ;;  %4862 = vmatpush3.bf16.msra.mxu0 %v7012_v50 }
 0xf2f   :  { %3448 = vmatprep.subr.bf16.mxu1 %v6942_v26  ;;  %4863 = vmatprep.subr.bf16.mxu0 %v7183_v60 }
 0xf32   :  { %3449 = vmatpush1.bf16.msra.mxu1 %v6946_v54  ;;  %4864 = vmatpush3.bf16.msra.mxu0 %v7018_v1 }
 0xf33   :  { %3675 = vmatprep.subr.bf16.mxu0 %v5232_v23 }
 0xfe8   :  { %v3335_v21 = vpop.f32.mrb[72].mxu1  ;;  %v3378_v33 = vpop.f32.mrb[72].mxu0 }
 0xfe9   :  { %v5002_v59 = vadd.f32 %v6702_v63, %v3335_v21  ;;  %v3337_v19 = vpop.f32.mrb[73].mxu1  ;;  %v4847_v0 = vpop.f32.mrb[73].mxu0  ;;  %v3379_v50 = vadd.f32 %v3378_v33, %v6711_v52  ;;  %v5250_v21 = vld [vmem:[#allocation8 + $0x64] ss:$8 sps:$4 sm:$0xff]   ;;  %v5248_v33 = vld [vmem:[#allocation8 + $0x60] ss:$8 sps:$4 sm:$0xff]  }
 0xfea   :  { %v3339_v30 = vpop.f32.mrb[74].mxu1  ;;  %v3381_v58 = vpop.f32.mrb[74].mxu0  ;;  %v5004_v55 = vadd.f32 %v6704_v25, %v3337_v19  ;;  %v5251_v19 = vld [vmem:[#allocation8 + $0x70] ss:$8 sps:$4 sm:$0xff]   ;;  %v5254_v0 = vld [vmem:[#allocation9 + $0x40] sm:$0xff]  }
 0xfeb   :  { %v4222_v48 = vmul.f32 -1.442695, %v5002_v59  ;;  %v5006_v17 = vadd.f32 %v6702_v63, %v3339_v30  ;;  %v3341_v31 = vpop.f32.mrb[75].mxu1  ;;  %v4848_v53 = vpop.f32.mrb[75].mxu0  ;;  %v3382_v41 = vadd.f32 %v3381_v58, %v6711_v52  ;;  %v5253_v59 = vld [vmem:[#allocation8 + $0x74] ss:$8 sps:$4 sm:$0xff]   ;;  %4454 = vmatprep.subr.bf16.mxu1 %v5254_v0 }
 0xfec   :  { %v5008_v26 = vadd.f32 %v6704_v25, %v3341_v31  ;;  %v4224_v54 = vmul.f32 -1.442695, %v5004_v55  ;;  %v5255_v30 = vld [vmem:[#allocation9] sm:$0xff]   ;;  %v5268_v0 = vld [vmem:[#allocation9 + $0x78] sm:$0xff]  }
 0xfed   :  { %5558 = vpow2.f32 %v4222_v48  ;;  %v4223_v7 = vmul.f32 -1.442695, %v5006_v17 }
 0xfee   :  { %v4225_v2 = vmul.f32 -1.442695, %v5008_v26 }
 0xfef   :  { %5560 = vpow2.f32 %v4223_v7 }
 0xff0   :  { %5562 = vpow2.f32 %v4224_v54 }
 0xff1   :  { %5564 = vpow2.f32 %v4225_v2 }
 0xff7   :  { %v5559_v16 = vpop.eup %5558 }
 0xff8   :  { %v3399_v35 = vadd.f32 1.0, %v5559_v16 }
 0xff9   :  { %v5561_v13 = vpop.eup %5560 }
 0xffa   :  { %5566 = vrcp.f32 %v3399_v35  ;;  %v3400_v27 = vadd.f32 1.0, %v5561_v13  ;;  %v5563_v36 = vpop.eup %5562 }
 0xffb   :  { %v5565_v51 = vpop.eup %5564  ;;  %v3413_v15 = vadd.f32 1.0, %v5563_v36 }
 0xffc   :  { %5568 = vrcp.f32 %v3400_v27  ;;  %v3414_v1 = vadd.f32 1.0, %v5565_v51 }
 0xffd   :  { %5570 = vrcp.f32 %v3413_v15 }
 0xffe   :  { %5572 = vrcp.f32 %v3414_v1 }
0x1004   :  { %v5567_v4 = vpop.eup %5566 }
0x1005   :  { %v3419_v24 = vmul.f32 %v5567_v4, %v3379_v50 }
0x1006   :  { %v5569_v40 = vpop.eup %5568 }
0x1007   :  { %v3421_v56 = vadd.f32 %v3419_v24, %v2262_v11  ;;  %v3420_v14 = vmul.f32 %v5569_v40, %v3382_v41  ;;  %v5571_v49 = vpop.eup %5570 }
0x1008   :  { %v5573_v32 = vpop.eup %5572  ;;  %v3425_v45 = vsub.f32 1.0, %v5571_v49  ;;  %v3429_v6 = vmul.f32 %v5571_v49, %v7035_v28  ;;  %v5242_v28 = vld [vmem:[#allocation8 + $0x40] ss:$8 sps:$4 sm:$0xff]  }
0x1009   :  { %5574 = vtanh.f32 %v3421_v56  ;;  %v3422_v22 = vadd.f32 %v3420_v14, %v2265_v42  ;;  %v3426_v47 = vsub.f32 1.0, %v5573_v32  ;;  %v3430_v8 = vmul.f32 %v5573_v32, %v7037_v18  ;;  %v5244_v18 = vld [vmem:[#allocation8 + $0x44] ss:$8 sps:$4 sm:$0xff]  }
0x100a   :  { %v7191_v32 = vld [vmem:[#allocation18_spill] sm:$0xff] }
0x100b   :  { %5576 = vtanh.f32 %v3422_v22 }
0x1013   :  { %v5575_v39 = vpop.eup %5574 }
0x1014   :  { %v3427_v34 = vmul.f32 %v5575_v39, %v3425_v45  ;;  %v2273_v45 = vadd.f32 %v7191_v32, %v6714_v46 }
0x1015   :  { %v5577_v29 = vpop.eup %5576 }
0x1016   :  { %v3428_v43 = vmul.f32 %v5577_v29, %v3426_v47  ;;  %v7086_v61 = vadd.f32 %v3429_v6, %v3427_v34 }
0x1018   :  { %v7088_v20 = vadd.f32 %v3430_v8, %v3428_v43 }
0x101a   :  { %v3433_v9 = vpack.c.bf16 %v7088_v20, %v7086_v61 }
0x101c   :  { %3467 = vmatmul.mubr.bf16.vlgmr.msra.gmra.mrb[76].mxu1 %v3433_v9  ;;  %4866 = vmatmul.mubr.bf16.vlgmr.msra.gmra.mrb[76].mxu0 %v3433_v9 }
0x101d   :  { %3707 = vmatprep.mubr.bf16.mxu0 %v7184_v5  ;;  %3676 = vmatpush1.bf16.msra.mxu0 %v5230_v37  ;;  %v5245_v5 = vld [vmem:[#allocation8 + $0x50] ss:$8 sps:$4 sm:$0xff]  }
0x101e   :  { %3677 = vmatprep.subr.bf16.mxu0 %v5235_v10  ;;  %4455 = vmatpush3.bf16.msra.mxu1 %v5255_v30  ;;  %v5269_v30 = vld [vmem:[#allocation9 + $0x38] sm:$0xff]  }
0x1021   :  { %3678 = vmatpush1.bf16.msra.mxu0 %v5233_v12 }
0x1022   :  { %3679 = vmatprep.subr.bf16.mxu0 %v5238_v57 }
0x1025   :  { %3680 = vmatpush1.bf16.msra.mxu0 %v5236_v44 }
0x1026   :  { %3681 = vmatprep.subr.bf16.mxu0 %v5241_v3  ;;  %v5256_v3 = vld [vmem:[#allocation9 + $0x48] sm:$0xff]  }
0x1027   :  { %4456 = vmatprep.subr.bf16.mxu1 %v5256_v3 }
0x1029   :  { %3682 = vmatpush1.bf16.msra.mxu0 %v5239_v38  ;;  %v5257_v38 = vld [vmem:[#allocation9 + $0x8] sm:$0xff]  }
0x102a   :  { %3683 = vmatprep.subr.bf16.mxu0 %v5244_v18  ;;  %4457 = vmatpush3.bf16.msra.mxu1 %v5257_v38  ;;  %v5259_v18 = vld [vmem:[#allocation9 + $0x10] sm:$0xff]  }
0x102d   :  { %3684 = vmatpush1.bf16.msra.mxu0 %v5242_v28  ;;  %v5258_v28 = vld [vmem:[#allocation9 + $0x50] sm:$0xff]  }
0x102e   :  { %3685 = vmatprep.subr.bf16.mxu0 %v5247_v62  ;;  %4458 = vmatprep.subr.bf16.mxu1 %v5258_v28  ;;  %v5261_v62 = vld [vmem:[#allocation9 + $0x18] sm:$0xff]  }
0x102f   :  { %4459 = vmatpush3.bf16.msra.mxu1 %v5259_v18 }
0x1031   :  { %3686 = vmatpush1.bf16.msra.mxu0 %v5245_v5  ;;  %v5263_v5 = vld [vmem:[#allocation9 + $0x20] sm:$0xff]  }
0x1032   :  { %3687 = vmatprep.subr.bf16.mxu0 %v5250_v21  ;;  %v5264_v21 = vld [vmem:[#allocation9 + $0x68] sm:$0xff]  }
0x1035   :  { %3688 = vmatpush1.bf16.msra.mxu0 %v5248_v33  ;;  %v5265_v33 = vld [vmem:[#allocation9 + $0x28] sm:$0xff]  }
0x1036   :  { %3689 = vmatprep.subr.bf16.mxu0 %v5253_v59  ;;  %v5266_v59 = vld [vmem:[#allocation9 + $0x70] sm:$0xff]  }
0x1039   :  { %3690 = vmatpush1.bf16.msra.mxu0 %v5251_v19  ;;  %v5267_v19 = vld [vmem:[#allocation9 + $0x30] sm:$0xff]  }
0x103a   :  { %4869 = vmatprep.subr.bf16.mxu0 %v7183_v60 }
0x10ef   :  { %v3468_v58 = vpop.f32.mrb[76].mxu1  ;;  %v3511_v48 = vpop.f32.mrb[76].mxu0 }
0x10f0   :  { %v5010_v17 = vadd.f32 %v6702_v63, %v3468_v58  ;;  %v3470_v31 = vpop.f32.mrb[77].mxu1  ;;  %v4867_v53 = vpop.f32.mrb[77].mxu0  ;;  %v3512_v41 = vadd.f32 %v3511_v48, %v6711_v52  ;;  %v5270_v58 = vld [vmem:[%s7165_s9] sm:$0xff]  }
0x10f1   :  { %v3472_v55 = vpop.f32.mrb[78].mxu1  ;;  %v3514_v7 = vpop.f32.mrb[78].mxu0  ;;  %v5012_v35 = vadd.f32 %v6704_v25, %v3470_v31  ;;  %v3583_v48 = vld [vmem:[%s7162_s6] sm:$0x3]  ;;  %v7193_v53 = vld [vmem:[#allocation16_spill] sm:$0xff] }
0x10f2   :  { %v4226_v26 = vmul.f32 -1.442695, %v5010_v17  ;;  %v5014_v54 = vadd.f32 %v6702_v63, %v3472_v55  ;;  %v3474_v2 = vpop.f32.mrb[79].mxu1  ;;  %v4868_v16 = vpop.f32.mrb[79].mxu0  ;;  %v3515_v22 = vadd.f32 %v3514_v7, %v6711_v52  ;;  %v7192_v17 = vld [vmem:[#allocation15_spill] sm:$0xff]  ;;  %v3592_v55 = vrot.slane %v3583_v48, %v7193_v53 }
0x10f3   :  { %v5016_v27 = vadd.f32 %v6704_v25, %v3474_v2  ;;  %v4228_v36 = vmul.f32 -1.442695, %v5012_v35  ;;  %v7190_v25 = vld [vmem:[#allocation17_spill] sm:$0xff]  ;;  %v3588_v31 = vrot.slane %v3583_v48, %v7192_v17 }
0x10f4   :  { %5578 = vpow2.f32 %v4226_v26  ;;  %v4227_v13 = vmul.f32 -1.442695, %v5014_v54  ;;  %v2270_v56 = vadd.f32 %v7190_v25, %v6714_v46 }
0x10f5   :  { %v4229_v51 = vmul.f32 -1.442695, %v5016_v27 }
0x10f6   :  { %5580 = vpow2.f32 %v4227_v13 }
0x10f7   :  { %5582 = vpow2.f32 %v4228_v36 }
0x10f8   :  { %5584 = vpow2.f32 %v4229_v51 }
0x10fe   :  { %v5579_v15 = vpop.eup %5578 }
0x10ff   :  { %v3532_v50 = vadd.f32 1.0, %v5579_v15 }
0x1100   :  { %v5581_v1 = vpop.eup %5580 }
0x1101   :  { %5586 = vrcp.f32 %v3532_v50  ;;  %v3533_v4 = vadd.f32 1.0, %v5581_v1  ;;  %v5583_v63 = vpop.eup %5582 }
0x1102   :  { %v5585_v11 = vpop.eup %5584  ;;  %v3546_v24 = vadd.f32 1.0, %v5583_v63 }
0x1103   :  { %5588 = vrcp.f32 %v3533_v4  ;;  %v3547_v40 = vadd.f32 1.0, %v5585_v11 }
0x1104   :  { %5590 = vrcp.f32 %v3546_v24 }
0x1105   :  { %5592 = vrcp.f32 %v3547_v40 }
0x110b   :  { %v5587_v42 = vpop.eup %5586 }
0x110c   :  { %v3552_v14 = vmul.f32 %v5587_v42, %v3512_v41 }
0x110d   :  { %v5589_v49 = vpop.eup %5588 }
0x110e   :  { %v3554_v39 = vadd.f32 %v3552_v14, %v2270_v56  ;;  %v3553_v47 = vmul.f32 %v5589_v49, %v3515_v22  ;;  %v5591_v6 = vpop.eup %5590 }
0x110f   :  { %v5593_v29 = vpop.eup %5592  ;;  %v3558_v43 = vsub.f32 1.0, %v5591_v6  ;;  %v3562_v37 = vmul.f32 %v5591_v6, %v7086_v61  ;;  %v5260_v61 = vld [vmem:[#allocation9 + $0x58] sm:$0xff]  }
0x1110   :  { %5594 = vtanh.f32 %v3554_v39  ;;  %v3555_v34 = vadd.f32 %v3553_v47, %v2273_v45  ;;  %v3559_v9 = vsub.f32 1.0, %v5593_v29  ;;  %v3563_v12 = vmul.f32 %v5593_v29, %v7088_v20  ;;  %4460 = vmatprep.subr.bf16.mxu1 %v5260_v61  ;;  %v5262_v20 = vld [vmem:[#allocation9 + $0x60] sm:$0xff]  }
0x1111   :  { %4461 = vmatpush3.bf16.msra.mxu1 %v5261_v62 }
0x1112   :  { %5596 = vtanh.f32 %v3555_v34  ;;  %4462 = vmatprep.subr.bf16.mxu1 %v5262_v20 }
0x1115   :  { %4463 = vmatpush3.bf16.msra.mxu1 %v5263_v5 }
0x1116   :  { %4464 = vmatprep.subr.bf16.mxu1 %v5264_v21 }
0x1119   :  { %4465 = vmatpush3.bf16.msra.mxu1 %v5265_v33 }
0x111a   :  { %v5595_v8 = vpop.eup %5594  ;;  %4466 = vmatprep.subr.bf16.mxu1 %v5266_v59 }
0x111b   :  { %v3560_v23 = vmul.f32 %v5595_v8, %v3558_v43 }
0x111c   :  { %v5597_v10 = vpop.eup %5596 }
0x111d   :  { %v3561_v52 = vmul.f32 %v5597_v10, %v3559_v9  ;;  %v3564_v57 = vadd.f32 %v3562_v37, %v3560_v23  ;;  %4467 = vmatpush3.bf16.msra.mxu1 %v5267_v19  ;;  %v5271_v9 = vld [vmem:[%s7165_s9 + $0x8] sm:$0xff]   ;;  %v5272_v23 = vld [vmem:[%s7165_s9 + $0x10] sm:$0xff]   ;;  %v5273_v37 = vld [vmem:[%s7165_s9 + $0x18] sm:$0xff]  }
0x111e   :  { %4468 = vmatprep.subr.bf16.mxu1 %v5268_v0  ;;  %v5274_v10 = vld [vmem:[%s7165_s9 + $0x20] sm:$0xff]  }
0x111f   :  { %v3565_v46 = vadd.f32 %v3563_v12, %v3561_v52  ;;  %v5275_v52 = vld [vmem:[%s7165_s9 + $0x28] sm:$0xff]   ;;  %v5276_v12 = vld [vmem:[%s7165_s9 + $0x30] sm:$0xff]  }
0x1121   :  { %v3566_v44 = vpack.c.bf16 %v3565_v46, %v3564_v57  ;;  %4469 = vmatpush3.bf16.msra.mxu1 %v5269_v30  ;;  %v5277_v57 = vld [vmem:[%s7165_s9 + $0x38] sm:$0xff]  }
0x1123   :  { %3708 = vmatmul.mubr.bf16.vlgmr.msra.gmra.mrb[80].mxu0 %v3566_v44  ;;  %v4250_v44 = vld [vmem:[%s7164_s8] ss:$0 sm:$0xff] }
0x1124   :  { %4885 = vmatprep.mubr.msk.bf16.mxu0 %vm5764_vm0, %v7183_v60  ;;  %4870 = vmatpush3.bf16.msra.mxu0 %v5270_v58 }
0x1125   :  { %4871 = vmatprep.subr.bf16.mxu0 %v7183_v60 }
0x1128   :  { %4872 = vmatpush3.bf16.msra.mxu0 %v5271_v9 }
0x1129   :  { %4873 = vmatprep.subr.bf16.mxu0 %v7183_v60 }
0x112c   :  { %4874 = vmatpush3.bf16.msra.mxu0 %v5272_v23 }
0x112d   :  { %4875 = vmatprep.subr.bf16.mxu0 %v7183_v60 }
0x1130   :  { %4876 = vmatpush3.bf16.msra.mxu0 %v5273_v37 }
0x1131   :  { %4877 = vmatprep.subr.bf16.mxu0 %v7183_v60 }
0x1134   :  { %4878 = vmatpush3.bf16.msra.mxu0 %v5274_v10 }
0x1135   :  { %4879 = vmatprep.subr.bf16.mxu0 %v7183_v60 }
0x1138   :  { %4880 = vmatpush3.bf16.msra.mxu0 %v5275_v52 }
0x1139   :  { %4881 = vmatprep.subr.bf16.mxu0 %v7183_v60 }
0x113c   :  { %4882 = vmatpush3.bf16.msra.mxu0 %v5276_v12 }
0x113d   :  { %4883 = vmatprep.subr.bf16.mxu0 %v7183_v60 }
0x1140   :  { %4884 = vmatpush3.bf16.msra.mxu0 %v5277_v57 }
0x11f6   :  { %v3709_v7 = vpop.f32.mrb[80].mxu0 }
0x11f7   :  { %v3710_v26 = vadd.f32 %v3709_v7, %v3588_v31  ;;  %v3711_v54 = vpop.f32.mrb[81].mxu0 }
0x11f8   :  { %v3712_v2 = vadd.f32 %v3711_v54, %v3592_v55  ;;  %v3713_v16 = vpop.f32.mrb[82].mxu0 }
0x11f9   :  { %v3722_v35 = vmul.f32 1.442695, %v3710_v26  ;;  %v3714_v13 = vadd.f32 %v3713_v16, %v3588_v31  ;;  %v3715_v27 = vpop.f32.mrb[83].mxu0  ;;  %vm3718_vm1 = vcmp.gt.f32.partialorder %v3710_v26, 0.0 }
0x11fa   :  { %v3724_v36 = vmul.f32 1.442695, %v3712_v2  ;;  %v3716_v51 = vadd.f32 %v3715_v27, %v3592_v55  ;;  %vm3719_vm2 = vcmp.gt.f32.partialorder %v3712_v2, 0.0  ;;  %v4269_v55 = vld [vmem:[%s7166_s10] ss:$0 sm:$0xff] }
0x11fb   :  { %5598 = vpow2.f32 %v3722_v35  ;;  %v3726_v15 = vmul.f32 1.442695, %v3714_v13  ;;  %vm3720_vm3 = vcmp.gt.f32.partialorder %v3714_v13, 0.0 }
0x11fc   :  { %5600 = vpow2.f32 %v3724_v36  ;;  %v3728_v50 = vmul.f32 1.442695, %v3716_v51  ;;  %vm3721_vm4 = vcmp.gt.f32.partialorder %v3716_v51, 0.0 }
0x11fd   :  { %5602 = vpow2.f32 %v3726_v15 }
0x11fe   :  { %5604 = vpow2.f32 %v3728_v50 }
0x1205   :  { %v5599_v1 = vpop.eup %5598 }
0x1206   :  { %v5601_v4 = vpop.eup %5600  ;;  %v4246_v63 = vadd.f32 -1.0, %v5599_v1 }
0x1207   :  { %v5603_v11 = vpop.eup %5602  ;;  %v4247_v24 = vadd.f32 -1.0, %v5601_v4 }
0x1208   :  { %v5605_v41 = vpop.eup %5604  ;;  %v3734_v40 = vmul.f32 1.6732632, %v4246_v63  ;;  %v4248_v42 = vadd.f32 -1.0, %v5603_v11 }
0x1209   :  { %v3735_v25 = vmul.f32 1.6732632, %v4247_v24  ;;  %v4249_v56 = vadd.f32 -1.0, %v5605_v41 }
0x120a   :  { %v3738_v14 = vsel %vm3718_vm1, %v3710_v26, %v3734_v40  ;;  %v3736_v22 = vmul.f32 1.6732632, %v4248_v42 }
0x120b   :  { %v3739_v49 = vsel %vm3719_vm2, %v3712_v2, %v3735_v25  ;;  %v3737_v32 = vmul.f32 1.6732632, %v4249_v56  ;;  %v3742_v39 = vmul.f32 1.050701, %v3738_v14 }
0x120c   :  { %v3740_v45 = vsel %vm3720_vm3, %v3714_v13, %v3736_v22  ;;  %v3743_v6 = vmul.f32 1.050701, %v3739_v49 }
0x120d   :  { %v3744_v47 = vmul.f32 1.050701, %v3740_v45  ;;  %v3741_v34 = vsel %vm3721_vm4, %v3716_v51, %v3737_v32 }
0x120e   :  { %v3745_v29 = vmul.f32 1.050701, %v3741_v34 }
0x120f   :  { %v3746_v43 = vpack.c.bf16 %v3744_v47, %v3742_v39 }
0x1210   :  { %v3747_v8 = vpack.c.bf16 %v3745_v29, %v3743_v6 }
0x1212   :  { %3915 = vmatprep.mubr.bf16.mxu1 %v3747_v8 }
0x1213   :  { %3916 = vmatmul.mubr.bf16.vlgmr.msra.gmra.mrb[80].mxu1 %v3746_v43 }
0x12e6   :  { %v4470_v46 = vpop.f32.mrb[80].mxu1 }
0x12e7   :  { %v4471_v3 = vpop.f32.mrb[81].mxu1 }
0x12e8   :  { %v4472_v38 = vadd.f32 %v4471_v3, %v4470_v46  ;;  %v4473_v28 = vpop.f32.mrb[82].mxu1 }
0x12e9   :  { %v4474_v18 = vpop.f32.mrb[83].mxu1 }
0x12ea   :  { %v3918_v61 = vadd.f32 %v4472_v38, %v4250_v44  ;;  %v4475_v62 = vadd.f32 %v4474_v18, %v4473_v28 }
0x12ec   :  { %v3926_v20 = vmul.f32 1.442695, %v3918_v61  ;;  %v3921_v5 = vadd.f32 %v4475_v62, %v4250_v44  ;;  %vm3924_vm5 = vcmp.gt.f32.partialorder %v3918_v61, 0.0 }
0x12ee   :  { %5606 = vpow2.f32 %v3926_v20  ;;  %v3928_v60 = vmul.f32 1.442695, %v3921_v5  ;;  %vm3925_vm6 = vcmp.gt.f32.partialorder %v3921_v5, 0.0 }
0x12f0   :  { %5608 = vpow2.f32 %v3928_v60 }
0x12f8   :  { %v5607_v21 = vpop.eup %5606 }
0x12f9   :  { %v4267_v33 = vadd.f32 -1.0, %v5607_v21 }
0x12fa   :  { %v5609_v59 = vpop.eup %5608 }
0x12fb   :  { %v3932_v19 = vmul.f32 1.6732632, %v4267_v33  ;;  %v4268_v0 = vadd.f32 -1.0, %v5609_v59 }
0x12fd   :  { %v3934_v30 = vsel %vm3924_vm5, %v3918_v61, %v3932_v19  ;;  %v3933_v58 = vmul.f32 1.6732632, %v4268_v0 }
0x12fe   :  { %v3936_v17 = vmul.f32 1.050701, %v3934_v30 }
0x12ff   :  { %v3935_v48 = vsel %vm3925_vm6, %v3921_v5, %v3933_v58 }
0x1300   :  { %v3937_v31 = vmul.f32 1.050701, %v3935_v48 }
0x1302   :  { %v3938_v53 = vpack.c.bf16 %v3937_v31, %v3936_v17 }
0x1304   :  { %4886 = vmatmul.mubr.bf16.vlgmr.msra.gmra.mrb[84].mxu0 %v3938_v53 }
0x13d7   :  { %v4044_v7 = vpop.f32.mrb[84].mxu0 }
0x13d8   :  { %v4045_v26 = vadd.f32 %v4269_v55, %v4044_v7  ;;  %v4887_v54 = vpop.f32.mrb[85].mxu0 }
0x13d9   :  { %v4047_v2 = vpop.f32.mrb[86].mxu0 }
0x13da   :  { %4051 = vst [vmem:[%s7167_s11] sm:$0xff] %v4045_v26  ;;  %v4048_v16 = vadd.f32 %v4269_v55, %v4047_v2  ;;  %v4888_v35 = vpop.f32.mrb[87].mxu0 }
0x13dc   :  { %4052 = vst [vmem:[%s7167_s11 + $0x8] sm:$0xff] %v4048_v16 }
0x13dd   :  { %4057 = vsyncpa [#allocation5], 1 }
0x13de   :  { %4058 = vsyncpa [#allocation7], 1 }
0x13df   :  { %4059 = vsyncpa [#allocation10], 1 }

</bundles_post_ra>
